<compile_context>
chip_gen: v7x
topology: tpu7x:2x2x1
jax: 0.10.0
libtpu: 0.0.40
codegen_flags: <defaults>
</compile_context>

<pallas_src>
import functools

import jax
import jax.numpy as jnp
from jax.experimental import pallas as pl
from jax.experimental.pallas import tpu as pltpu


# ----------------------------------------------------------------------------
# Pallas kernels
# ----------------------------------------------------------------------------
def _gemm_kernel(w_ref, x_ref, b_ref, *rest, relu, has_res):
    """out[Cout, bn] = relu?(w @ x + b (+ residual)); f32 accumulation."""
    if has_res:
        res_ref, o_ref = rest
    else:
        (o_ref,) = rest
    acc = jnp.dot(w_ref[...], x_ref[...], preferred_element_type=jnp.float32)
    acc = acc + b_ref[...].astype(jnp.float32)
    if has_res:
        acc = acc + res_ref[...].astype(jnp.float32)
    if relu:
        acc = jnp.maximum(acc, 0.0)
    o_ref[...] = acc.astype(o_ref.dtype)


def _grouped_gemm_kernel(w_ref, x_ref, b_ref, o_ref):
    """Grid step g: out[:, g-block] = w[g] @ x[:, g-block] + b[g]."""
    acc = jnp.dot(w_ref[0], x_ref[...], preferred_element_type=jnp.float32)
    acc = acc + b_ref[0].astype(jnp.float32)
    o_ref[...] = acc.astype(o_ref.dtype)


def _pick_block_n(M, K, Cout, itemsize, vmem_budget=12 * 1024 * 1024, cap=1024):
    """Largest lane tile (multiple of 128) dividing M within a VMEM budget;
    keep >=2 grid steps when possible so both v7x TensorCores get work."""
    if M % 128 != 0 or M <= 128:
        return M, 1                      # tiny / ragged level: one full block

    def footprint(bn):
        # double-buffered activation + output blocks, plus resident weights
        return 2 * K * bn * itemsize + 2 * Cout * bn * 4 + Cout * K * itemsize

    bn = min(M, cap)
    while bn > 128 and (M % bn != 0 or footprint(bn) > vmem_budget):
        bn -= 128
    if bn == M and bn >= 256 and (bn // 2) % 128 == 0:
        bn //= 2                         # >=2 balanced grid steps (v7x megacore)
    return bn, M // bn


def conv_gemm(w, x, b, residual=None, *, relu=False, out_dtype=None):
    """out[Cout, M] = relu?(w[Cout,K] @ x[K,M] + b[Cout] (+ residual[Cout,M]))."""
    Cout, K = w.shape
    M = x.shape[1]
    out_dtype = out_dtype or x.dtype
    bn, grid_m = _pick_block_n(M, K, Cout, jnp.dtype(x.dtype).itemsize)
    b2 = b.reshape(Cout, 1).astype(jnp.float32)

    in_specs = [
        pl.BlockSpec((Cout, K), lambda j: (0, 0)),
        pl.BlockSpec((K, bn), lambda j: (0, j)),
        pl.BlockSpec((Cout, 1), lambda j: (0, 0)),
    ]
    args = [w, x, b2]
    if residual is not None:
        in_specs.append(pl.BlockSpec((Cout, bn), lambda j: (0, j)))
        args.append(residual)

    kernel = functools.partial(_gemm_kernel, relu=relu,
                               has_res=residual is not None)
    return pl.pallas_call(
        kernel,
        out_shape=jax.ShapeDtypeStruct((Cout, M), out_dtype),
        grid=(grid_m,),
        in_specs=in_specs,
        out_specs=pl.BlockSpec((Cout, bn), lambda j: (0, j)),
        compiler_params=pltpu.CompilerParams(
            dimension_semantics=("parallel",),
            vmem_limit_bytes=32 * 1024 * 1024,   # explicit; within v5e/v6e/v7x limits
        ),
    )(*args)


def grouped_conv_gemm(w_stack, b_stack, x_groups, *, out_dtype=None):
    """G small GEMMs with identical [Cout, K] weight shape (different weights
    and different M_g) in ONE pallas_call: grid over groups, each group's
    columns padded to a common lane-dense block.  Falls back to per-group
    calls when the levels are big (launch overhead no longer dominates)."""
    G, Cout, K = w_stack.shape
    out_dtype = out_dtype or x_groups[0].dtype
    max_m = max(x.shape[1] for x in x_groups)
    block_n = max(128, ((max_m + 127) // 128) * 128)
    if block_n > 512:
        return [conv_gemm(w_stack[g], x_groups[g], b_stack[g, :, 0],
                          out_dtype=out_dtype) for g in range(G)]

    xs = [jnp.pad(x, ((0, 0), (0, block_n - x.shape[1]))) for x in x_groups]
    xcat = jnp.concatenate(xs, axis=1)                    # [K, G*block_n]
    out = pl.pallas_call(
        _grouped_gemm_kernel,
        out_shape=jax.ShapeDtypeStruct((Cout, G * block_n), out_dtype),
        grid=(G,),
        in_specs=[
            pl.BlockSpec((1, Cout, K), lambda g: (g, 0, 0)),
            pl.BlockSpec((K, block_n), lambda g: (0, g)),
            pl.BlockSpec((1, Cout, 1), lambda g: (g, 0, 0)),
        ],
        out_specs=pl.BlockSpec((Cout, block_n), lambda g: (0, g)),
        compiler_params=pltpu.CompilerParams(
            dimension_semantics=("parallel",),
            vmem_limit_bytes=32 * 1024 * 1024,
        ),
    )(w_stack, xcat, b_stack)
    return [out[:, g * block_n: g * block_n + x.shape[1]]
            for g, x in enumerate(x_groups)]


# ----------------------------------------------------------------------------
# JAX glue: channels-first im2col, conv wrappers, nearest upsample
# ----------------------------------------------------------------------------
def _im2col3x3_cf(x, stride):
    """x: [Cin, N, H, W] -> (patches [9*Cin, N*Ho*Wo], (N, Ho, Wo)); 3x3, pad=1."""
    Cin, N, H, W = x.shape
    Ho = (H + 2 - 3) // stride + 1
    Wo = (W + 2 - 3) // stride + 1
    xp = jnp.pad(x, ((0, 0), (0, 0), (1, 1), (1, 1)))
    taps = []
    for ky in range(3):
        for kx in range(3):
            taps.append(
                xp[:, :, ky:ky + stride * Ho:stride, kx:kx + stride * Wo:stride]
                .reshape(Cin, N * Ho * Wo))
    return jnp.concatenate(taps, axis=0), (N, Ho, Wo)


def conv3x3_cf(x, w_mat, b, *, stride=1, relu=False, out_dtype=None):
    # w_mat: [Cout, 9*Cin], tap-major columns (ky, kx, cin)
    patches, (n, ho, wo) = _im2col3x3_cf(x, stride)
    out = conv_gemm(w_mat, patches, b, relu=relu, out_dtype=out_dtype)
    return out.reshape(w_mat.shape[0], n, ho, wo)


def conv1x1_cf(x, w_mat, b, *, residual=None, relu=False, out_dtype=None):
    Cin, N, H, W = x.shape
    res = None if residual is None else residual.reshape(residual.shape[0], N * H * W)
    out = conv_gemm(w_mat, x.reshape(Cin, N * H * W), b,
                    residual=res, relu=relu, out_dtype=out_dtype)
    return out.reshape(w_mat.shape[0], N, H, W)


def upsample_nearest_cf(x, out_hw):
    # exact integer-factor nearest upsample == F.interpolate(mode="nearest")
    H, W = out_hw
    sh, sw = H // x.shape[2], W // x.shape[3]
    return jnp.repeat(jnp.repeat(x, sh, axis=2), sw, axis=3)


# ----------------------------------------------------------------------------
# Parameters (deterministic, in-script)
# ----------------------------------------------------------------------------
def init_params(key, backbone_cfg, in_channels_list, fpn_channels,
                param_dtype=jnp.bfloat16):
    params = {"backbone": [], "lateral": []}
    for cin, cout in backbone_cfg:
        key, kw, kb = jax.random.split(key, 3)
        scale = 1.0 / jnp.sqrt(9.0 * cin)
        params["backbone"].append(
            ((jax.random.normal(kw, (cout, 9 * cin), jnp.float32) * scale
              ).astype(param_dtype),
             jax.random.normal(kb, (cout,), jnp.float32) * 0.01))
    for cin in in_channels_list:
        key, kw, kb = jax.random.split(key, 3)
        scale = 1.0 / jnp.sqrt(float(cin))
        params["lateral"].append(
            ((jax.random.normal(kw, (fpn_channels, cin), jnp.float32) * scale
              ).astype(param_dtype),
             jax.random.normal(kb, (fpn_channels,), jnp.float32) * 0.01))
    ws, bs = [], []
    for _ in in_channels_list:
        key, kw, kb = jax.random.split(key, 3)
        scale = 1.0 / jnp.sqrt(9.0 * fpn_channels)
        ws.append((jax.random.normal(kw, (fpn_channels, 9 * fpn_channels),
                                     jnp.float32) * scale).astype(param_dtype))
        bs.append(jax.random.normal(kb, (fpn_channels, 1), jnp.float32) * 0.01)
    params["output_w"] = jnp.stack(ws)          # [G, Cfpn, 9*Cfpn]
    params["output_b"] = jnp.stack(bs)          # [G, Cfpn, 1]
    return params


# ----------------------------------------------------------------------------
# Forward pass (mirrors BackboneWithFPN.forward)
# ----------------------------------------------------------------------------
def backbone_with_fpn_forward(params, x_nchw, act_dtype=jnp.bfloat16):
    # NCHW -> [C, N, H, W]: only the two leading (non-tiled) axes are swapped.
    x = jnp.transpose(x_nchw, (1, 0, 2, 3)).astype(act_dtype)

    # ---- synthetic backbone: stride-2 3x3 conv + ReLU per stage -------------
    feats = []
    n_stages = len(params["backbone"])
    for stage_idx, (w, b) in enumerate(params["backbone"]):
        x = conv3x3_cf(x, w, b, stride=2, relu=True)
        if stage_idx >= n_stages - 3:   # last 3 stages -> p3 (s8), p4 (s16), p5 (s32)
            feats.append(x)

    # ---- FeaturePyramidNetwork (torchvision semantics) -----------------------
    # Top-down chain; "lateral + upsample(top)" is fused into the lateral
    # 1x1-conv kernel epilogue (no separate add kernel).
    inners = [None] * len(feats)
    w_l, b_l = params["lateral"][-1]
    inners[-1] = conv1x1_cf(feats[-1], w_l, b_l)
    for idx in range(len(feats) - 2, -1, -1):
        top_down = upsample_nearest_cf(inners[idx + 1], feats[idx].shape[2:])
        w_l, b_l = params["lateral"][idx]
        inners[idx] = conv1x1_cf(feats[idx], w_l, b_l, residual=top_down)

    # All three 3x3 output convs batched into a single pallas_call.
    patch_groups, shapes = [], []
    for inner in inners:
        patches, (n, ho, wo) = _im2col3x3_cf(inner, 1)
        patch_groups.append(patches)
        shapes.append((n, ho, wo))
    outs = grouped_conv_gemm(params["output_w"], params["output_b"],
                             patch_groups, out_dtype=jnp.float32)

    names = ["p3", "p4", "p5"]
    result = {}
    for name, o, (n, ho, wo) in zip(names, outs, shapes):
        cf = o.reshape(params["output_w"].shape[1], n, ho, wo)
        result[name] = jnp.transpose(cf, (1, 0, 2, 3))   # -> NCHW like PyTorch
    return result


# ----------------------------------------------------------------------------
if __name__ == "__main__":
    # Synthetic backbone config: stem + 4 stages, each /2 in space.
    # p3/p4/p5 channel counts stand in for regnet_x_400mf's [64, 160, 400].
    backbone_cfg = [(3, 16), (16, 24), (24, 32), (32, 64), (64, 128)]
    in_channels_list = [32, 64, 128]
    fpn_channels = 32

    key = jax.random.PRNGKey(0)
    key, kx, kp = jax.random.split(key, 3)
    x = jax.random.normal(kx, (2, 3, 64, 64), jnp.float32)   # NCHW like PyTorch
    params = init_params(kp, backbone_cfg, in_channels_list, fpn_channels)

    fwd = jax.jit(backbone_with_fpn_forward)
    out = fwd(params, x)
    for name in ("p3", "p4", "p5"):
        jax.block_until_ready(out[name])

    # sanity: FPN outputs all have fpn_channels channels at strides 8/16/32
    assert out["p3"].shape == (2, fpn_channels, 8, 8)
    assert out["p4"].shape == (2, fpn_channels, 4, 4)
    assert out["p5"].shape == (2, fpn_channels, 2, 2)
    assert out["p3"].dtype == jnp.float32

    print("KERNEL_OK")
</pallas_src>

<mosaic_0001>
module attributes {stable_mosaic.version = 11 : i64} {
  func.func @_gemm_kernel(%arg0: i32, %arg1: memref<16x27xbf16, #tpu.memory_space<vmem>>, %arg2: memref<27x1024xbf16, #tpu.memory_space<vmem>>, %arg3: memref<16x1xf32, #tpu.memory_space<vmem>>, %arg4: memref<16x1024xbf16, #tpu.memory_space<vmem>>) attributes {dimension_semantics = [#tpu.dimension_semantics<parallel>], iteration_bounds = array<i64: 2>, scalar_prefetch = 0 : i64, scratch_operands = 0 : i64, tpu.core_type = #tpu.core_type<tc>, window_params = [{pipeline_mode = #tpu.pipeline_mode<synchronous>, transform_indices = @transform_0, window_bounds = array<i64: 16, 27>}, {transform_indices = @transform_1, window_bounds = array<i64: 27, 1024>}, {pipeline_mode = #tpu.pipeline_mode<synchronous>, transform_indices = @transform_2, window_bounds = array<i64: 16, 1>}, {transform_indices = @transform_3, window_bounds = array<i64: 16, 1024>}]} {
    %c0 = arith.constant 0 : index
    %c0_0 = arith.constant 0 : index
    %0 = vector.load %arg1[%c0, %c0_0] : memref<16x27xbf16, #tpu.memory_space<vmem>>, vector<16x27xbf16>
    %c0_1 = arith.constant 0 : index
    %c0_2 = arith.constant 0 : index
    %1 = vector.load %arg2[%c0_1, %c0_2] : memref<27x1024xbf16, #tpu.memory_space<vmem>>, vector<27x1024xbf16>
    %cst = arith.constant dense<0.000000e+00> : vector<16x1024xf32>
    %2 = tpu.matmul %0, %1, %cst {dimension_numbers = #tpu.dot_dimension_numbers<[1], [0], [0], [1], [0, 0, 1, 1], [], []>} : vector<16x27xbf16>, vector<27x1024xbf16>, vector<16x1024xf32> -> vector<16x1024xf32>
    %c0_3 = arith.constant 0 : index
    %c0_4 = arith.constant 0 : index
    %3 = vector.load %arg3[%c0_3, %c0_4] : memref<16x1xf32, #tpu.memory_space<vmem>>, vector<16x1xf32>
    %4 = vector.broadcast %3 : vector<16x1xf32> to vector<16x1024xf32>
    %5 = arith.addf %2, %4 : vector<16x1024xf32>
    %cst_5 = arith.constant 0.000000e+00 : f32
    %6 = vector.broadcast %cst_5 : f32 to vector<16x1024xf32>
    %7 = arith.maximumf %5, %6 : vector<16x1024xf32>
    %8 = arith.truncf %7 : vector<16x1024xf32> to vector<16x1024xbf16>
    %c0_6 = arith.constant 0 : index
    %c0_7 = arith.constant 0 : index
    %9 = vector.load %arg4[%c0_6, %c0_7] : memref<16x1024xbf16, #tpu.memory_space<vmem>>, vector<16x1024xbf16>
    tpu.vector_store %arg4[%c0_6, %c0_7], %8 {strides = array<i32>} : memref<16x1024xbf16, #tpu.memory_space<vmem>>, vector<16x1024xbf16>,
    return
  }
  func.func @transform_0(%arg0: i32) -> (i32, i32) {
    %c0_i32 = arith.constant 0 : i32
    %c0_i32_0 = arith.constant 0 : i32
    %c0_i32_1 = arith.constant 0 : i32
    return %c0_i32, %c0_i32_0 : i32, i32
  }
  func.func @transform_1(%arg0: i32) -> (i32, i32) {
    %c0_i32 = arith.constant 0 : i32
    %c0_i32_0 = arith.constant 0 : i32
    return %c0_i32, %arg0 : i32, i32
  }
  func.func @transform_2(%arg0: i32) -> (i32, i32) {
    %c0_i32 = arith.constant 0 : i32
    %c0_i32_0 = arith.constant 0 : i32
    %c0_i32_1 = arith.constant 0 : i32
    return %c0_i32, %c0_i32_0 : i32, i32
  }
  func.func @transform_3(%arg0: i32) -> (i32, i32) {
    %c0_i32 = arith.constant 0 : i32
    %c0_i32_0 = arith.constant 0 : i32
    return %c0_i32, %arg0 : i32, i32
  }
}

module attributes {stable_mosaic.version = 11 : i64} {
  func.func @_gemm_kernel(%arg0: i32, %arg1: memref<24x144xbf16, #tpu.memory_space<vmem>>, %arg2: memref<144x256xbf16, #tpu.memory_space<vmem>>, %arg3: memref<24x1xf32, #tpu.memory_space<vmem>>, %arg4: memref<24x256xbf16, #tpu.memory_space<vmem>>) attributes {dimension_semantics = [#tpu.dimension_semantics<parallel>], iteration_bounds = array<i64: 2>, scalar_prefetch = 0 : i64, scratch_operands = 0 : i64, tpu.core_type = #tpu.core_type<tc>, window_params = [{pipeline_mode = #tpu.pipeline_mode<synchronous>, transform_indices = @transform_0, window_bounds = array<i64: 24, 144>}, {transform_indices = @transform_1, window_bounds = array<i64: 144, 256>}, {pipeline_mode = #tpu.pipeline_mode<synchronous>, transform_indices = @transform_2, window_bounds = array<i64: 24, 1>}, {transform_indices = @transform_3, window_bounds = array<i64: 24, 256>}]} {
    %c0 = arith.constant 0 : index
    %c0_0 = arith.constant 0 : index
    %0 = vector.load %arg1[%c0, %c0_0] : memref<24x144xbf16, #tpu.memory_space<vmem>>, vector<24x144xbf16>
    %c0_1 = arith.constant 0 : index
    %c0_2 = arith.constant 0 : index
    %1 = vector.load %arg2[%c0_1, %c0_2] : memref<144x256xbf16, #tpu.memory_space<vmem>>, vector<144x256xbf16>
    %cst = arith.constant dense<0.000000e+00> : vector<24x256xf32>
    %2 = tpu.matmul %0, %1, %cst {dimension_numbers = #tpu.dot_dimension_numbers<[1], [0], [0], [1], [0, 0, 1, 1], [], []>} : vector<24x144xbf16>, vector<144x256xbf16>, vector<24x256xf32> -> vector<24x256xf32>
    %c0_3 = arith.constant 0 : index
    %c0_4 = arith.constant 0 : index
    %3 = vector.load %arg3[%c0_3, %c0_4] : memref<24x1xf32, #tpu.memory_space<vmem>>, vector<24x1xf32>
    %4 = vector.broadcast %3 : vector<24x1xf32> to vector<24x256xf32>
    %5 = arith.addf %2, %4 : vector<24x256xf32>
    %cst_5 = arith.constant 0.000000e+00 : f32
    %6 = vector.broadcast %cst_5 : f32 to vector<24x256xf32>
    %7 = arith.maximumf %5, %6 : vector<24x256xf32>
    %8 = arith.truncf %7 : vector<24x256xf32> to vector<24x256xbf16>
    %c0_6 = arith.constant 0 : index
    %c0_7 = arith.constant 0 : index
    %9 = vector.load %arg4[%c0_6, %c0_7] : memref<24x256xbf16, #tpu.memory_space<vmem>>, vector<24x256xbf16>
    tpu.vector_store %arg4[%c0_6, %c0_7], %8 {strides = array<i32>} : memref<24x256xbf16, #tpu.memory_space<vmem>>, vector<24x256xbf16>,
    return
  }
  func.func @transform_0(%arg0: i32) -> (i32, i32) {
    %c0_i32 = arith.constant 0 : i32
    %c0_i32_0 = arith.constant 0 : i32
    %c0_i32_1 = arith.constant 0 : i32
    return %c0_i32, %c0_i32_0 : i32, i32
  }
  func.func @transform_1(%arg0: i32) -> (i32, i32) {
    %c0_i32 = arith.constant 0 : i32
    %c0_i32_0 = arith.constant 0 : i32
    return %c0_i32, %arg0 : i32, i32
  }
  func.func @transform_2(%arg0: i32) -> (i32, i32) {
    %c0_i32 = arith.constant 0 : i32
    %c0_i32_0 = arith.constant 0 : i32
    %c0_i32_1 = arith.constant 0 : i32
    return %c0_i32, %c0_i32_0 : i32, i32
  }
  func.func @transform_3(%arg0: i32) -> (i32, i32) {
    %c0_i32 = arith.constant 0 : i32
    %c0_i32_0 = arith.constant 0 : i32
    return %c0_i32, %arg0 : i32, i32
  }
}

module attributes {stable_mosaic.version = 11 : i64} {
  func.func @_gemm_kernel(%arg0: i32, %arg1: memref<32x216xbf16, #tpu.memory_space<vmem>>, %arg2: memref<216x128xbf16, #tpu.memory_space<vmem>>, %arg3: memref<32x1xf32, #tpu.memory_space<vmem>>, %arg4: memref<32x128xbf16, #tpu.memory_space<vmem>>) attributes {dimension_semantics = [#tpu.dimension_semantics<parallel>], iteration_bounds = array<i64: 1>, scalar_prefetch = 0 : i64, scratch_operands = 0 : i64, tpu.core_type = #tpu.core_type<tc>, window_params = [{pipeline_mode = #tpu.pipeline_mode<synchronous>, transform_indices = @transform_0, window_bounds = array<i64: 32, 216>}, {transform_indices = @transform_1, window_bounds = array<i64: 216, 128>}, {pipeline_mode = #tpu.pipeline_mode<synchronous>, transform_indices = @transform_2, window_bounds = array<i64: 32, 1>}, {transform_indices = @transform_3, window_bounds = array<i64: 32, 128>}]} {
    %c0 = arith.constant 0 : index
    %c0_0 = arith.constant 0 : index
    %0 = vector.load %arg1[%c0, %c0_0] : memref<32x216xbf16, #tpu.memory_space<vmem>>, vector<32x216xbf16>
    %c0_1 = arith.constant 0 : index
    %c0_2 = arith.constant 0 : index
    %1 = vector.load %arg2[%c0_1, %c0_2] : memref<216x128xbf16, #tpu.memory_space<vmem>>, vector<216x128xbf16>
    %cst = arith.constant dense<0.000000e+00> : vector<32x128xf32>
    %2 = tpu.matmul %0, %1, %cst {dimension_numbers = #tpu.dot_dimension_numbers<[1], [0], [0], [1], [0, 0, 1, 1], [], []>} : vector<32x216xbf16>, vector<216x128xbf16>, vector<32x128xf32> -> vector<32x128xf32>
    %c0_3 = arith.constant 0 : index
    %c0_4 = arith.constant 0 : index
    %3 = vector.load %arg3[%c0_3, %c0_4] : memref<32x1xf32, #tpu.memory_space<vmem>>, vector<32x1xf32>
    %4 = vector.broadcast %3 : vector<32x1xf32> to vector<32x128xf32>
    %5 = arith.addf %2, %4 : vector<32x128xf32>
    %cst_5 = arith.constant 0.000000e+00 : f32
    %6 = vector.broadcast %cst_5 : f32 to vector<32x128xf32>
    %7 = arith.maximumf %5, %6 : vector<32x128xf32>
    %8 = arith.truncf %7 : vector<32x128xf32> to vector<32x128xbf16>
    %c0_6 = arith.constant 0 : index
    %c0_7 = arith.constant 0 : index
    %9 = vector.load %arg4[%c0_6, %c0_7] : memref<32x128xbf16, #tpu.memory_space<vmem>>, vector<32x128xbf16>
    tpu.vector_store %arg4[%c0_6, %c0_7], %8 {strides = array<i32>} : memref<32x128xbf16, #tpu.memory_space<vmem>>, vector<32x128xbf16>,
    return
  }
  func.func @transform_0(%arg0: i32) -> (i32, i32) {
    %c0_i32 = arith.constant 0 : i32
    %c0_i32_0 = arith.constant 0 : i32
    %c0_i32_1 = arith.constant 0 : i32
    return %c0_i32, %c0_i32_0 : i32, i32
  }
  func.func @transform_1(%arg0: i32) -> (i32, i32) {
    %c0_i32 = arith.constant 0 : i32
    %c0_i32_0 = arith.constant 0 : i32
    return %c0_i32, %arg0 : i32, i32
  }
  func.func @transform_2(%arg0: i32) -> (i32, i32) {
    %c0_i32 = arith.constant 0 : i32
    %c0_i32_0 = arith.constant 0 : i32
    %c0_i32_1 = arith.constant 0 : i32
    return %c0_i32, %c0_i32_0 : i32, i32
  }
  func.func @transform_3(%arg0: i32) -> (i32, i32) {
    %c0_i32 = arith.constant 0 : i32
    %c0_i32_0 = arith.constant 0 : i32
    return %c0_i32, %arg0 : i32, i32
  }
}

module attributes {stable_mosaic.version = 11 : i64} {
  func.func @_gemm_kernel(%arg0: i32, %arg1: memref<64x288xbf16, #tpu.memory_space<vmem>>, %arg2: memref<288x32xbf16, #tpu.memory_space<vmem>>, %arg3: memref<64x1xf32, #tpu.memory_space<vmem>>, %arg4: memref<64x32xbf16, #tpu.memory_space<vmem>>) attributes {dimension_semantics = [#tpu.dimension_semantics<parallel>], iteration_bounds = array<i64: 1>, scalar_prefetch = 0 : i64, scratch_operands = 0 : i64, tpu.core_type = #tpu.core_type<tc>, window_params = [{pipeline_mode = #tpu.pipeline_mode<synchronous>, transform_indices = @transform_0, window_bounds = array<i64: 64, 288>}, {transform_indices = @transform_1, window_bounds = array<i64: 288, 32>}, {pipeline_mode = #tpu.pipeline_mode<synchronous>, transform_indices = @transform_2, window_bounds = array<i64: 64, 1>}, {transform_indices = @transform_3, window_bounds = array<i64: 64, 32>}]} {
    %c0 = arith.constant 0 : index
    %c0_0 = arith.constant 0 : index
    %0 = vector.load %arg1[%c0, %c0_0] : memref<64x288xbf16, #tpu.memory_space<vmem>>, vector<64x288xbf16>
    %c0_1 = arith.constant 0 : index
    %c0_2 = arith.constant 0 : index
    %1 = vector.load %arg2[%c0_1, %c0_2] : memref<288x32xbf16, #tpu.memory_space<vmem>>, vector<288x32xbf16>
    %cst = arith.constant dense<0.000000e+00> : vector<64x32xf32>
    %2 = tpu.matmul %0, %1, %cst {dimension_numbers = #tpu.dot_dimension_numbers<[1], [0], [0], [1], [0, 0, 1, 1], [], []>} : vector<64x288xbf16>, vector<288x32xbf16>, vector<64x32xf32> -> vector<64x32xf32>
    %c0_3 = arith.constant 0 : index
    %c0_4 = arith.constant 0 : index
    %3 = vector.load %arg3[%c0_3, %c0_4] : memref<64x1xf32, #tpu.memory_space<vmem>>, vector<64x1xf32>
    %4 = vector.broadcast %3 : vector<64x1xf32> to vector<64x32xf32>
    %5 = arith.addf %2, %4 : vector<64x32xf32>
    %cst_5 = arith.constant 0.000000e+00 : f32
    %6 = vector.broadcast %cst_5 : f32 to vector<64x32xf32>
    %7 = arith.maximumf %5, %6 : vector<64x32xf32>
    %8 = arith.truncf %7 : vector<64x32xf32> to vector<64x32xbf16>
    %c0_6 = arith.constant 0 : index
    %c0_7 = arith.constant 0 : index
    %9 = vector.load %arg4[%c0_6, %c0_7] : memref<64x32xbf16, #tpu.memory_space<vmem>>, vector<64x32xbf16>
    tpu.vector_store %arg4[%c0_6, %c0_7], %8 {strides = array<i32>} : memref<64x32xbf16, #tpu.memory_space<vmem>>, vector<64x32xbf16>,
    return
  }
  func.func @transform_0(%arg0: i32) -> (i32, i32) {
    %c0_i32 = arith.constant 0 : i32
    %c0_i32_0 = arith.constant 0 : i32
    %c0_i32_1 = arith.constant 0 : i32
    return %c0_i32, %c0_i32_0 : i32, i32
  }
  func.func @transform_1(%arg0: i32) -> (i32, i32) {
    %c0_i32 = arith.constant 0 : i32
    %c0_i32_0 = arith.constant 0 : i32
    return %c0_i32, %arg0 : i32, i32
  }
  func.func @transform_2(%arg0: i32) -> (i32, i32) {
    %c0_i32 = arith.constant 0 : i32
    %c0_i32_0 = arith.constant 0 : i32
    %c0_i32_1 = arith.constant 0 : i32
    return %c0_i32, %c0_i32_0 : i32, i32
  }
  func.func @transform_3(%arg0: i32) -> (i32, i32) {
    %c0_i32 = arith.constant 0 : i32
    %c0_i32_0 = arith.constant 0 : i32
    return %c0_i32, %arg0 : i32, i32
  }
}

module attributes {stable_mosaic.version = 11 : i64} {
  func.func @_gemm_kernel(%arg0: i32, %arg1: memref<128x576xbf16, #tpu.memory_space<vmem>>, %arg2: memref<576x8xbf16, #tpu.memory_space<vmem>>, %arg3: memref<128x1xf32, #tpu.memory_space<vmem>>, %arg4: memref<128x8xbf16, #tpu.memory_space<vmem>>) attributes {dimension_semantics = [#tpu.dimension_semantics<parallel>], iteration_bounds = array<i64: 1>, scalar_prefetch = 0 : i64, scratch_operands = 0 : i64, tpu.core_type = #tpu.core_type<tc>, window_params = [{pipeline_mode = #tpu.pipeline_mode<synchronous>, transform_indices = @transform_0, window_bounds = array<i64: 128, 576>}, {transform_indices = @transform_1, window_bounds = array<i64: 576, 8>}, {pipeline_mode = #tpu.pipeline_mode<synchronous>, transform_indices = @transform_2, window_bounds = array<i64: 128, 1>}, {transform_indices = @transform_3, window_bounds = array<i64: 128, 8>}]} {
    %c0 = arith.constant 0 : index
    %c0_0 = arith.constant 0 : index
    %0 = vector.load %arg1[%c0, %c0_0] : memref<128x576xbf16, #tpu.memory_space<vmem>>, vector<128x576xbf16>
    %c0_1 = arith.constant 0 : index
    %c0_2 = arith.constant 0 : index
    %1 = vector.load %arg2[%c0_1, %c0_2] : memref<576x8xbf16, #tpu.memory_space<vmem>>, vector<576x8xbf16>
    %cst = arith.constant dense<0.000000e+00> : vector<128x8xf32>
    %2 = tpu.matmul %0, %1, %cst {dimension_numbers = #tpu.dot_dimension_numbers<[1], [0], [0], [1], [0, 0, 1, 1], [], []>} : vector<128x576xbf16>, vector<576x8xbf16>, vector<128x8xf32> -> vector<128x8xf32>
    %c0_3 = arith.constant 0 : index
    %c0_4 = arith.constant 0 : index
    %3 = vector.load %arg3[%c0_3, %c0_4] : memref<128x1xf32, #tpu.memory_space<vmem>>, vector<128x1xf32>
    %4 = vector.broadcast %3 : vector<128x1xf32> to vector<128x8xf32>
    %5 = arith.addf %2, %4 : vector<128x8xf32>
    %cst_5 = arith.constant 0.000000e+00 : f32
    %6 = vector.broadcast %cst_5 : f32 to vector<128x8xf32>
    %7 = arith.maximumf %5, %6 : vector<128x8xf32>
    %8 = arith.truncf %7 : vector<128x8xf32> to vector<128x8xbf16>
    %c0_6 = arith.constant 0 : index
    %c0_7 = arith.constant 0 : index
    %9 = vector.load %arg4[%c0_6, %c0_7] : memref<128x8xbf16, #tpu.memory_space<vmem>>, vector<128x8xbf16>
    tpu.vector_store %arg4[%c0_6, %c0_7], %8 {strides = array<i32>} : memref<128x8xbf16, #tpu.memory_space<vmem>>, vector<128x8xbf16>,
    return
  }
  func.func @transform_0(%arg0: i32) -> (i32, i32) {
    %c0_i32 = arith.constant 0 : i32
    %c0_i32_0 = arith.constant 0 : i32
    %c0_i32_1 = arith.constant 0 : i32
    return %c0_i32, %c0_i32_0 : i32, i32
  }
  func.func @transform_1(%arg0: i32) -> (i32, i32) {
    %c0_i32 = arith.constant 0 : i32
    %c0_i32_0 = arith.constant 0 : i32
    return %c0_i32, %arg0 : i32, i32
  }
  func.func @transform_2(%arg0: i32) -> (i32, i32) {
    %c0_i32 = arith.constant 0 : i32
    %c0_i32_0 = arith.constant 0 : i32
    %c0_i32_1 = arith.constant 0 : i32
    return %c0_i32, %c0_i32_0 : i32, i32
  }
  func.func @transform_3(%arg0: i32) -> (i32, i32) {
    %c0_i32 = arith.constant 0 : i32
    %c0_i32_0 = arith.constant 0 : i32
    return %c0_i32, %arg0 : i32, i32
  }
}

module attributes {stable_mosaic.version = 11 : i64} {
  func.func @_gemm_kernel(%arg0: i32, %arg1: memref<32x128xbf16, #tpu.memory_space<vmem>>, %arg2: memref<128x8xbf16, #tpu.memory_space<vmem>>, %arg3: memref<32x1xf32, #tpu.memory_space<vmem>>, %arg4: memref<32x8xbf16, #tpu.memory_space<vmem>>) attributes {dimension_semantics = [#tpu.dimension_semantics<parallel>], iteration_bounds = array<i64: 1>, scalar_prefetch = 0 : i64, scratch_operands = 0 : i64, tpu.core_type = #tpu.core_type<tc>, window_params = [{pipeline_mode = #tpu.pipeline_mode<synchronous>, transform_indices = @transform_0, window_bounds = array<i64: 32, 128>}, {transform_indices = @transform_1, window_bounds = array<i64: 128, 8>}, {pipeline_mode = #tpu.pipeline_mode<synchronous>, transform_indices = @transform_2, window_bounds = array<i64: 32, 1>}, {transform_indices = @transform_3, window_bounds = array<i64: 32, 8>}]} {
    %c0 = arith.constant 0 : index
    %c0_0 = arith.constant 0 : index
    %0 = vector.load %arg1[%c0, %c0_0] : memref<32x128xbf16, #tpu.memory_space<vmem>>, vector<32x128xbf16>
    %c0_1 = arith.constant 0 : index
    %c0_2 = arith.constant 0 : index
    %1 = vector.load %arg2[%c0_1, %c0_2] : memref<128x8xbf16, #tpu.memory_space<vmem>>, vector<128x8xbf16>
    %cst = arith.constant dense<0.000000e+00> : vector<32x8xf32>
    %2 = tpu.matmul %0, %1, %cst {dimension_numbers = #tpu.dot_dimension_numbers<[1], [0], [0], [1], [0, 0, 1, 1], [], []>} : vector<32x128xbf16>, vector<128x8xbf16>, vector<32x8xf32> -> vector<32x8xf32>
    %c0_3 = arith.constant 0 : index
    %c0_4 = arith.constant 0 : index
    %3 = vector.load %arg3[%c0_3, %c0_4] : memref<32x1xf32, #tpu.memory_space<vmem>>, vector<32x1xf32>
    %4 = vector.broadcast %3 : vector<32x1xf32> to vector<32x8xf32>
    %5 = arith.addf %2, %4 : vector<32x8xf32>
    %6 = arith.truncf %5 : vector<32x8xf32> to vector<32x8xbf16>
    %c0_5 = arith.constant 0 : index
    %c0_6 = arith.constant 0 : index
    %7 = vector.load %arg4[%c0_5, %c0_6] : memref<32x8xbf16, #tpu.memory_space<vmem>>, vector<32x8xbf16>
    tpu.vector_store %arg4[%c0_5, %c0_6], %6 {strides = array<i32>} : memref<32x8xbf16, #tpu.memory_space<vmem>>, vector<32x8xbf16>,
    return
  }
  func.func @transform_0(%arg0: i32) -> (i32, i32) {
    %c0_i32 = arith.constant 0 : i32
    %c0_i32_0 = arith.constant 0 : i32
    %c0_i32_1 = arith.constant 0 : i32
    return %c0_i32, %c0_i32_0 : i32, i32
  }
  func.func @transform_1(%arg0: i32) -> (i32, i32) {
    %c0_i32 = arith.constant 0 : i32
    %c0_i32_0 = arith.constant 0 : i32
    return %c0_i32, %arg0 : i32, i32
  }
  func.func @transform_2(%arg0: i32) -> (i32, i32) {
    %c0_i32 = arith.constant 0 : i32
    %c0_i32_0 = arith.constant 0 : i32
    %c0_i32_1 = arith.constant 0 : i32
    return %c0_i32, %c0_i32_0 : i32, i32
  }
  func.func @transform_3(%arg0: i32) -> (i32, i32) {
    %c0_i32 = arith.constant 0 : i32
    %c0_i32_0 = arith.constant 0 : i32
    return %c0_i32, %arg0 : i32, i32
  }
}

module attributes {stable_mosaic.version = 11 : i64} {
  func.func @_gemm_kernel(%arg0: i32, %arg1: memref<32x64xbf16, #tpu.memory_space<vmem>>, %arg2: memref<64x32xbf16, #tpu.memory_space<vmem>>, %arg3: memref<32x1xf32, #tpu.memory_space<vmem>>, %arg4: memref<32x32xbf16, #tpu.memory_space<vmem>>, %arg5: memref<32x32xbf16, #tpu.memory_space<vmem>>) attributes {dimension_semantics = [#tpu.dimension_semantics<parallel>], iteration_bounds = array<i64: 1>, scalar_prefetch = 0 : i64, scratch_operands = 0 : i64, tpu.core_type = #tpu.core_type<tc>, window_params = [{pipeline_mode = #tpu.pipeline_mode<synchronous>, transform_indices = @transform_0, window_bounds = array<i64: 32, 64>}, {transform_indices = @transform_1, window_bounds = array<i64: 64, 32>}, {pipeline_mode = #tpu.pipeline_mode<synchronous>, transform_indices = @transform_2, window_bounds = array<i64: 32, 1>}, {transform_indices = @transform_3, window_bounds = array<i64: 32, 32>}, {transform_indices = @transform_4, window_bounds = array<i64: 32, 32>}]} {
    %c0 = arith.constant 0 : index
    %c0_0 = arith.constant 0 : index
    %0 = vector.load %arg1[%c0, %c0_0] : memref<32x64xbf16, #tpu.memory_space<vmem>>, vector<32x64xbf16>
    %c0_1 = arith.constant 0 : index
    %c0_2 = arith.constant 0 : index
    %1 = vector.load %arg2[%c0_1, %c0_2] : memref<64x32xbf16, #tpu.memory_space<vmem>>, vector<64x32xbf16>
    %cst = arith.constant dense<0.000000e+00> : vector<32x32xf32>
    %2 = tpu.matmul %0, %1, %cst {dimension_numbers = #tpu.dot_dimension_numbers<[1], [0], [0], [1], [0, 0, 1, 1], [], []>} : vector<32x64xbf16>, vector<64x32xbf16>, vector<32x32xf32> -> vector<32x32xf32>
    %c0_3 = arith.constant 0 : index
    %c0_4 = arith.constant 0 : index
    %3 = vector.load %arg3[%c0_3, %c0_4] : memref<32x1xf32, #tpu.memory_space<vmem>>, vector<32x1xf32>
    %4 = vector.broadcast %3 : vector<32x1xf32> to vector<32x32xf32>
    %5 = arith.addf %2, %4 : vector<32x32xf32>
    %c0_5 = arith.constant 0 : index
    %c0_6 = arith.constant 0 : index
    %6 = vector.load %arg4[%c0_5, %c0_6] : memref<32x32xbf16, #tpu.memory_space<vmem>>, vector<32x32xbf16>
    %7 = arith.extf %6 : vector<32x32xbf16> to vector<32x32xf32>
    %8 = arith.addf %5, %7 : vector<32x32xf32>
    %9 = arith.truncf %8 : vector<32x32xf32> to vector<32x32xbf16>
    %c0_7 = arith.constant 0 : index
    %c0_8 = arith.constant 0 : index
    %10 = vector.load %arg5[%c0_7, %c0_8] : memref<32x32xbf16, #tpu.memory_space<vmem>>, vector<32x32xbf16>
    tpu.vector_store %arg5[%c0_7, %c0_8], %9 {strides = array<i32>} : memref<32x32xbf16, #tpu.memory_space<vmem>>, vector<32x32xbf16>,
    return
  }
  func.func @transform_0(%arg0: i32) -> (i32, i32) {
    %c0_i32 = arith.constant 0 : i32
    %c0_i32_0 = arith.constant 0 : i32
    %c0_i32_1 = arith.constant 0 : i32
    return %c0_i32, %c0_i32_0 : i32, i32
  }
  func.func @transform_1(%arg0: i32) -> (i32, i32) {
    %c0_i32 = arith.constant 0 : i32
    %c0_i32_0 = arith.constant 0 : i32
    return %c0_i32, %arg0 : i32, i32
  }
  func.func @transform_2(%arg0: i32) -> (i32, i32) {
    %c0_i32 = arith.constant 0 : i32
    %c0_i32_0 = arith.constant 0 : i32
    %c0_i32_1 = arith.constant 0 : i32
    return %c0_i32, %c0_i32_0 : i32, i32
  }
  func.func @transform_3(%arg0: i32) -> (i32, i32) {
    %c0_i32 = arith.constant 0 : i32
    %c0_i32_0 = arith.constant 0 : i32
    return %c0_i32, %arg0 : i32, i32
  }
  func.func @transform_4(%arg0: i32) -> (i32, i32) {
    %c0_i32 = arith.constant 0 : i32
    %c0_i32_0 = arith.constant 0 : i32
    return %c0_i32, %arg0 : i32, i32
  }
}

module attributes {stable_mosaic.version = 11 : i64} {
  func.func @_gemm_kernel(%arg0: i32, %arg1: memref<32x32xbf16, #tpu.memory_space<vmem>>, %arg2: memref<32x128xbf16, #tpu.memory_space<vmem>>, %arg3: memref<32x1xf32, #tpu.memory_space<vmem>>, %arg4: memref<32x128xbf16, #tpu.memory_space<vmem>>, %arg5: memref<32x128xbf16, #tpu.memory_space<vmem>>) attributes {dimension_semantics = [#tpu.dimension_semantics<parallel>], iteration_bounds = array<i64: 1>, scalar_prefetch = 0 : i64, scratch_operands = 0 : i64, tpu.core_type = #tpu.core_type<tc>, window_params = [{pipeline_mode = #tpu.pipeline_mode<synchronous>, transform_indices = @transform_0, window_bounds = array<i64: 32, 32>}, {transform_indices = @transform_1, window_bounds = array<i64: 32, 128>}, {pipeline_mode = #tpu.pipeline_mode<synchronous>, transform_indices = @transform_2, window_bounds = array<i64: 32, 1>}, {transform_indices = @transform_3, window_bounds = array<i64: 32, 128>}, {transform_indices = @transform_4, window_bounds = array<i64: 32, 128>}]} {
    %c0 = arith.constant 0 : index
    %c0_0 = arith.constant 0 : index
    %0 = vector.load %arg1[%c0, %c0_0] : memref<32x32xbf16, #tpu.memory_space<vmem>>, vector<32x32xbf16>
    %c0_1 = arith.constant 0 : index
    %c0_2 = arith.constant 0 : index
    %1 = vector.load %arg2[%c0_1, %c0_2] : memref<32x128xbf16, #tpu.memory_space<vmem>>, vector<32x128xbf16>
    %cst = arith.constant dense<0.000000e+00> : vector<32x128xf32>
    %2 = tpu.matmul %0, %1, %cst {dimension_numbers = #tpu.dot_dimension_numbers<[1], [0], [0], [1], [0, 0, 1, 1], [], []>} : vector<32x32xbf16>, vector<32x128xbf16>, vector<32x128xf32> -> vector<32x128xf32>
    %c0_3 = arith.constant 0 : index
    %c0_4 = arith.constant 0 : index
    %3 = vector.load %arg3[%c0_3, %c0_4] : memref<32x1xf32, #tpu.memory_space<vmem>>, vector<32x1xf32>
    %4 = vector.broadcast %3 : vector<32x1xf32> to vector<32x128xf32>
    %5 = arith.addf %2, %4 : vector<32x128xf32>
    %c0_5 = arith.constant 0 : index
    %c0_6 = arith.constant 0 : index
    %6 = vector.load %arg4[%c0_5, %c0_6] : memref<32x128xbf16, #tpu.memory_space<vmem>>, vector<32x128xbf16>
    %7 = arith.extf %6 : vector<32x128xbf16> to vector<32x128xf32>
    %8 = arith.addf %5, %7 : vector<32x128xf32>
    %9 = arith.truncf %8 : vector<32x128xf32> to vector<32x128xbf16>
    %c0_7 = arith.constant 0 : index
    %c0_8 = arith.constant 0 : index
    %10 = vector.load %arg5[%c0_7, %c0_8] : memref<32x128xbf16, #tpu.memory_space<vmem>>, vector<32x128xbf16>
    tpu.vector_store %arg5[%c0_7, %c0_8], %9 {strides = array<i32>} : memref<32x128xbf16, #tpu.memory_space<vmem>>, vector<32x128xbf16>,
    return
  }
  func.func @transform_0(%arg0: i32) -> (i32, i32) {
    %c0_i32 = arith.constant 0 : i32
    %c0_i32_0 = arith.constant 0 : i32
    %c0_i32_1 = arith.constant 0 : i32
    return %c0_i32, %c0_i32_0 : i32, i32
  }
  func.func @transform_1(%arg0: i32) -> (i32, i32) {
    %c0_i32 = arith.constant 0 : i32
    %c0_i32_0 = arith.constant 0 : i32
    return %c0_i32, %arg0 : i32, i32
  }
  func.func @transform_2(%arg0: i32) -> (i32, i32) {
    %c0_i32 = arith.constant 0 : i32
    %c0_i32_0 = arith.constant 0 : i32
    %c0_i32_1 = arith.constant 0 : i32
    return %c0_i32, %c0_i32_0 : i32, i32
  }
  func.func @transform_3(%arg0: i32) -> (i32, i32) {
    %c0_i32 = arith.constant 0 : i32
    %c0_i32_0 = arith.constant 0 : i32
    return %c0_i32, %arg0 : i32, i32
  }
  func.func @transform_4(%arg0: i32) -> (i32, i32) {
    %c0_i32 = arith.constant 0 : i32
    %c0_i32_0 = arith.constant 0 : i32
    return %c0_i32, %arg0 : i32, i32
  }
}

module attributes {stable_mosaic.version = 11 : i64} {
  func.func @_grouped_gemm_kernel(%arg0: i32, %arg1: memref<1x32x288xbf16, #tpu.memory_space<vmem>>, %arg2: memref<288x128xbf16, #tpu.memory_space<vmem>>, %arg3: memref<1x32x1xf32, #tpu.memory_space<vmem>>, %arg4: memref<32x128xf32, #tpu.memory_space<vmem>>) attributes {dimension_semantics = [#tpu.dimension_semantics<parallel>], iteration_bounds = array<i64: 3>, scalar_prefetch = 0 : i64, scratch_operands = 0 : i64, tpu.core_type = #tpu.core_type<tc>, window_params = [{transform_indices = @transform_0, window_bounds = array<i64: 1, 32, 288>}, {transform_indices = @transform_1, window_bounds = array<i64: 288, 128>}, {transform_indices = @transform_2, window_bounds = array<i64: 1, 32, 1>}, {transform_indices = @transform_3, window_bounds = array<i64: 32, 128>}]} {
    %c0 = arith.constant 0 : index
    %c0_0 = arith.constant 0 : index
    %c0_1 = arith.constant 0 : index
    %0 = vector.load %arg1[%c0, %c0_0, %c0_1] : memref<1x32x288xbf16, #tpu.memory_space<vmem>>, vector<1x32x288xbf16>
    %1 = vector.shape_cast %0 : vector<1x32x288xbf16> to vector<32x288xbf16>
    %c0_2 = arith.constant 0 : index
    %c0_3 = arith.constant 0 : index
    %2 = vector.load %arg2[%c0_2, %c0_3] : memref<288x128xbf16, #tpu.memory_space<vmem>>, vector<288x128xbf16>
    %cst = arith.constant dense<0.000000e+00> : vector<32x128xf32>
    %3 = tpu.matmul %1, %2, %cst {dimension_numbers = #tpu.dot_dimension_numbers<[1], [0], [0], [1], [0, 0, 1, 1], [], []>} : vector<32x288xbf16>, vector<288x128xbf16>, vector<32x128xf32> -> vector<32x128xf32>
    %c0_4 = arith.constant 0 : index
    %c0_5 = arith.constant 0 : index
    %c0_6 = arith.constant 0 : index
    %4 = vector.load %arg3[%c0_4, %c0_5, %c0_6] : memref<1x32x1xf32, #tpu.memory_space<vmem>>, vector<1x32x1xf32>
    %5 = vector.shape_cast %4 : vector<1x32x1xf32> to vector<32x1xf32>
    %6 = vector.broadcast %5 : vector<32x1xf32> to vector<32x128xf32>
    %7 = arith.addf %3, %6 : vector<32x128xf32>
    %c0_7 = arith.constant 0 : index
    %c0_8 = arith.constant 0 : index
    %8 = vector.load %arg4[%c0_7, %c0_8] : memref<32x128xf32, #tpu.memory_space<vmem>>, vector<32x128xf32>
    tpu.vector_store %arg4[%c0_7, %c0_8], %7 {strides = array<i32>} : memref<32x128xf32, #tpu.memory_space<vmem>>, vector<32x128xf32>,
    return
  }
  func.func @transform_0(%arg0: i32) -> (i32, i32, i32) {
    %c0_i32 = arith.constant 0 : i32
    %c0_i32_0 = arith.constant 0 : i32
    %c0_i32_1 = arith.constant 0 : i32
    return %arg0, %c0_i32, %c0_i32_0 : i32, i32, i32
  }
  func.func @transform_1(%arg0: i32) -> (i32, i32) {
    %c0_i32 = arith.constant 0 : i32
    %c0_i32_0 = arith.constant 0 : i32
    return %c0_i32, %arg0 : i32, i32
  }
  func.func @transform_2(%arg0: i32) -> (i32, i32, i32) {
    %c0_i32 = arith.constant 0 : i32
    %c0_i32_0 = arith.constant 0 : i32
    %c0_i32_1 = arith.constant 0 : i32
    return %arg0, %c0_i32, %c0_i32_0 : i32, i32, i32
  }
  func.func @transform_3(%arg0: i32) -> (i32, i32) {
    %c0_i32 = arith.constant 0 : i32
    %c0_i32_0 = arith.constant 0 : i32
    return %c0_i32, %arg0 : i32, i32
  }
}

</mosaic_0001>

<bundles_post_ra>
// kernel: backbone_with_fpn_forward.9
= control target key start
LH: loop header
LB: loop body
LE: loop exit
PB: predicated region body
PF: predicated region fallthrough
CT: control target
= control target key end

     0   :  { %s826_s12 = smov 0   ;;  %s828_s13 = smov 0   ;;  %s963_s0 = inlined_call_operand.vmem [shape: bf16[16,27], index: 0, kind: input, shape index: {}]   ;;  %s964_s1 = inlined_call_operand.vmem [shape: bf16[27,2048], index: 1, kind: input, shape index: {}]   ;;  %s965_s2 = inlined_call_operand.vmem [shape: f32[16,1], index: 2, kind: input, shape index: {}]   ;;  %s966_s3 = inlined_call_operand.vmem [shape: bf16[16,2048], index: 3, kind: output, shape index: {}]  }
   0x1   :  { %s830_s14 = smov 0  }
   0x2 LB: > { %s698_s15 = sadd.s32 4294967295, %s802_s14   ;;  %s843_s16 = sadd.s32 1, %s802_s14   ;;  %s802_s14 = sphi %s830_s14, %s970_s14   ;;  %s798_s13 = sphi %s828_s13, %s969_s13   ;;  %s794_s12 = sphi %s826_s12, %s968_s12  }
   0x3   : > { %s38_s17 = ssub.s32 %s802_s14, %s843_s16  ;;  %s41_s18 = sadd.s32 1, %s798_s13 }
   0x4   : > { %p39_p0 = scmp.eq.s32.totalorder %s38_s17, 0  ;;  %p48_p1 = scmp.ne.s32.totalorder %s798_s13, %s794_s12 }
   0x5   : > { %p49_p2 = scmp.eq.s32.totalorder %s802_s14, 0  ;;  %p99_p3 = scmp.eq.s32.totalorder %s698_s15, 1 }
   0x6   : > { %s854_s19 = scalar_select %p39_p0, %s798_s13, %s41_s18  }
   0x7   : > { %p50_p4 = por %p49_p2, %p48_p1  ;;  %p856_p5 = por %p99_p3, %p48_p1 }
   0x8   : > { %p701_p6 = scmp.ge.s32.totalorder %s802_s14, 2 }
   0xa   : > { %127 = sbr.rel (%p701_p6) target bundleno = 29 (0x1d), region = 24 }
  0x11   : > { %130 = sbr.rel (!%p50_p4) target bundleno = 29 (0x1d), region = 28  ;;  %s132_s21 = sand.u32 (%p50_p4), 1, %s798_s13  }
  0x12   : > { %s742_s22 = sshll.u32 (%p50_p4), %s802_s14, 5  ;;  %s702_s23 = sshll.u32 (%p50_p4), %s132_s21, 7 }
  0x13   : > { %s866_s26 = scalar_lea.vmem (%p50_p4), %s964_s1, %s742_s22  ;;  %s134_s27 = scalar_lea.vmem (%p50_p4), [#allocation2], %s702_s23 }
  0x14   : > { %v150_v0 = vld [vmem:[%s866_s26] sm:$0xff] (%p50_p4)  ;;  %v152_v1 = vld [vmem:[%s866_s26 + $0x8] sm:$0xff] (%p50_p4)  ;;  %v154_v2 = vld [vmem:[%s866_s26 + $0x10] sm:$0xff] (%p50_p4) }
  0x15   : > { %151 = vst [vmem:[%s134_s27] sm:$0xff] (%p50_p4), %v150_v0  ;;  %153 = vst [vmem:[%s134_s27 + $0x8] sm:$0xff] (%p50_p4), %v152_v1  ;;  %v156_v3 = vld [vmem:[%s866_s26 + $0x18] sm:$0xff] (%p50_p4)  ;;  %v158_v4 = vld [vmem:[%s866_s26 + $0x40] sm:$0xff] (%p50_p4) }
  0x16   : > { %155 = vst [vmem:[%s134_s27 + $0x10] sm:$0xff] (%p50_p4), %v154_v2  ;;  %v160_v5 = vld [vmem:[%s866_s26 + $0x48] sm:$0xff] (%p50_p4)  ;;  %157 = vst [vmem:[%s134_s27 + $0x18] sm:$0xff] (%p50_p4), %v156_v3  ;;  %v162_v6 = vld [vmem:[%s866_s26 + $0x50] sm:$0xff] (%p50_p4) }
  0x17   : > { %159 = vst [vmem:[%s134_s27 + $0x20] sm:$0xff] (%p50_p4), %v158_v4  ;;  %161 = vst [vmem:[%s134_s27 + $0x28] sm:$0xff] (%p50_p4), %v160_v5  ;;  %v164_v7 = vld [vmem:[%s866_s26 + $0x58] sm:$0xff] (%p50_p4)  ;;  %v166_v8 = vld [vmem:[%s866_s26 + $0x80] sm:$0xff] (%p50_p4) }
  0x18   : > { %163 = vst [vmem:[%s134_s27 + $0x30] sm:$0xff] %v162_v6  ;;  %165 = vst [vmem:[%s134_s27 + $0x38] sm:$0xff] %v164_v7  ;;  %v168_v9 = vld [vmem:[%s866_s26 + $0x88] sm:$0xff]  ;;  %v170_v10 = vld [vmem:[%s866_s26 + $0x90] sm:$0xff] }
  0x19   : > { %167 = vst [vmem:[%s134_s27 + $0x40] sm:$0xff] %v166_v8  ;;  %v172_v11 = vld [vmem:[%s866_s26 + $0x98] sm:$0xff]  ;;  %169 = vst [vmem:[%s134_s27 + $0x48] sm:$0xff] %v168_v9  ;;  %v174_v12 = vld [vmem:[%s866_s26 + $0xc0] sm:$0xff] }
  0x1a   : > { %171 = vst [vmem:[%s134_s27 + $0x50] sm:$0xff] %v170_v10  ;;  %173 = vst [vmem:[%s134_s27 + $0x58] sm:$0xff] %v172_v11  ;;  %v176_v13 = vld [vmem:[%s866_s26 + $0xc8] sm:$0xff]  ;;  %v178_v14 = vld [vmem:[%s866_s26 + $0xd0] sm:$0xff] }
  0x1b   : > { %175 = vst [vmem:[%s134_s27 + $0x60] sm:$0xff] %v174_v12  ;;  %177 = vst [vmem:[%s134_s27 + $0x68] sm:$0xff] %v176_v13  ;;  %v180_v15 = vld [vmem:[%s866_s26 + $0xd8] sm:$0xff] }
  0x1c   : > { %179 = vst [vmem:[%s134_s27 + $0x70] sm:$0xff] %v178_v14  ;;  %181 = vst [vmem:[%s134_s27 + $0x78] sm:$0xff] %v180_v15 }
  0x1d PF: > { %p705_p7 = scmp.ge.s32.totalorder %s802_s14, 1  ;;  %p186_p8 = scmp.lt.s32.totalorder %s802_s14, 3 }
  0x1f   : > { %p187_p9 = pnand %p705_p7, %p186_p8 }
  0x20   : > { %s193_s28 = sand.u32 (!%p187_p9), 1, %s794_s12   ;;  %vm329_vm0 = vcmask (!%p187_p9), 1044480   ;;  %vm330_vm1 = vcmask (!%p187_p9), 1045504   ;;  %v804_v16 = vmov (!%p187_p9), 65535   ;;  %v805_v18 = vmov (!%p187_p9), 0   ;;  %v236_v19 = vld [vmem:[%s965_s2] sm:$0xff] (!%p187_p9) }
  0x21   : > { %190 = sbr.rel (%p187_p9) target bundleno = 286 (0x11e), region = 51  ;;  %s706_s29 = sshll.u32 (!%p187_p9), %s193_s28, 7  ;;  %v331_v17 = vsel (!%p187_p9), %vm329_vm0, 4294967295, %v804_v16  ;;  %389 = vmatprep.mubr.bf16.mxu0 (!%p187_p9), %v805_v18  ;;  %432 = vmatprep.mubr.bf16.mxu1 (!%p187_p9), %v805_v18  ;;  %v237_v36 = vld [vmem:[%s965_s2 + $0x8] sm:$0xff] (!%p187_p9)  ;;  %v779_v53 = vld [vmem:[%s963_s0] sm:$0xff] (!%p187_p9)   ;;  %vm325_vm2 = vcmask (!%p187_p9), 220160  }
  0x22   : > { %778 = vset.pattern.permute.xlu0 (!%p187_p9), %v805_v18  ;;  %s895_s5 = scalar_lea.vmem (!%p187_p9), [#allocation2], %s706_s29  ;;  %v332_v28 = vsel (!%p187_p9), %vm330_vm1, %v331_v17, 0  ;;  %s707_s10 = sshll.u32 (!%p187_p9), %s193_s28, 6 }
  0x23   : > { %v220_v20 = vld [vmem:[%s895_s5] sm:$0xff] (!%p187_p9)  ;;  %v221_v22 = vld [vmem:[%s895_s5 + $0x8] sm:$0xff] (!%p187_p9)  ;;  %240 = vperm.xlu0 (!%p187_p9), %778, %v236_v19   ;;  %v222_v35 = vld [vmem:[%s895_s5 + $0x10] sm:$0xff] (!%p187_p9)  ;;  %s928_s11 = scalar_lea.vmem (!%p187_p9), [#allocation3], %s707_s10 }
  0x24   : > { %v224_v21 = vld [vmem:[%s895_s5 + $0x20] sm:$0xff] (!%p187_p9)  ;;  %v225_v24 = vld [vmem:[%s895_s5 + $0x28] sm:$0xff] (!%p187_p9)  ;;  %v226_v39 = vld [vmem:[%s895_s5 + $0x30] sm:$0xff] (!%p187_p9) }
  0x25   : > { %v710_v23 = vcombine.high (!%p187_p9), %v220_v20, %v224_v21  ;;  %v709_v25 = vcombine.low (!%p187_p9), %v220_v20, %v224_v21  ;;  %v228_v26 = vld [vmem:[%s895_s5 + $0x40] sm:$0xff] (!%p187_p9)  ;;  %v712_v29 = vcombine.high (!%p187_p9), %v221_v22, %v225_v24  ;;  %v711_v30 = vcombine.low (!%p187_p9), %v221_v22, %v225_v24  ;;  %v229_v32 = vld [vmem:[%s895_s5 + $0x48] sm:$0xff] (!%p187_p9)  ;;  %v223_v40 = vld [vmem:[%s895_s5 + $0x18] sm:$0xff] (!%p187_p9) }
  0x26   : > { %v232_v27 = vld [vmem:[%s895_s5 + $0x60] sm:$0x33] (!%p187_p9)  ;;  %v233_v33 = vld [vmem:[%s895_s5 + $0x68] sm:$0x33] (!%p187_p9)  ;;  %v227_v41 = vld [vmem:[%s895_s5 + $0x38] sm:$0xff] (!%p187_p9)  ;;  %v714_v49 = vcombine.high (!%p187_p9), %v222_v35, %v226_v39  ;;  %v713_v55 = vcombine.low (!%p187_p9), %v222_v35, %v226_v39 }
  0x27   : > { %v718_v31 = vcombine.high (!%p187_p9), %v228_v26, %v232_v27  ;;  %v717_v34 = vcombine.low (!%p187_p9), %v228_v26, %v232_v27  ;;  %357 = vmatprep.subr.bf16.mxu0 (!%p187_p9), %v710_v23  ;;  %v720_v37 = vcombine.high (!%p187_p9), %v229_v32, %v233_v33  ;;  %v719_v38 = vcombine.low (!%p187_p9), %v229_v32, %v233_v33  ;;  %v230_v44 = vld [vmem:[%s895_s5 + $0x50] sm:$0xff] (!%p187_p9)  ;;  %v231_v46 = vld [vmem:[%s895_s5 + $0x58] sm:$0xff] (!%p187_p9) }
  0x28   : > { %400 = vmatprep.subr.bf16.mxu1 %v712_v29  ;;  %358 = vmatpush1.bf16.msra.mxu0 %v709_v25  ;;  %v234_v45 = vld [vmem:[%s895_s5 + $0x70] sm:$0x33]  ;;  %v235_v50 = vld [vmem:[%s895_s5 + $0x78] sm:$0x33]  ;;  %v716_v51 = vcombine.high %v223_v40, %v227_v41  ;;  %v715_v57 = vcombine.low %v223_v40, %v227_v41  ;;  %s751_s12 = sshll.u32 (%p856_p5), %s698_s15, 5 }
  0x29   : > { %v337_v42 = vand.u32 %v718_v31, %v332_v28  ;;  %v334_v43 = vand.u32 %v717_v34, %v332_v28  ;;  %401 = vmatpush1.bf16.msra.mxu1 %v711_v30  ;;  %v343_v47 = vand.u32 %v720_v37, %v332_v28  ;;  %v340_v48 = vand.u32 %v719_v38, %v332_v28  ;;  %s610_s21 = scalar_lea.vmem (%p856_p5), %s966_s3, %s751_s12 }
  0x2a   : > { %v722_v52 = vcombine.high %v230_v44, %v234_v45  ;;  %v724_v54 = vcombine.high %v231_v46, %v235_v50  ;;  %245 = vperm.xlu0 %778, %v237_v36   ;;  %v721_v56 = vcombine.low %v230_v44, %v234_v45  ;;  %v723_v59 = vcombine.low %v231_v46, %v235_v50 }
  0x2b   : > { %359 = vmatprep.subr.bf16.mxu0 %v337_v42  ;;  %402 = vmatprep.subr.bf16.mxu1 %v343_v47 }
  0x2c   : > { %360 = vmatpush1.bf16.msra.mxu0 %v334_v43  ;;  %v349_v58 = vand.u32 %v722_v52, %v332_v28  ;;  %v355_v60 = vand.u32 %v724_v54, %v332_v28  ;;  %v346_v61 = vand.u32 %v721_v56, %v332_v28  ;;  %v352_v62 = vand.u32 %v723_v59, %v332_v28 }
  0x2d   : > { %403 = vmatpush1.bf16.msra.mxu1 %v340_v48  ;;  %443 = vmatprep.subr.bf16.mxu0 %v714_v49 }
  0x2e   : > { %486 = vmatprep.subr.bf16.mxu1 %v716_v51 }
  0x2f   : > { %725 = vmatmul.mubr.msk.bf16.vlgmr.msra.gmra.mrb[0].mxu0 %vm325_vm2, %v779_v53 }
  0x30   : > { %726 = vmatmul.mubr.msk.bf16.vlgmr.msra.gmra.mrb[0].mxu1 %vm325_vm2, %v779_v53  ;;  %444 = vmatpush1.bf16.msra.mxu0 %v713_v55 }
  0x31   : > { %487 = vmatpush1.bf16.msra.mxu1 %v715_v57  ;;  %445 = vmatprep.subr.bf16.mxu0 %v349_v58 }
  0x32   : > { %488 = vmatprep.subr.bf16.mxu1 %v355_v60  ;;  %475 = vmatprep.mubr.bf16.mxu0 %v805_v18 }
  0x33   : > { %518 = vmatprep.mubr.bf16.mxu1 %v805_v18 }
  0x34   : > { %446 = vmatpush1.bf16.msra.mxu0 %v346_v61 }
  0x35   : > { %489 = vmatpush1.bf16.msra.mxu1 %v352_v62 }
  0x37   : > { %727 = vmatmul.mubr.msk.bf16.vlgmr.msra.gmra.mrb[4].mxu0 %vm325_vm2, %v779_v53 }
  0x38   : > { %728 = vmatmul.mubr.msk.bf16.vlgmr.msra.gmra.mrb[4].mxu1 %vm325_vm2, %v779_v53 }
  0xa2   : > { %v241_v63 = vpop.permute.xlu0 %240 }
  0xa9   : > { %v246_v1 = vpop.permute.xlu0 %245 }
 0x102   : > { %v391_v0 = vpop.f32.mrb[0].mxu0 }
 0x103   : > { %v392_v2 = vadd.f32 %v391_v0, %v241_v63  ;;  %v434_v3 = vpop.f32.mrb[0].mxu1  ;;  %v393_v4 = vpop.f32.mrb[1].mxu0 }
 0x104   : > { %v435_v5 = vadd.f32 %v434_v3, %v241_v63  ;;  %v394_v6 = vadd.f32 %v393_v4, %v241_v63  ;;  %v436_v7 = vpop.f32.mrb[1].mxu1  ;;  %v395_v8 = vpop.f32.mrb[2].mxu0 }
 0x105   : > { %v529_v9 = vmax.f32 %v392_v2, 0.0  ;;  %v437_v10 = vadd.f32 %v436_v7, %v241_v63  ;;  %v396_v11 = vadd.f32 %v395_v8, %v246_v1  ;;  %v438_v12 = vpop.f32.mrb[2].mxu1  ;;  %v397_v13 = vpop.f32.mrb[3].mxu0 }
 0x106   : > { %v531_v14 = vmax.f32 %v435_v5, 0.0  ;;  %v530_v15 = vmax.f32 %v394_v6, 0.0  ;;  %v439_v16 = vadd.f32 %v438_v12, %v246_v1  ;;  %v398_v17 = vadd.f32 %v397_v13, %v246_v1  ;;  %v440_v18 = vpop.f32.mrb[3].mxu1 }
 0x107   : > { %v532_v19 = vmax.f32 %v437_v10, 0.0  ;;  %v537_v20 = vmax.f32 %v396_v11, 0.0  ;;  %v441_v21 = vadd.f32 %v440_v18, %v246_v1 }
 0x108   : > { %v743_v22 = vpack.c.bf16 %v530_v15, %v529_v9  ;;  %v539_v23 = vmax.f32 %v439_v16, 0.0  ;;  %v538_v24 = vmax.f32 %v398_v17, 0.0 }
 0x109   : > { %v744_v25 = vpack.c.bf16 %v532_v19, %v531_v14  ;;  %v540_v26 = vmax.f32 %v441_v21, 0.0 }
 0x10a   : > { %593 = vst [vmem:[%s928_s11] sm:$0xff] %v743_v22  ;;  %v747_v27 = vpack.c.bf16 %v538_v24, %v537_v20  ;;  %v477_v28 = vpop.f32.mrb[4].mxu0 }
 0x10b   : > { %594 = vst [vmem:[%s928_s11 + $0x8] sm:$0xff] %v744_v25  ;;  %v748_v29 = vpack.c.bf16 %v540_v26, %v539_v23  ;;  %v478_v30 = vadd.f32 %v477_v28, %v241_v63  ;;  %v520_v31 = vpop.f32.mrb[4].mxu1  ;;  %v479_v32 = vpop.f32.mrb[5].mxu0 }
 0x10c   : > { %597 = vst [vmem:[%s928_s11 + $0x20] sm:$0xff] %v747_v27  ;;  %v521_v33 = vadd.f32 %v520_v31, %v241_v63  ;;  %v480_v34 = vadd.f32 %v479_v32, %v241_v63  ;;  %v522_v35 = vpop.f32.mrb[5].mxu1  ;;  %v481_v36 = vpop.f32.mrb[6].mxu0 }
 0x10d   : > { %598 = vst [vmem:[%s928_s11 + $0x28] sm:$0xff] %v748_v29  ;;  %v533_v37 = vmax.f32 %v478_v30, 0.0  ;;  %v523_v38 = vadd.f32 %v522_v35, %v241_v63  ;;  %v482_v39 = vadd.f32 %v481_v36, %v246_v1  ;;  %v524_v40 = vpop.f32.mrb[6].mxu1  ;;  %v483_v41 = vpop.f32.mrb[7].mxu0 }
 0x10e   : > { %v535_v42 = vmax.f32 %v521_v33, 0.0  ;;  %v534_v43 = vmax.f32 %v480_v34, 0.0  ;;  %v525_v44 = vadd.f32 %v524_v40, %v246_v1  ;;  %v484_v45 = vadd.f32 %v483_v41, %v246_v1  ;;  %v526_v46 = vpop.f32.mrb[7].mxu1 }
 0x10f   : > { %v536_v47 = vmax.f32 %v523_v38, 0.0  ;;  %v541_v48 = vmax.f32 %v482_v39, 0.0  ;;  %v527_v49 = vadd.f32 %v526_v46, %v246_v1  ;;  %607 = sbr.rel (!%p856_p5) target bundleno = 286 (0x11e), region = 59 }
 0x110   : > { %v745_v50 = vpack.c.bf16 %v534_v43, %v533_v37  ;;  %v543_v51 = vmax.f32 %v525_v44, 0.0  ;;  %v542_v52 = vmax.f32 %v484_v45, 0.0 }
 0x111   : > { %v746_v53 = vpack.c.bf16 %v536_v47, %v535_v42  ;;  %v544_v54 = vmax.f32 %v527_v49, 0.0  ;;  %v623_v57 = vld [vmem:[%s928_s11] sm:$0xff] (%p856_p5) }
 0x112   : > { %595 = vst [vmem:[%s928_s11 + $0x10] sm:$0xff] %v745_v50  ;;  %v749_v55 = vpack.c.bf16 %v542_v52, %v541_v48  ;;  %v625_v58 = vld [vmem:[%s928_s11 + $0x8] sm:$0xff] (%p856_p5)  ;;  %624 = vst [vmem:[%s610_s21] sm:$0xff] (%p856_p5), %v623_v57 }
 0x113   : > { %596 = vst [vmem:[%s928_s11 + $0x18] sm:$0xff] %v746_v53  ;;  %v750_v56 = vpack.c.bf16 %v544_v54, %v543_v51  ;;  %v631_v61 = vld [vmem:[%s928_s11 + $0x20] sm:$0xff] (%p856_p5)  ;;  %626 = vst [vmem:[%s610_s21 + $0x8] sm:$0xff] (%p856_p5), %v625_v58 }
 0x114   : > { %599 = vst [vmem:[%s928_s11 + $0x30] sm:$0xff] %v749_v55  ;;  %v633_v62 = vld [vmem:[%s928_s11 + $0x28] sm:$0xff] (%p856_p5)  ;;  %632 = vst [vmem:[%s610_s21 + $0x40] sm:$0xff] (%p856_p5), %v631_v61 }
 0x115   : > { %600 = vst [vmem:[%s928_s11 + $0x38] sm:$0xff] %v750_v56  ;;  %634 = vst [vmem:[%s610_s21 + $0x48] sm:$0xff] (%p856_p5), %v633_v62 }
 0x119   : > { %v627_v59 = vld [vmem:[%s928_s11 + $0x10] sm:$0xff] }
 0x11a   : > { %v629_v60 = vld [vmem:[%s928_s11 + $0x18] sm:$0xff]  ;;  %628 = vst [vmem:[%s610_s21 + $0x10] sm:$0xff] %v627_v59 }
 0x11b   : > { %630 = vst [vmem:[%s610_s21 + $0x18] sm:$0xff] %v629_v60  ;;  %v635_v63 = vld [vmem:[%s928_s11 + $0x30] sm:$0xff] }
 0x11c   : > { %v637_v0 = vld [vmem:[%s928_s11 + $0x38] sm:$0xff]  ;;  %636 = vst [vmem:[%s610_s21 + $0x50] sm:$0xff] %v635_v63 }
 0x11d   : > { %638 = vst [vmem:[%s610_s21 + $0x58] sm:$0xff] %v637_v0 }
 0x11e PF: > { %p10_p10 = scmp.ge.s32.totalorder %s843_s16, 4   ;;  %s968_s12 = smov %s798_s13 }
 0x11f   : > { %s969_s13 = smov %s854_s19  ;;  %s970_s14 = smov %s843_s16 }
 0x120   :  { %12 = sbr.rel (!%p10_p10) target bundleno = 2 (0x2), region = 113 }

// kernel: backbone_with_fpn_forward.10
= control target key start
LH: loop header
LB: loop body
LE: loop exit
PB: predicated region body
PF: predicated region fallthrough
CT: control target
= control target key end

     0   :  { %s776_s12 = smov 0   ;;  %s778_s13 = smov 0   ;;  %s904_s0 = inlined_call_operand.vmem [shape: bf16[24,144], index: 0, kind: input, shape index: {}]   ;;  %s905_s1 = inlined_call_operand.vmem [shape: bf16[144,512], index: 1, kind: input, shape index: {}]   ;;  %s906_s2 = inlined_call_operand.vmem [shape: f32[24,1], index: 2, kind: input, shape index: {}]   ;;  %s907_s3 = inlined_call_operand.vmem [shape: bf16[24,512], index: 3, kind: output, shape index: {}]  }
   0x1   :  { %s780_s14 = smov 0  }
   0x2 LB: > { %s608_s15 = sadd.s32 4294967295, %s753_s14   ;;  %s793_s16 = sadd.s32 1, %s753_s14   ;;  %s753_s14 = sphi %s780_s14, %s911_s14   ;;  %s749_s13 = sphi %s778_s13, %s910_s13   ;;  %s745_s12 = sphi %s776_s12, %s909_s12  }
   0x3   : > { %s38_s17 = ssub.s32 %s753_s14, %s793_s16  ;;  %s41_s18 = sadd.s32 1, %s749_s13 }
   0x4   : > { %p39_p0 = scmp.eq.s32.totalorder %s38_s17, 0  ;;  %p48_p1 = scmp.ne.s32.totalorder %s749_s13, %s745_s12 }
   0x5   : > { %p49_p2 = scmp.eq.s32.totalorder %s753_s14, 0  ;;  %p99_p3 = scmp.eq.s32.totalorder %s608_s15, 1 }
   0x6   : > { %s804_s19 = scalar_select %p39_p0, %s749_s13, %s41_s18  }
   0x7   : > { %p50_p4 = por %p49_p2, %p48_p1  ;;  %p806_p5 = por %p99_p3, %p48_p1 }
   0x8   : > { %p611_p6 = scmp.ge.s32.totalorder %s753_s14, 2 }
   0xa   : > { %127 = sbr.rel (%p611_p6) target bundleno = 30 (0x1e), region = 24 }
  0x11   : > { %130 = sbr.rel (!%p50_p4) target bundleno = 30 (0x1e), region = 28  ;;  %s132_s21 = sand.u32 (%p50_p4), 1, %s749_s13  }
  0x12   : > { %s646_s22 = sshll.u32 (%p50_p4), %s753_s14, 3  ;;  %s669_s23 = smul.u32 (%p50_p4), 144, %s132_s21 }
  0x13   : > { %s816_s26 = scalar_lea.vmem (%p50_p4), %s905_s1, %s646_s22 }
  0x14   : > { %v199_v0 = vld [vmem:[%s816_s26] sm:$0xff] (%p50_p4)  ;;  %v201_v1 = vld [vmem:[%s816_s26 + $0x10] sm:$0xff] (%p50_p4)  ;;  %s134_s27 = scalar_lea.vmem (%p50_p4), [#allocation2], %s669_s23 }
  0x15   : > { %v203_v2 = vld [vmem:[%s816_s26 + $0x20] sm:$0xff] (%p50_p4)  ;;  %v205_v3 = vld [vmem:[%s816_s26 + $0x30] sm:$0xff] (%p50_p4)  ;;  %200 = vst [vmem:[%s134_s27] sm:$0xff] (%p50_p4), %v199_v0  ;;  %202 = vst [vmem:[%s134_s27 + $0x8] sm:$0xff] (%p50_p4), %v201_v1 }
  0x16   : > { %v207_v4 = vld [vmem:[%s816_s26 + $0x40] sm:$0xff] (%p50_p4)  ;;  %v209_v5 = vld [vmem:[%s816_s26 + $0x50] sm:$0xff] (%p50_p4)  ;;  %204 = vst [vmem:[%s134_s27 + $0x10] sm:$0xff] (%p50_p4), %v203_v2  ;;  %206 = vst [vmem:[%s134_s27 + $0x18] sm:$0xff] (%p50_p4), %v205_v3 }
  0x17   : > { %208 = vst [vmem:[%s134_s27 + $0x20] sm:$0xff] (%p50_p4), %v207_v4  ;;  %210 = vst [vmem:[%s134_s27 + $0x28] sm:$0xff] (%p50_p4), %v209_v5  ;;  %v211_v6 = vld [vmem:[%s816_s26 + $0x60] sm:$0xff] (%p50_p4)  ;;  %v213_v7 = vld [vmem:[%s816_s26 + $0x70] sm:$0xff] (%p50_p4) }
  0x18   : > { %v215_v8 = vld [vmem:[%s816_s26 + $0x80] sm:$0xff]  ;;  %212 = vst [vmem:[%s134_s27 + $0x30] sm:$0xff] %v211_v6  ;;  %214 = vst [vmem:[%s134_s27 + $0x38] sm:$0xff] %v213_v7  ;;  %v217_v9 = vld [vmem:[%s816_s26 + $0x90] sm:$0xff] }
  0x19   : > { %216 = vst [vmem:[%s134_s27 + $0x40] sm:$0xff] %v215_v8  ;;  %v219_v10 = vld [vmem:[%s816_s26 + $0xa0] sm:$0xff]  ;;  %v221_v11 = vld [vmem:[%s816_s26 + $0xb0] sm:$0xff]  ;;  %218 = vst [vmem:[%s134_s27 + $0x48] sm:$0xff] %v217_v9 }
  0x1a   : > { %220 = vst [vmem:[%s134_s27 + $0x50] sm:$0xff] %v219_v10  ;;  %222 = vst [vmem:[%s134_s27 + $0x58] sm:$0xff] %v221_v11  ;;  %v223_v12 = vld [vmem:[%s816_s26 + $0xc0] sm:$0xff]  ;;  %v225_v13 = vld [vmem:[%s816_s26 + $0xd0] sm:$0xff] }
  0x1b   : > { %v227_v14 = vld [vmem:[%s816_s26 + $0xe0] sm:$0xff]  ;;  %224 = vst [vmem:[%s134_s27 + $0x60] sm:$0xff] %v223_v12  ;;  %226 = vst [vmem:[%s134_s27 + $0x68] sm:$0xff] %v225_v13  ;;  %v229_v15 = vld [vmem:[%s816_s26 + $0xf0] sm:$0xff] }
  0x1c   : > { %228 = vst [vmem:[%s134_s27 + $0x70] sm:$0xff] %v227_v14  ;;  %v231_v16 = vld [vmem:[%s816_s26 + $0x100] sm:$0xff]  ;;  %v233_v17 = vld [vmem:[%s816_s26 + $0x110] sm:$0xff]  ;;  %230 = vst [vmem:[%s134_s27 + $0x78] sm:$0xff] %v229_v15 }
  0x1d   : > { %232 = vst [vmem:[%s134_s27 + $0x80] sm:$0xff] %v231_v16  ;;  %234 = vst [vmem:[%s134_s27 + $0x88] sm:$0xff] %v233_v17 }
  0x1e PF: > { %p614_p7 = scmp.ge.s32.totalorder %s753_s14, 1  ;;  %p239_p8 = scmp.lt.s32.totalorder %s753_s14, 3 }
  0x20   : > { %p240_p9 = pnand %p614_p7, %p239_p8 }
  0x21   : > { %s246_s28 = sand.u32 (!%p240_p9), 1, %s745_s12   ;;  %vm415_vm0 = vcmask (!%p240_p9), 130048   ;;  %v728_v18 = vld [vmem:[%s904_s0 + $0x4] ss:$8 sps:$4 sm:$0xff] (!%p240_p9)   ;;  %v847_v19 = vld [vmem:[%s904_s0 + $0x10] sm:$0xff] (!%p240_p9)  ;;  %v755_v22 = vmov (!%p240_p9), 0  }
  0x22   : > { %243 = sbr.rel (%p240_p9) target bundleno = 305 (0x131), region = 66  ;;  %v292_v20 = vld [vmem:[%s906_s2] sm:$0xff] (!%p240_p9)  ;;  %v618_v21 = vcombine.high (!%p240_p9), %v847_v19, %v847_v19  ;;  %697 = vset.pattern.permute.xlu0 (!%p240_p9), %v755_v22  ;;  %698 = vset.pattern.permute.xlu1 (!%p240_p9), %v755_v22  ;;  %v294_v23 = vld [vmem:[%s906_s2 + $0x10] sm:$0xff] (!%p240_p9)  ;;  %v293_v27 = vld [vmem:[%s906_s2 + $0x8] sm:$0xff] (!%p240_p9)  ;;  %v617_v44 = vcombine.low (!%p240_p9), %v847_v19, %v847_v19 }
  0x23   : > { %s670_s29 = smul.u32 (!%p240_p9), 144, %s246_s28  ;;  %637 = vmatprep.mubr.msk.bf16.mxu0 (!%p240_p9), %vm415_vm0, %v728_v18  ;;  %297 = vperm.xlu0 (!%p240_p9), %697, %v292_v20   ;;  %v726_v43 = vld [vmem:[%s904_s0] ss:$8 sps:$4 sm:$0xff] (!%p240_p9)  }
  0x24   : > { %638 = vmatprep.mubr.msk.bf16.mxu1 (!%p240_p9), %vm415_vm0, %v618_v21  ;;  %307 = vperm.xlu1 (!%p240_p9), %698, %v294_v23   ;;  %s671_s23 = smul.u32 (!%p240_p9), 24, %s246_s28 }
  0x25   : > { %s857_s11 = scalar_lea.vmem (!%p240_p9), [#allocation2], %s670_s29 }
  0x26   : > { %v699_v24 = vld [vmem:[%s857_s11 + $0x4] ss:$8 sps:$4 sm:$0xff] (!%p240_p9)   ;;  %v701_v25 = vld [vmem:[%s857_s11] ss:$8 sps:$4 sm:$0xff] (!%p240_p9)   ;;  %v702_v26 = vld [vmem:[%s857_s11 + $0x14] ss:$8 sps:$4 sm:$0xff] (!%p240_p9)  }
  0x27   : > { %422 = vmatprep.subr.bf16.mxu0 (!%p240_p9), %v699_v24  ;;  %651 = vmatprep.subr.bf16.mxu1 (!%p240_p9), %v699_v24  ;;  %v704_v28 = vld [vmem:[%s857_s11 + $0x10] ss:$8 sps:$4 sm:$0xff] (!%p240_p9)   ;;  %v705_v29 = vld [vmem:[%s857_s11 + $0x24] ss:$8 sps:$4 sm:$0xff] (!%p240_p9)   ;;  %v707_v30 = vld [vmem:[%s857_s11 + $0x20] ss:$8 sps:$4 sm:$0xff] (!%p240_p9)  }
  0x28   : > { %423 = vmatpush1.bf16.msra.mxu0 (!%p240_p9), %v701_v25  ;;  %660 = vmatpush1.bf16.msra.mxu1 (!%p240_p9), %v701_v25  ;;  %v708_v31 = vld [vmem:[%s857_s11 + $0x34] ss:$8 sps:$4 sm:$0xff] (!%p240_p9)   ;;  %v710_v32 = vld [vmem:[%s857_s11 + $0x30] ss:$8 sps:$4 sm:$0xff] (!%p240_p9)   ;;  %v711_v33 = vld [vmem:[%s857_s11 + $0x44] ss:$8 sps:$4 sm:$0xff] (!%p240_p9)  }
  0x29   : > { %424 = vmatprep.subr.bf16.mxu0 %v702_v26  ;;  %652 = vmatprep.subr.bf16.mxu1 %v702_v26  ;;  %v713_v34 = vld [vmem:[%s857_s11 + $0x40] ss:$8 sps:$4 sm:$0xff]   ;;  %v714_v35 = vld [vmem:[%s857_s11 + $0x54] ss:$8 sps:$4 sm:$0xff]   ;;  %v716_v36 = vld [vmem:[%s857_s11 + $0x50] ss:$8 sps:$4 sm:$0xff]  }
  0x2a   : > { %302 = vperm.xlu0 %697, %v293_v27   ;;  %v717_v37 = vld [vmem:[%s857_s11 + $0x64] ss:$8 sps:$4 sm:$0xff]   ;;  %v719_v38 = vld [vmem:[%s857_s11 + $0x60] ss:$8 sps:$4 sm:$0xff]   ;;  %v720_v39 = vld [vmem:[%s857_s11 + $0x74] ss:$8 sps:$4 sm:$0xff]  }
  0x2b   : > { %v722_v40 = vld [vmem:[%s857_s11 + $0x70] ss:$8 sps:$4 sm:$0xff]   ;;  %v723_v41 = vld [vmem:[%s857_s11 + $0x84] ss:$8 sps:$4 sm:$0xff]   ;;  %v725_v42 = vld [vmem:[%s857_s11 + $0x80] ss:$8 sps:$4 sm:$0xff]  }
  0x2c   : > { %425 = vmatpush1.bf16.msra.mxu0 %v704_v28  ;;  %661 = vmatpush1.bf16.msra.mxu1 %v704_v28  ;;  %s267_s12 = scalar_lea.vmem [#allocation3], %s671_s23  ;;  %s650_s24 = sshll.u32 (%p806_p5), %s608_s15, 3 }
  0x2d   : > { %426 = vmatprep.subr.bf16.mxu0 %v705_v29  ;;  %653 = vmatprep.subr.bf16.mxu1 %v705_v29  ;;  %s511_s27 = scalar_lea.vmem (%p806_p5), %s907_s3, %s650_s24 }
  0x30   : > { %427 = vmatpush1.bf16.msra.mxu0 %v707_v30  ;;  %662 = vmatpush1.bf16.msra.mxu1 %v707_v30 }
  0x31   : > { %428 = vmatprep.subr.bf16.mxu0 %v708_v31  ;;  %654 = vmatprep.subr.bf16.mxu1 %v708_v31 }
  0x34   : > { %429 = vmatpush1.bf16.msra.mxu0 %v710_v32  ;;  %663 = vmatpush1.bf16.msra.mxu1 %v710_v32 }
  0x35   : > { %430 = vmatprep.subr.bf16.mxu0 %v711_v33  ;;  %655 = vmatprep.subr.bf16.mxu1 %v711_v33 }
  0x38   : > { %431 = vmatpush1.bf16.msra.mxu0 %v713_v34  ;;  %664 = vmatpush1.bf16.msra.mxu1 %v713_v34 }
  0x39   : > { %432 = vmatprep.subr.bf16.mxu0 %v714_v35  ;;  %656 = vmatprep.subr.bf16.mxu1 %v714_v35 }
  0x3c   : > { %433 = vmatpush1.bf16.msra.mxu0 %v716_v36  ;;  %665 = vmatpush1.bf16.msra.mxu1 %v716_v36 }
  0x3d   : > { %434 = vmatprep.subr.bf16.mxu0 %v717_v37  ;;  %657 = vmatprep.subr.bf16.mxu1 %v717_v37 }
  0x40   : > { %435 = vmatpush1.bf16.msra.mxu0 %v719_v38  ;;  %666 = vmatpush1.bf16.msra.mxu1 %v719_v38 }
  0x41   : > { %436 = vmatprep.subr.bf16.mxu0 %v720_v39  ;;  %658 = vmatprep.subr.bf16.mxu1 %v720_v39 }
  0x44   : > { %437 = vmatpush1.bf16.msra.mxu0 %v722_v40  ;;  %667 = vmatpush1.bf16.msra.mxu1 %v722_v40 }
  0x45   : > { %438 = vmatprep.subr.bf16.mxu0 %v723_v41  ;;  %659 = vmatprep.subr.bf16.mxu1 %v723_v41 }
  0x48   : > { %439 = vmatpush1.bf16.msra.mxu0 %v725_v42  ;;  %668 = vmatpush1.bf16.msra.mxu1 %v725_v42 }
  0x4b   : > { %455 = vmatmul.mubr.bf16.vlgmr.msra.gmra.mrb[0].mxu0 %v726_v43  ;;  %465 = vmatmul.mubr.bf16.vlgmr.msra.gmra.mrb[0].mxu1 %v617_v44 }
  0xa2   : > { %v298_v45 = vpop.permute.xlu0 %297 }
  0xa3   : > { %v308_v46 = vpop.permute.xlu1 %307 }
  0xa9   : > { %v303_v47 = vpop.permute.xlu0 %302 }
 0x11e   : > { %v456_v48 = vpop.f32.mrb[0].mxu0  ;;  %v466_v49 = vpop.f32.mrb[0].mxu1 }
 0x11f   : > { %v457_v50 = vadd.f32 %v456_v48, %v298_v45  ;;  %v458_v51 = vpop.f32.mrb[1].mxu0  ;;  %v468_v52 = vpop.f32.mrb[1].mxu1  ;;  %v467_v53 = vadd.f32 %v466_v49, %v308_v46 }
 0x120   : > { %v459_v54 = vadd.f32 %v458_v51, %v298_v45  ;;  %v469_v55 = vadd.f32 %v468_v52, %v308_v46  ;;  %v460_v56 = vpop.f32.mrb[2].mxu0  ;;  %v470_v57 = vpop.f32.mrb[2].mxu1 }
 0x121   : > { %v473_v58 = vmax.f32 %v457_v50, 0.0  ;;  %v477_v59 = vmax.f32 %v467_v53, 0.0  ;;  %v461_v60 = vadd.f32 %v460_v56, %v303_v47  ;;  %v462_v61 = vpop.f32.mrb[3].mxu0  ;;  %v471_v62 = vpop.f32.mrb[3].mxu1 }
 0x122   : > { %v474_v63 = vmax.f32 %v459_v54, 0.0  ;;  %v478_v0 = vmax.f32 %v469_v55, 0.0  ;;  %v463_v1 = vadd.f32 %v462_v61, %v303_v47  ;;  %508 = sbr.rel (!%p806_p5) target bundleno = 305 (0x131), region = 74 }
 0x123   : > { %v475_v2 = vmax.f32 %v461_v60, 0.0 }
 0x124   : > { %v647_v3 = vpack.c.bf16 %v474_v63, %v473_v58  ;;  %v649_v4 = vpack.c.bf16 %v478_v0, %v477_v59  ;;  %v476_v5 = vmax.f32 %v463_v1, 0.0 }
 0x126   : > { %499 = vst [vmem:[%s267_s12] sm:$0xff] %v647_v3  ;;  %501 = vst [vmem:[%s267_s12 + $0x10] sm:$0xff] %v649_v4  ;;  %v648_v6 = vpack.c.bf16 %v476_v5, %v475_v2 }
 0x128   : > { %500 = vst [vmem:[%s267_s12 + $0x8] sm:$0xff] %v648_v6 }
 0x12d   : > { %v543_v7 = vld [vmem:[%s267_s12] sm:$0xff]  ;;  %v547_v9 = vld [vmem:[%s267_s12 + $0x10] sm:$0xff] }
 0x12e   : > { %544 = vst [vmem:[%s511_s27] sm:$0xff] %v543_v7  ;;  %548 = vst [vmem:[%s511_s27 + $0x20] sm:$0xff] %v547_v9 }
 0x12f   : > { %v545_v8 = vld [vmem:[%s267_s12 + $0x8] sm:$0xff] }
 0x130   : > { %546 = vst [vmem:[%s511_s27 + $0x10] sm:$0xff] %v545_v8 }
 0x131 PF: > { %p10_p10 = scmp.ge.s32.totalorder %s793_s16, 4   ;;  %s909_s12 = smov %s749_s13 }
 0x132   : > { %s910_s13 = smov %s804_s19  ;;  %s911_s14 = smov %s793_s16 }
 0x133   :  { %12 = sbr.rel (!%p10_p10) target bundleno = 2 (0x2), region = 143 }

// kernel: backbone_with_fpn_forward.11
= control target key start
LH: loop header
LB: loop body
LE: loop exit
PB: predicated region body
PF: predicated region fallthrough
CT: control target
= control target key end

     0   :  { %v347_v0 = vmov 0   ;;  %vm169_vm0 = vcmask 719872   ;;  %vm176_vm1 = vcmask 1043456   ;;  %s472_s1 = inlined_call_operand.vmem [shape: bf16[216,128], index: 1, kind: input, shape index: {}]   ;;  %s473_s0 = inlined_call_operand.vmem [shape: bf16[32,216], index: 0, kind: input, shape index: {}]   ;;  %s474_s2 = inlined_call_operand.vmem [shape: f32[32,1], index: 2, kind: input, shape index: {}]   ;;  %s475_s3 = inlined_call_operand.vmem [shape: bf16[32,128], index: 3, kind: output, shape index: {}]  }
   0x1   :  { %180 = vmatprep.subr.bf16.mxu0 %v347_v0  ;;  %296 = vmatprep.subr.bf16.mxu1 %v347_v0  ;;  %v327_v1 = vld [vmem:[%s472_s1] sm:$0xff]   ;;  %v328_v2 = vld [vmem:[%s472_s1 + $0x8] sm:$0xff]   ;;  %v329_v3 = vld [vmem:[%s472_s1 + $0x10] sm:$0xff]  }
   0x2   :  { %326 = vset.pattern.permute.xlu1 %v347_v0  ;;  %325 = vset.pattern.permute.xlu0 %v347_v0  ;;  %v330_v4 = vld [vmem:[%s472_s1 + $0x18] sm:$0xff]   ;;  %v331_v5 = vld [vmem:[%s472_s1 + $0x20] sm:$0xff]   ;;  %v48_v8 = vld [vmem:[%s474_s2 + $0x10] sm:$0xff] }
   0x3   :  { %181 = vmatpush1.bf16.msra.mxu0 %v327_v1  ;;  %310 = vmatpush1.bf16.msra.mxu1 %v327_v1  ;;  %v343_v6 = vld [vmem:[%s473_s0 + $0x4] ss:$8 sps:$4 sm:$0xff]   ;;  %v346_v7 = vld [vmem:[%s473_s0 + $0x14] ss:$8 sps:$4 sm:$0xff]   ;;  %v340_v20 = vld [vmem:[%s472_s1 + $0x68] ss:$0 sps:$4 sm:$0xff]  }
   0x4   :  { %182 = vmatprep.subr.bf16.mxu0 %v347_v0  ;;  %297 = vmatprep.subr.bf16.mxu1 %v347_v0  ;;  %v46_v9 = vld [vmem:[%s474_s2] sm:$0xff]  ;;  %v332_v10 = vld [vmem:[%s472_s1 + $0x28] sm:$0xff]   ;;  %v49_v11 = vld [vmem:[%s474_s2 + $0x18] sm:$0xff]  ;;  %v178_v21 = vsel %vm176_vm1, %v340_v20, 0 }
   0x5   :  { %275 = vmatprep.mubr.msk.bf16.mxu0 %vm169_vm0, %v343_v6  ;;  %62 = vperm.xlu1 %326, %v48_v8   ;;  %v47_v12 = vld [vmem:[%s474_s2 + $0x8] sm:$0xff]  ;;  %v333_v13 = vld [vmem:[%s472_s1 + $0x30] sm:$0xff]   ;;  %v334_v14 = vld [vmem:[%s472_s1 + $0x38] sm:$0xff]  }
   0x6   :  { %52 = vperm.xlu0 %325, %v46_v9   ;;  %276 = vmatprep.mubr.msk.bf16.mxu1 %vm169_vm0, %v346_v7  ;;  %v335_v15 = vld [vmem:[%s472_s1 + $0x40] sm:$0xff]   ;;  %v336_v16 = vld [vmem:[%s472_s1 + $0x48] sm:$0xff]   ;;  %v337_v17 = vld [vmem:[%s472_s1 + $0x50] sm:$0xff]  }
   0x7   :  { %183 = vmatpush1.bf16.msra.mxu0 %v328_v2  ;;  %311 = vmatpush1.bf16.msra.mxu1 %v328_v2  ;;  %v338_v18 = vld [vmem:[%s472_s1 + $0x58] sm:$0xff]   ;;  %v339_v19 = vld [vmem:[%s472_s1 + $0x60] sm:$0xff]  }
   0x8   :  { %184 = vmatprep.subr.bf16.mxu0 %v347_v0  ;;  %298 = vmatprep.subr.bf16.mxu1 %v347_v0  ;;  %v341_v22 = vld [vmem:[%s473_s0] ss:$8 sps:$4 sm:$0xff]   ;;  %v344_v23 = vld [vmem:[%s473_s0 + $0x10] ss:$8 sps:$4 sm:$0xff]  }
   0x9   :  { %67 = vperm.xlu1 %326, %v49_v11  }
   0xa   :  { %57 = vperm.xlu0 %325, %v47_v12  }
   0xb   :  { %185 = vmatpush1.bf16.msra.mxu0 %v329_v3  ;;  %312 = vmatpush1.bf16.msra.mxu1 %v329_v3 }
   0xc   :  { %186 = vmatprep.subr.bf16.mxu0 %v347_v0  ;;  %299 = vmatprep.subr.bf16.mxu1 %v347_v0 }
   0xf   :  { %187 = vmatpush1.bf16.msra.mxu0 %v330_v4  ;;  %313 = vmatpush1.bf16.msra.mxu1 %v330_v4 }
  0x10   :  { %188 = vmatprep.subr.bf16.mxu0 %v347_v0  ;;  %300 = vmatprep.subr.bf16.mxu1 %v347_v0 }
  0x13   :  { %189 = vmatpush1.bf16.msra.mxu0 %v331_v5  ;;  %314 = vmatpush1.bf16.msra.mxu1 %v331_v5 }
  0x14   :  { %190 = vmatprep.subr.bf16.mxu0 %v347_v0  ;;  %301 = vmatprep.subr.bf16.mxu1 %v347_v0 }
  0x17   :  { %191 = vmatpush1.bf16.msra.mxu0 %v332_v10  ;;  %315 = vmatpush1.bf16.msra.mxu1 %v332_v10 }
  0x18   :  { %192 = vmatprep.subr.bf16.mxu0 %v347_v0  ;;  %302 = vmatprep.subr.bf16.mxu1 %v347_v0 }
  0x1b   :  { %193 = vmatpush1.bf16.msra.mxu0 %v333_v13  ;;  %316 = vmatpush1.bf16.msra.mxu1 %v333_v13 }
  0x1c   :  { %194 = vmatprep.subr.bf16.mxu0 %v347_v0  ;;  %303 = vmatprep.subr.bf16.mxu1 %v347_v0 }
  0x1f   :  { %195 = vmatpush1.bf16.msra.mxu0 %v334_v14  ;;  %317 = vmatpush1.bf16.msra.mxu1 %v334_v14 }
  0x20   :  { %196 = vmatprep.subr.bf16.mxu0 %v347_v0  ;;  %304 = vmatprep.subr.bf16.mxu1 %v347_v0 }
  0x23   :  { %197 = vmatpush1.bf16.msra.mxu0 %v335_v15  ;;  %318 = vmatpush1.bf16.msra.mxu1 %v335_v15 }
  0x24   :  { %198 = vmatprep.subr.bf16.mxu0 %v347_v0  ;;  %305 = vmatprep.subr.bf16.mxu1 %v347_v0 }
  0x27   :  { %199 = vmatpush1.bf16.msra.mxu0 %v336_v16  ;;  %319 = vmatpush1.bf16.msra.mxu1 %v336_v16 }
  0x28   :  { %200 = vmatprep.subr.bf16.mxu0 %v347_v0  ;;  %306 = vmatprep.subr.bf16.mxu1 %v347_v0 }
  0x2b   :  { %201 = vmatpush1.bf16.msra.mxu0 %v337_v17  ;;  %320 = vmatpush1.bf16.msra.mxu1 %v337_v17 }
  0x2c   :  { %202 = vmatprep.subr.bf16.mxu0 %v347_v0  ;;  %307 = vmatprep.subr.bf16.mxu1 %v347_v0 }
  0x2f   :  { %203 = vmatpush1.bf16.msra.mxu0 %v338_v18  ;;  %321 = vmatpush1.bf16.msra.mxu1 %v338_v18 }
  0x30   :  { %204 = vmatprep.subr.bf16.mxu0 %v347_v0  ;;  %308 = vmatprep.subr.bf16.mxu1 %v347_v0 }
  0x33   :  { %205 = vmatpush1.bf16.msra.mxu0 %v339_v19  ;;  %322 = vmatpush1.bf16.msra.mxu1 %v339_v19 }
  0x34   :  { %206 = vmatprep.subr.bf16.mxu0 %v347_v0  ;;  %309 = vmatprep.subr.bf16.mxu1 %v347_v0 }
  0x37   :  { %207 = vmatpush1.bf16.msra.mxu0 %v178_v21  ;;  %323 = vmatpush1.bf16.msra.mxu1 %v178_v21 }
  0x3a   :  { %213 = vmatmul.mubr.bf16.vlgmr.msra.gmra.mrb[0].mxu0 %v341_v22  ;;  %221 = vmatmul.mubr.bf16.vlgmr.msra.gmra.mrb[0].mxu1 %v344_v23 }
  0x84   :  { %v63_v24 = vpop.permute.xlu1 %62 }
  0x85   :  { %v53_v25 = vpop.permute.xlu0 %52 }
  0x88   :  { %v68_v26 = vpop.permute.xlu1 %67 }
  0x89   :  { %v58_v27 = vpop.permute.xlu0 %57 }
 0x10d   :  { %v214_v28 = vpop.f32.mrb[0].mxu0  ;;  %v222_v29 = vpop.f32.mrb[0].mxu1 }
 0x10e   :  { %v215_v30 = vadd.f32 %v214_v28, %v53_v25  ;;  %v223_v31 = vadd.f32 %v222_v29, %v63_v24  ;;  %v216_v32 = vpop.f32.mrb[1].mxu0  ;;  %v224_v33 = vpop.f32.mrb[1].mxu1 }
 0x10f   :  { %v217_v34 = vpop.f32.mrb[2].mxu0  ;;  %v225_v35 = vpop.f32.mrb[2].mxu1 }
 0x110   :  { %v218_v36 = vadd.f32 %v217_v34, %v58_v27  ;;  %v226_v37 = vadd.f32 %v225_v35, %v68_v26  ;;  %v219_v38 = vpop.f32.mrb[3].mxu0  ;;  %v227_v39 = vpop.f32.mrb[3].mxu1  ;;  %v229_v40 = vmax.f32 %v215_v30, 0.0  ;;  %v231_v41 = vmax.f32 %v223_v31, 0.0 }
 0x112   :  { %v230_v42 = vmax.f32 %v218_v36, 0.0  ;;  %v232_v43 = vmax.f32 %v226_v37, 0.0 }
 0x114   :  { %v288_v44 = vpack.c.bf16 %v230_v42, %v229_v40  ;;  %v293_v45 = vpack.c.bf16 %v232_v43, %v231_v41 }
 0x116   :  { %289 = vst [vmem:[%s475_s3] sm:$0xff] %v288_v44   ;;  %295 = vst [vmem:[%s475_s3 + $0x8] sm:$0xff] %v293_v45  }

// kernel: backbone_with_fpn_forward.12
= control target key start
LH: loop header
LB: loop body
LE: loop exit
PB: predicated region body
PF: predicated region fallthrough
CT: control target
= control target key end

     0   :  { %v640_v1 = vmov 0   ;;  %vm283_vm0 = vcmask 261120   ;;  %vm466_vm1 = vcmask 257024   ;;  %s811_s1 = inlined_call_operand.vmem [shape: bf16[288,32], index: 1, kind: input, shape index: {}]   ;;  %s812_s0 = inlined_call_operand.vmem [shape: bf16[64,288], index: 0, kind: input, shape index: {}]   ;;  %s813_s2 = inlined_call_operand.vmem [shape: f32[64,1], index: 2, kind: input, shape index: {}]   ;;  %s814_s3 = inlined_call_operand.vmem [shape: bf16[64,32], index: 3, kind: output, shape index: {}]  }
   0x1   :  { %v606_v0 = vld [vmem:[%s811_s1 + $0x40] sm:$0xff]   ;;  %605 = vset.pattern.permute.xlu1 %v640_v1  ;;  %604 = vset.pattern.permute.xlu0 %v640_v1  ;;  %v608_v3 = vld [vmem:[%s811_s1 + $0x48] sm:$0xff]   ;;  %v610_v5 = vld [vmem:[%s811_s1 + $0x50] sm:$0xff]  }
   0x2   :  { %v607_v2 = vld [vmem:[%s811_s1] sm:$0xff]   ;;  %529 = vmatprep.subr.bf16.mxu0 %v606_v0  ;;  %587 = vmatprep.subr.bf16.mxu1 %v606_v0  ;;  %v609_v4 = vld [vmem:[%s811_s1 + $0x8] sm:$0xff]   ;;  %v611_v6 = vld [vmem:[%s811_s1 + $0x10] sm:$0xff]  }
   0x3   :  { %530 = vmatpush3.bf16.msra.mxu0 %v607_v2  ;;  %595 = vmatpush3.bf16.msra.mxu1 %v607_v2  ;;  %v612_v7 = vld [vmem:[%s811_s1 + $0x58] sm:$0xff]   ;;  %v614_v9 = vld [vmem:[%s811_s1 + $0x60] sm:$0xff]   ;;  %v616_v11 = vld [vmem:[%s811_s1 + $0x68] sm:$0xff]  }
   0x4   :  { %531 = vmatprep.subr.bf16.mxu0 %v608_v3  ;;  %588 = vmatprep.subr.bf16.mxu1 %v608_v3  ;;  %v613_v8 = vld [vmem:[%s811_s1 + $0x18] sm:$0xff]   ;;  %v615_v10 = vld [vmem:[%s811_s1 + $0x20] sm:$0xff]   ;;  %v617_v14 = vld [vmem:[%s811_s1 + $0x28] sm:$0xff]  }
   0x5   :  { %v624_v12 = vld [vmem:[%s812_s0 + $0x4] ss:$12 sps:$4 sm:$0xff]   ;;  %v627_v13 = vld [vmem:[%s812_s0 + $0x4c] ss:$12 sps:$4 sm:$0xff]   ;;  %v625_v23 = vld [vmem:[%s812_s0 + $0x48] ss:$12 sps:$4 sm:$0xff]  }
   0x6   :  { %v618_v15 = vld [vmem:[%s811_s1 + $0x70] sm:$0xff]   ;;  %328 = vmatprep.mubr.bf16.mxu0 %v624_v12  ;;  %352 = vmatprep.mubr.bf16.mxu1 %v627_v13  ;;  %v620_v17 = vld [vmem:[%s811_s1 + $0x78] sm:$0xff]   ;;  %v67_v20 = vld [vmem:[%s813_s2] sm:$0xff] }
   0x7   :  { %532 = vmatpush3.bf16.msra.mxu0 %v609_v4  ;;  %596 = vmatpush3.bf16.msra.mxu1 %v609_v4  ;;  %v619_v16 = vld [vmem:[%s811_s1 + $0x30] sm:$0xff]   ;;  %v621_v18 = vld [vmem:[%s811_s1 + $0x38] sm:$0xff]   ;;  %v628_v21 = vld [vmem:[%s811_s1 + $0x80] sm:$0xff]  }
   0x8   :  { %533 = vmatprep.subr.bf16.mxu0 %v610_v5  ;;  %589 = vmatprep.subr.bf16.mxu1 %v610_v5  ;;  %v69_v19 = vld [vmem:[%s813_s2 + $0x10] sm:$0xff]  ;;  %v622_v22 = vld [vmem:[%s812_s0] ss:$12 sps:$4 sm:$0xff]   ;;  %v70_v24 = vld [vmem:[%s813_s2 + $0x18] sm:$0xff] }
   0x9   :  { %87 = vperm.xlu1 %605, %v69_v19   ;;  %77 = vperm.xlu0 %604, %v67_v20   ;;  %v68_v25 = vld [vmem:[%s813_s2 + $0x8] sm:$0xff]  ;;  %v71_v30 = vld [vmem:[%s813_s2 + $0x20] sm:$0xff]  ;;  %v74_v33 = vld [vmem:[%s813_s2 + $0x38] sm:$0xff] }
   0xa   :  { %v630_v26 = vld [vmem:[%s812_s0 + $0x1c] ss:$12 sps:$4 sm:$0xff]   ;;  %v633_v31 = vld [vmem:[%s812_s0 + $0x18] ss:$12 sps:$4 sm:$0xff]   ;;  %v634_v32 = vld [vmem:[%s812_s0 + $0x20] ss:$12 sps:$4 sm:$0xff]  }
   0xb   :  { %534 = vmatpush3.bf16.msra.mxu0 %v611_v6  ;;  %597 = vmatpush3.bf16.msra.mxu1 %v611_v6  ;;  %v629_v27 = vld [vmem:[%s811_s1 + $0x88] sm:$0xff]   ;;  %v73_v34 = vld [vmem:[%s813_s2 + $0x30] sm:$0xff]  ;;  %v637_v36 = vld [vmem:[%s812_s0 + $0x38] ss:$12 sps:$4 sm:$0xff]  }
   0xc   :  { %535 = vmatprep.subr.bf16.mxu0 %v612_v7  ;;  %590 = vmatprep.subr.bf16.mxu1 %v612_v7  ;;  %v632_v28 = vld [vmem:[%s812_s0 + $0x8] ss:$12 sps:$4 sm:$0xff]   ;;  %v638_v37 = vld [vmem:[%s812_s0 + $0x30] ss:$12 sps:$4 sm:$0xff]  }
   0xd   :  { %92 = vperm.xlu1 %605, %v70_v24   ;;  %82 = vperm.xlu0 %604, %v68_v25   ;;  %v72_v29 = vld [vmem:[%s813_s2 + $0x28] sm:$0xff]  ;;  %v635_v35 = vld [vmem:[%s812_s0 + $0x34] ss:$12 sps:$4 sm:$0xff]   ;;  %v639_v38 = vld [vmem:[%s812_s0 + $0x50] ss:$12 sps:$4 sm:$0xff]  }
   0xf   :  { %536 = vmatpush3.bf16.msra.mxu0 %v613_v8  ;;  %598 = vmatpush3.bf16.msra.mxu1 %v613_v8 }
  0x10   :  { %537 = vmatprep.subr.bf16.mxu0 %v614_v9  ;;  %591 = vmatprep.subr.bf16.mxu1 %v614_v9 }
  0x11   :  { %102 = vperm.xlu1 %605, %v72_v29   ;;  %97 = vperm.xlu0 %604, %v71_v30  }
  0x13   :  { %538 = vmatpush3.bf16.msra.mxu0 %v615_v10  ;;  %599 = vmatpush3.bf16.msra.mxu1 %v615_v10 }
  0x14   :  { %539 = vmatprep.subr.bf16.mxu0 %v616_v11  ;;  %592 = vmatprep.subr.bf16.mxu1 %v616_v11 }
  0x15   :  { %112 = vperm.xlu1 %605, %v74_v33   ;;  %107 = vperm.xlu0 %604, %v73_v34  }
  0x17   :  { %540 = vmatpush3.bf16.msra.mxu0 %v617_v14  ;;  %600 = vmatpush3.bf16.msra.mxu1 %v617_v14 }
  0x18   :  { %541 = vmatprep.subr.bf16.mxu0 %v618_v15  ;;  %593 = vmatprep.subr.bf16.mxu1 %v618_v15 }
  0x1b   :  { %542 = vmatpush3.bf16.msra.mxu0 %v619_v16  ;;  %601 = vmatpush3.bf16.msra.mxu1 %v619_v16 }
  0x1c   :  { %543 = vmatprep.subr.bf16.mxu0 %v620_v17  ;;  %594 = vmatprep.subr.bf16.mxu1 %v620_v17 }
  0x1f   :  { %544 = vmatpush3.bf16.msra.mxu0 %v621_v18  ;;  %602 = vmatpush3.bf16.msra.mxu1 %v621_v18 }
  0x20   :  { %575 = vmatprep.subr.bf16.mxu1 %v628_v21 }
  0x22   :  { %329 = vmatmul.mubr.bf16.vlgmr.msra.gmra.mrb[0].mxu0 %v622_v22  ;;  %353 = vmatmul.mubr.bf16.vlgmr.msra.gmra.mrb[0].mxu1 %v625_v23 }
  0x23   :  { %576 = vmatpush3.bf16.msra.mxu1 %v628_v21  ;;  %336 = vmatprep.mubr.bf16.mxu0 %v630_v26 }
  0x24   :  { %577 = vmatprep.subr.bf16.mxu1 %v629_v27  ;;  %579 = vmatprep.mubr.msk.bf16.mxu1 %vm283_vm0, %v632_v28 }
  0x27   :  { %578 = vmatpush3.bf16.msra.mxu1 %v629_v27 }
  0x2a   :  { %337 = vmatmul.mubr.bf16.gmra.mrb[4].mxu0 %v633_v31  ;;  %580 = vmatmul.mubr.msk.bf16.vlgmr.msra.gmra.mrb[4].mxu1 %vm283_vm0, %v634_v32 }
  0x2b   :  { %344 = vmatprep.mubr.bf16.mxu0 %v635_v35  ;;  %583 = vmatprep.mubr.msk.bf16.mxu1 %vm283_vm0, %v637_v36 }
  0x32   :  { %345 = vmatmul.mubr.bf16.gmra.mrb[8].mxu0 %v638_v37  ;;  %584 = vmatmul.mubr.msk.bf16.gmra.mrb[8].mxu1 %vm283_vm0, %v639_v38 }
  0x88   :  { %v88_v39 = vpop.permute.xlu1 %87  ;;  %v78_v40 = vpop.permute.xlu0 %77 }
  0x8c   :  { %v93_v41 = vpop.permute.xlu1 %92  ;;  %v83_v42 = vpop.permute.xlu0 %82 }
  0x90   :  { %v98_v55 = vpop.permute.xlu0 %97  ;;  %v103_v56 = vpop.permute.xlu1 %102 }
  0x94   :  { %v108_v5 = vpop.permute.xlu0 %107  ;;  %v113_v10 = vpop.permute.xlu1 %112 }
  0xf5   :  { %v545_v43 = vpop.f32.mrb[0].mxu0  ;;  %v563_v44 = vpop.f32.mrb[0].mxu1 }
  0xf6   :  { %v546_v45 = vpop.f32.mrb[1].mxu0  ;;  %v564_v46 = vpop.f32.mrb[1].mxu1 }
  0xf7   :  { %v547_v47 = vadd.f32 %v546_v45, %v545_v43  ;;  %v548_v48 = vpop.f32.mrb[2].mxu0  ;;  %v565_v49 = vadd.f32 %v564_v46, %v563_v44  ;;  %v566_v50 = vpop.f32.mrb[2].mxu1 }
  0xf8   :  { %v549_v51 = vpop.f32.mrb[3].mxu0  ;;  %v567_v52 = vpop.f32.mrb[3].mxu1 }
  0xf9   :  { %v550_v53 = vadd.f32 %v549_v51, %v548_v48  ;;  %v568_v54 = vadd.f32 %v567_v52, %v566_v50  ;;  %v331_v59 = vadd.f32 %v547_v47, %v78_v40  ;;  %v355_v15 = vadd.f32 %v565_v49, %v108_v5 }
  0xfb   :  { %v334_v2 = vadd.f32 %v550_v53, %v83_v42  ;;  %v358_v21 = vadd.f32 %v568_v54, %v113_v10 }
  0xfd   :  { %v551_v57 = vpop.f32.mrb[4].mxu0  ;;  %v581_v58 = vpop.f32.mrb[4].mxu1 }
  0xfe   :  { %v552_v60 = vpop.f32.mrb[5].mxu0  ;;  %v395_v61 = vpop.f32.mrb[5].mxu1 }
  0xff   :  { %v553_v62 = vadd.f32 %v552_v60, %v551_v57  ;;  %v396_v63 = vadd.f32 %v395_v61, %v331_v59  ;;  %v554_v0 = vpop.f32.mrb[6].mxu0  ;;  %v582_v1 = vpop.f32.mrb[6].mxu1 }
 0x100   :  { %v555_v3 = vpop.f32.mrb[7].mxu0  ;;  %v398_v4 = vpop.f32.mrb[7].mxu1 }
 0x101   :  { %v339_v6 = vadd.f32 %v553_v62, %v88_v39  ;;  %v426_v7 = vmax.f32 %v396_v63, 0.0  ;;  %v556_v8 = vadd.f32 %v555_v3, %v554_v0  ;;  %v399_v9 = vadd.f32 %v398_v4, %v334_v2 }
 0x103   :  { %v404_v11 = vadd.f32 %v581_v58, %v339_v6  ;;  %v521_v12 = vpack.c.bf16 %v426_v7, %v426_v7  ;;  %v342_v13 = vadd.f32 %v556_v8, %v93_v41  ;;  %v427_v14 = vmax.f32 %v399_v9, 0.0 }
 0x105   :  { %v428_v16 = vmax.f32 %v404_v11, 0.0  ;;  %467 = vst.msk [vmem:[%s814_s3] sm:$0xf] %vm466_vm1, %v521_v12  ;;  %v407_v17 = vadd.f32 %v582_v1, %v342_v13  ;;  %v522_v18 = vpack.c.bf16 %v427_v14, %v427_v14  ;;  %v557_v19 = vpop.f32.mrb[8].mxu0  ;;  %v585_v20 = vpop.f32.mrb[8].mxu1 }
 0x106   :  { %v420_v22 = vadd.f32 %v585_v20, %v355_v15  ;;  %v558_v23 = vpop.f32.mrb[9].mxu0  ;;  %v411_v24 = vpop.f32.mrb[9].mxu1 }
 0x107   :  { %v523_v25 = vpack.c.bf16 %v428_v16, %v428_v16  ;;  %v429_v26 = vmax.f32 %v407_v17, 0.0  ;;  %468 = vst.msk [vmem:[%s814_s3 + $0x4] sm:$0xf] %vm466_vm1, %v522_v18  ;;  %v559_v27 = vadd.f32 %v558_v23, %v557_v19  ;;  %v560_v28 = vpop.f32.mrb[10].mxu0  ;;  %v586_v29 = vpop.f32.mrb[10].mxu1 }
 0x108   :  { %v432_v30 = vmax.f32 %v420_v22, 0.0  ;;  %v423_v31 = vadd.f32 %v586_v29, %v358_v21  ;;  %v561_v32 = vpop.f32.mrb[11].mxu0  ;;  %v414_v33 = vpop.f32.mrb[11].mxu1 }
 0x109   :  { %469 = vst.msk [vmem:[%s814_s3 + $0x8] sm:$0xf] %vm466_vm1, %v523_v25  ;;  %v524_v34 = vpack.c.bf16 %v429_v26, %v429_v26  ;;  %v347_v35 = vadd.f32 %v559_v27, %v98_v55  ;;  %v562_v36 = vadd.f32 %v561_v32, %v560_v28 }
 0x10a   :  { %v527_v37 = vpack.c.bf16 %v432_v30, %v432_v30  ;;  %v433_v38 = vmax.f32 %v423_v31, 0.0 }
 0x10b   :  { %470 = vst.msk [vmem:[%s814_s3 + $0xc] sm:$0xf] %vm466_vm1, %v524_v34  ;;  %v412_v39 = vadd.f32 %v411_v24, %v347_v35  ;;  %v350_v40 = vadd.f32 %v562_v36, %v103_v56 }
 0x10c   :  { %473 = vst.msk [vmem:[%s814_s3 + $0x18] sm:$0xf] %vm466_vm1, %v527_v37  ;;  %v528_v41 = vpack.c.bf16 %v433_v38, %v433_v38 }
 0x10d   :  { %v430_v42 = vmax.f32 %v412_v39, 0.0  ;;  %v415_v43 = vadd.f32 %v414_v33, %v350_v40 }
 0x10e   :  { %474 = vst.msk [vmem:[%s814_s3 + $0x1c] sm:$0xf] %vm466_vm1, %v528_v41 }
 0x10f   :  { %v525_v44 = vpack.c.bf16 %v430_v42, %v430_v42  ;;  %v431_v45 = vmax.f32 %v415_v43, 0.0 }
 0x111   :  { %471 = vst.msk [vmem:[%s814_s3 + $0x10] sm:$0xf] %vm466_vm1, %v525_v44  ;;  %v526_v46 = vpack.c.bf16 %v431_v45, %v431_v45 }
 0x113   :  { %472 = vst.msk [vmem:[%s814_s3 + $0x14] sm:$0xf] %vm466_vm1, %v526_v46 }

// kernel: backbone_with_fpn_forward.14
= control target key start
LH: loop header
LB: loop body
LE: loop exit
PB: predicated region body
PF: predicated region fallthrough
CT: control target
= control target key end

     0   :  { %v254_v1 = vmov 0   ;;  %vm184_vm0 = vcmask 60416   ;;  %s329_s1 = inlined_call_operand.vmem [shape: bf16[128,8], index: 1, kind: input, shape index: {}]   ;;  %s330_s0 = inlined_call_operand.vmem [shape: bf16[32,128], index: 0, kind: input, shape index: {}]   ;;  %s331_s2 = inlined_call_operand.vmem [shape: f32[32,1], index: 2, kind: input, shape index: {}]   ;;  %s332_s3 = inlined_call_operand.vmem [shape: bf16[32,8], index: 3, kind: output, shape index: {}]  }
   0x1   :  { %v244_v0 = vld [vmem:[%s329_s1] sm:$0xff]   ;;  %243 = vset.pattern.permute.xlu1 %v254_v1  ;;  %242 = vset.pattern.permute.xlu0 %v254_v1  ;;  %v245_v2 = vld [vmem:[%s329_s1 + $0x8] sm:$0xff]   ;;  %v246_v3 = vld [vmem:[%s329_s1 + $0x10] sm:$0xff]  }
   0x2   :  { %221 = vmatprep.subr.bf16.mxu0 %v244_v0  ;;  %v247_v4 = vld [vmem:[%s329_s1 + $0x18] sm:$0xff]   ;;  %v252_v5 = vld [vmem:[%s330_s0] sm:$0xff]   ;;  %v37_v6 = vld [vmem:[%s331_s2 + $0x10] sm:$0xff] }
   0x3   :  { %222 = vmatpush3.bf16.msra.mxu0 %v244_v0  ;;  %237 = vmatprep.mubr.bf16.mxu0 %v252_v5  ;;  %v35_v7 = vld [vmem:[%s331_s2] sm:$0xff]  ;;  %v38_v9 = vld [vmem:[%s331_s2 + $0x18] sm:$0xff]  ;;  %v36_v10 = vld [vmem:[%s331_s2 + $0x8] sm:$0xff] }
   0x4   :  { %223 = vmatprep.subr.bf16.mxu0 %v245_v2  ;;  %51 = vperm.xlu1 %243, %v37_v6   ;;  %v248_v8 = vld [vmem:[%s329_s1 + $0x20] sm:$0xff]   ;;  %v249_v11 = vld [vmem:[%s329_s1 + $0x28] sm:$0xff]   ;;  %v250_v12 = vld [vmem:[%s329_s1 + $0x30] sm:$0xff]  }
   0x5   :  { %41 = vperm.xlu0 %242, %v35_v7   ;;  %v251_v13 = vld [vmem:[%s329_s1 + $0x38] sm:$0xff]   ;;  %v253_v14 = vld [vmem:[%s330_s0 + $0x8] sm:$0xff]  }
   0x7   :  { %224 = vmatpush3.bf16.msra.mxu0 %v245_v2 }
   0x8   :  { %225 = vmatprep.subr.bf16.mxu0 %v246_v3  ;;  %56 = vperm.xlu1 %243, %v38_v9  }
   0x9   :  { %46 = vperm.xlu0 %242, %v36_v10  }
   0xb   :  { %226 = vmatpush3.bf16.msra.mxu0 %v246_v3 }
   0xc   :  { %227 = vmatprep.subr.bf16.mxu0 %v247_v4 }
   0xf   :  { %228 = vmatpush3.bf16.msra.mxu0 %v247_v4 }
  0x10   :  { %229 = vmatprep.subr.bf16.mxu0 %v248_v8 }
  0x13   :  { %230 = vmatpush3.bf16.msra.mxu0 %v248_v8 }
  0x14   :  { %231 = vmatprep.subr.bf16.mxu0 %v249_v11 }
  0x17   :  { %232 = vmatpush3.bf16.msra.mxu0 %v249_v11 }
  0x18   :  { %233 = vmatprep.subr.bf16.mxu0 %v250_v12 }
  0x1b   :  { %234 = vmatpush3.bf16.msra.mxu0 %v250_v12 }
  0x1c   :  { %235 = vmatprep.subr.bf16.mxu0 %v251_v13 }
  0x1f   :  { %236 = vmatpush3.bf16.msra.mxu0 %v251_v13 }
  0x22   :  { %238 = vmatmul.mubr.bf16.vlgmr.msra.gmra.mrb[0].mxu0 %v253_v14 }
  0x83   :  { %v52_v15 = vpop.permute.xlu1 %51 }
  0x84   :  { %v42_v16 = vpop.permute.xlu0 %41 }
  0x87   :  { %v57_v20 = vpop.permute.xlu1 %56 }
  0x88   :  { %v47_v23 = vpop.permute.xlu0 %46 }
  0xf5   :  { %v239_v17 = vpop.f32.mrb[0].mxu0 }
  0xf6   :  { %v162_v18 = vadd.f32 %v239_v17, %v52_v15  ;;  %v153_v19 = vpop.f32.mrb[1].mxu0 }
  0xf7   :  { %v154_v21 = vadd.f32 %v153_v19, %v42_v16  ;;  %v240_v22 = vpop.f32.mrb[2].mxu0 }
  0xf8   :  { %v209_v24 = vpack.c.bf16 %v162_v18, %v162_v18  ;;  %v165_v25 = vadd.f32 %v240_v22, %v57_v20  ;;  %v156_v26 = vpop.f32.mrb[3].mxu0 }
  0xf9   :  { %v207_v27 = vpack.c.bf16 %v154_v21, %v154_v21  ;;  %v157_v28 = vadd.f32 %v156_v26, %v47_v23 }
  0xfa   :  { %187 = vst.msk [vmem:[%s332_s3 + $0x8] sm:$0xf] %vm184_vm0, %v209_v24  ;;  %v210_v29 = vpack.c.bf16 %v165_v25, %v165_v25 }
  0xfb   :  { %185 = vst.msk [vmem:[%s332_s3] sm:$0xf] %vm184_vm0, %v207_v27  ;;  %v208_v30 = vpack.c.bf16 %v157_v28, %v157_v28 }
  0xfc   :  { %188 = vst.msk [vmem:[%s332_s3 + $0xc] sm:$0xf] %vm184_vm0, %v210_v29 }
  0xfd   :  { %186 = vst.msk [vmem:[%s332_s3 + $0x4] sm:$0xf] %vm184_vm0, %v208_v30 }

// kernel: backbone_with_fpn_forward.13
= control target key start
LH: loop header
LB: loop body
LE: loop exit
PB: predicated region body
PF: predicated region fallthrough
CT: control target
= control target key end

     0   :  { %v1447_v1 = vmov 0   ;;  %vm647_vm0 = vcmask 523264   ;;  %vm1043_vm1 = vcmask 60416   ;;  %s1852_s1 = inlined_call_operand.vmem [shape: bf16[576,8], index: 1, kind: input, shape index: {}]   ;;  %s1853_s0 = inlined_call_operand.vmem [shape: bf16[128,576], index: 0, kind: input, shape index: {}]   ;;  %s1854_s2 = inlined_call_operand.vmem [shape: f32[128,1], index: 2, kind: input, shape index: {}]   ;;  %s1855_s3 = inlined_call_operand.vmem [shape: bf16[128,8], index: 3, kind: output, shape index: {}]  }
   0x1   :  { %v1355_v0 = vld [vmem:[%s1852_s1 + $0x40] sm:$0xff]   ;;  %1353 = vset.pattern.permute.xlu0 %v1447_v1  ;;  %1354 = vset.pattern.permute.xlu1 %v1447_v1  ;;  %v1359_v5 = vld [vmem:[%s1852_s1 + $0x48] sm:$0xff]   ;;  %v1363_v9 = vld [vmem:[%s1852_s1 + $0x50] sm:$0xff]  }
   0x2   :  { %v1356_v2 = vld [vmem:[%s1852_s1 + $0xc0] sm:$0xff]   ;;  %1180 = vmatprep.subr.bf16.mxu0 %v1355_v0  ;;  %v1360_v6 = vld [vmem:[%s1852_s1 + $0xc8] sm:$0xff]   ;;  %v1364_v10 = vld [vmem:[%s1852_s1 + $0xd0] sm:$0xff]  }
   0x3   :  { %v1357_v3 = vld [vmem:[%s1852_s1] sm:$0xff]   ;;  %1244 = vmatprep.subr.bf16.mxu1 %v1356_v2  ;;  %v1361_v7 = vld [vmem:[%s1852_s1 + $0x8] sm:$0xff]   ;;  %v1365_v11 = vld [vmem:[%s1852_s1 + $0x10] sm:$0xff]  }
   0x4   :  { %v1358_v4 = vld [vmem:[%s1852_s1 + $0x80] sm:$0xff]   ;;  %1181 = vmatpush3.bf16.msra.mxu0 %v1357_v3  ;;  %v1362_v8 = vld [vmem:[%s1852_s1 + $0x88] sm:$0xff]   ;;  %v1366_v12 = vld [vmem:[%s1852_s1 + $0x90] sm:$0xff]  }
   0x5   :  { %1245 = vmatpush3.bf16.msra.mxu1 %v1358_v4  ;;  %1182 = vmatprep.subr.bf16.mxu0 %v1359_v5  ;;  %v1367_v13 = vld [vmem:[%s1852_s1 + $0x58] sm:$0xff]   ;;  %v1371_v17 = vld [vmem:[%s1852_s1 + $0x60] sm:$0xff]   ;;  %v1375_v21 = vld [vmem:[%s1852_s1 + $0x68] sm:$0xff]  }
   0x6   :  { %1246 = vmatprep.subr.bf16.mxu1 %v1360_v6  ;;  %v1368_v14 = vld [vmem:[%s1852_s1 + $0xd8] sm:$0xff]   ;;  %v1372_v18 = vld [vmem:[%s1852_s1 + $0xe0] sm:$0xff]   ;;  %v1376_v22 = vld [vmem:[%s1852_s1 + $0xe8] sm:$0xff]  }
   0x7   :  { %v1369_v15 = vld [vmem:[%s1852_s1 + $0x18] sm:$0xff]   ;;  %v1373_v19 = vld [vmem:[%s1852_s1 + $0x20] sm:$0xff]   ;;  %v1377_v23 = vld [vmem:[%s1852_s1 + $0x28] sm:$0xff]  }
   0x8   :  { %1183 = vmatpush3.bf16.msra.mxu0 %v1361_v7  ;;  %v1370_v16 = vld [vmem:[%s1852_s1 + $0x98] sm:$0xff]   ;;  %v1374_v20 = vld [vmem:[%s1852_s1 + $0xa0] sm:$0xff]   ;;  %v1378_v24 = vld [vmem:[%s1852_s1 + $0xa8] sm:$0xff]  }
   0x9   :  { %1247 = vmatpush3.bf16.msra.mxu1 %v1362_v8  ;;  %1184 = vmatprep.subr.bf16.mxu0 %v1363_v9  ;;  %v1379_v25 = vld [vmem:[%s1852_s1 + $0x70] sm:$0xff]   ;;  %v1383_v29 = vld [vmem:[%s1852_s1 + $0x78] sm:$0xff]   ;;  %v1392_v36 = vld [vmem:[%s1853_s0 + $0xc] ss:$20 sps:$4 sm:$0xff]  }
   0xa   :  { %1248 = vmatprep.subr.bf16.mxu1 %v1364_v10  ;;  %v1380_v26 = vld [vmem:[%s1852_s1 + $0xf0] sm:$0xff]   ;;  %v1384_v30 = vld [vmem:[%s1852_s1 + $0xf8] sm:$0xff]   ;;  %v1393_v37 = vld [vmem:[%s1852_s1 + $0x100] sm:$0xff]   ;;  %801 = vmatprep.mubr.bf16.mxu1 %v1392_v36 }
   0xb   :  { %v1381_v27 = vld [vmem:[%s1852_s1 + $0x30] sm:$0xff]   ;;  %v1385_v31 = vld [vmem:[%s1852_s1 + $0x38] sm:$0xff]   ;;  %v1394_v38 = vld [vmem:[%s1853_s0 + $0x2c] ss:$20 sps:$4 sm:$0xff]  }
   0xc   :  { %1185 = vmatpush3.bf16.msra.mxu0 %v1365_v11  ;;  %v1382_v28 = vld [vmem:[%s1852_s1 + $0xb0] sm:$0xff]   ;;  %v1386_v32 = vld [vmem:[%s1852_s1 + $0xb8] sm:$0xff]   ;;  %v1406_v43 = vld [vmem:[%s1852_s1 + $0x108] sm:$0xff]  }
   0xd   :  { %1249 = vmatpush3.bf16.msra.mxu1 %v1366_v12  ;;  %1186 = vmatprep.subr.bf16.mxu0 %v1367_v13  ;;  %v1387_v33 = vld [vmem:[%s1853_s0] ss:$20 sps:$4 sm:$0xff]   ;;  %v1389_v34 = vld [vmem:[%s1853_s0 + $0x4] ss:$20 sps:$4 sm:$0xff]   ;;  %v1390_v35 = vld [vmem:[%s1853_s0 + $0x8] ss:$20 sps:$4 sm:$0xff]  }
   0xe   :  { %1250 = vmatprep.subr.bf16.mxu1 %v1368_v14  ;;  %704 = vmatprep.mubr.bf16.mxu0 %v1389_v34  ;;  %v1396_v39 = vld [vmem:[%s1853_s0 + $0x34] ss:$20 sps:$4 sm:$0xff]   ;;  %v1399_v41 = vld [vmem:[%s1853_s0 + $0x30] ss:$20 sps:$4 sm:$0xff]   ;;  %v1405_v46 = vld [vmem:[%s1853_s0 + $0x58] ss:$20 sps:$4 sm:$0xff]  }
   0xf   :  { %v1398_v40 = vld [vmem:[%s1853_s0 + $0x28] ss:$20 sps:$4 sm:$0xff]   ;;  %v1404_v45 = vld [vmem:[%s1853_s0 + $0x50] ss:$20 sps:$4 sm:$0xff]   ;;  %v1411_v51 = vld [vmem:[%s1853_s0 + $0x78] ss:$20 sps:$4 sm:$0xff]  }
  0x10   :  { %1187 = vmatpush3.bf16.msra.mxu0 %v1369_v15  ;;  %v1400_v42 = vld [vmem:[%s1853_s0 + $0x54] ss:$20 sps:$4 sm:$0xff]   ;;  %v1402_v44 = vld [vmem:[%s1853_s0 + $0x5c] ss:$20 sps:$4 sm:$0xff]   ;;  %v1409_v49 = vld [vmem:[%s1853_s0 + $0x84] ss:$20 sps:$4 sm:$0xff]  }
  0x11   :  { %1251 = vmatpush3.bf16.msra.mxu1 %v1370_v16  ;;  %1188 = vmatprep.subr.bf16.mxu0 %v1371_v17  ;;  %v1419_v47 = vld [vmem:[%s1852_s1 + $0x110] sm:$0xff]   ;;  %v1432_v50 = vld [vmem:[%s1852_s1 + $0x118] sm:$0xff]   ;;  %v1415_v54 = vld [vmem:[%s1853_s0 + $0xac] ss:$20 sps:$4 sm:$0xff]  }
  0x12   :  { %1252 = vmatprep.subr.bf16.mxu1 %v1372_v18  ;;  %v1407_v48 = vld [vmem:[%s1853_s0 + $0x7c] ss:$20 sps:$4 sm:$0xff]   ;;  %v1412_v52 = vld [vmem:[%s1853_s0 + $0x80] ss:$20 sps:$4 sm:$0xff]   ;;  %v1413_v53 = vld [vmem:[%s1853_s0 + $0xa4] ss:$20 sps:$4 sm:$0xff]  }
  0x13   :  { %v1417_v55 = vld [vmem:[%s1853_s0 + $0xa0] ss:$20 sps:$4 sm:$0xff]   ;;  %v1418_v56 = vld [vmem:[%s1853_s0 + $0xa8] ss:$20 sps:$4 sm:$0xff]   ;;  %v1425_v2 = vld [vmem:[%s1853_s0 + $0xd0] ss:$20 sps:$4 sm:$0xff]  }
  0x14   :  { %1189 = vmatpush3.bf16.msra.mxu0 %v1373_v19  ;;  %v1420_v57 = vld [vmem:[%s1853_s0 + $0xcc] ss:$20 sps:$4 sm:$0xff]   ;;  %v1422_v59 = vld [vmem:[%s1853_s0 + $0xd4] ss:$20 sps:$4 sm:$0xff]   ;;  %v138_v62 = vld [vmem:[%s1854_s2 + $0x18] sm:$0xff] }
  0x15   :  { %1253 = vmatpush3.bf16.msra.mxu1 %v1374_v20  ;;  %1190 = vmatprep.subr.bf16.mxu0 %v1375_v21  ;;  %v135_v58 = vld [vmem:[%s1854_s2] sm:$0xff]  ;;  %v137_v60 = vld [vmem:[%s1854_s2 + $0x10] sm:$0xff]  ;;  %v136_v61 = vld [vmem:[%s1854_s2 + $0x8] sm:$0xff] }
  0x16   :  { %1254 = vmatprep.subr.bf16.mxu1 %v1376_v22  ;;  %153 = vperm.xlu0 %1353, %v135_v58   ;;  %v139_v63 = vld [vmem:[%s1854_s2 + $0x20] sm:$0xff]  ;;  %v1424_v0 = vld [vmem:[%s1853_s0 + $0xc8] ss:$20 sps:$4 sm:$0xff]   ;;  %v141_v5 = vld [vmem:[%s1854_s2 + $0x30] sm:$0xff] }
  0x17   :  { %163 = vperm.xlu1 %1354, %v137_v60   ;;  %v140_v1 = vld [vmem:[%s1854_s2 + $0x28] sm:$0xff]  ;;  %v1428_v4 = vld [vmem:[%s1853_s0 + $0xfc] ss:$20 sps:$4 sm:$0xff]   ;;  %v143_v7 = vld [vmem:[%s1854_s2 + $0x40] sm:$0xff] }
  0x18   :  { %1191 = vmatpush3.bf16.msra.mxu0 %v1377_v23  ;;  %v1426_v3 = vld [vmem:[%s1853_s0 + $0xf4] ss:$20 sps:$4 sm:$0xff]   ;;  %v142_v6 = vld [vmem:[%s1854_s2 + $0x38] sm:$0xff]  ;;  %v1430_v8 = vld [vmem:[%s1853_s0 + $0xf0] ss:$20 sps:$4 sm:$0xff]  }
  0x19   :  { %1255 = vmatpush3.bf16.msra.mxu1 %v1378_v24  ;;  %1192 = vmatprep.subr.bf16.mxu0 %v1379_v25  ;;  %v144_v9 = vld [vmem:[%s1854_s2 + $0x48] sm:$0xff]  ;;  %v1433_v11 = vld [vmem:[%s1853_s0 + $0x11c] ss:$20 sps:$4 sm:$0xff]   ;;  %v1435_v12 = vld [vmem:[%s1853_s0 + $0x124] ss:$20 sps:$4 sm:$0xff]  }
  0x1a   :  { %1256 = vmatprep.subr.bf16.mxu1 %v1380_v26  ;;  %158 = vperm.xlu0 %1353, %v136_v61   ;;  %v1431_v10 = vld [vmem:[%s1853_s0 + $0xf8] ss:$20 sps:$4 sm:$0xff]   ;;  %v145_v13 = vld [vmem:[%s1854_s2 + $0x50] sm:$0xff]  ;;  %v147_v15 = vld [vmem:[%s1854_s2 + $0x60] sm:$0xff] }
  0x1b   :  { %168 = vperm.xlu1 %1354, %v138_v62   ;;  %v146_v14 = vld [vmem:[%s1854_s2 + $0x58] sm:$0xff]  ;;  %v148_v17 = vld [vmem:[%s1854_s2 + $0x68] sm:$0xff]  ;;  %v1438_v18 = vld [vmem:[%s1853_s0 + $0x120] ss:$20 sps:$4 sm:$0xff]  }
  0x1c   :  { %1193 = vmatpush3.bf16.msra.mxu0 %v1381_v27  ;;  %v1437_v16 = vld [vmem:[%s1853_s0 + $0x118] ss:$20 sps:$4 sm:$0xff]   ;;  %v1439_v19 = vld [vmem:[%s1853_s0 + $0x10] ss:$20 sps:$4 sm:$0xff]   ;;  %v1443_v25 = vld [vmem:[%s1853_s0 + $0x60] ss:$20 sps:$4 sm:$0xff]  }
  0x1d   :  { %1257 = vmatpush3.bf16.msra.mxu1 %v1382_v28  ;;  %1194 = vmatprep.subr.bf16.mxu0 %v1383_v29  ;;  %v1440_v20 = vld [vmem:[%s1853_s0 + $0xb0] ss:$20 sps:$4 sm:$0xff]   ;;  %v150_v22 = vld [vmem:[%s1854_s2 + $0x78] sm:$0xff]  ;;  %v1444_v26 = vld [vmem:[%s1853_s0 + $0x100] ss:$20 sps:$4 sm:$0xff]  }
  0x1e   :  { %1258 = vmatprep.subr.bf16.mxu1 %v1384_v30  ;;  %173 = vperm.xlu0 %1353, %v139_v63   ;;  %v149_v21 = vld [vmem:[%s1854_s2 + $0x70] sm:$0xff]  ;;  %v1441_v23 = vld [vmem:[%s1853_s0 + $0x38] ss:$20 sps:$4 sm:$0xff]   ;;  %v1445_v27 = vld [vmem:[%s1853_s0 + $0x88] ss:$20 sps:$4 sm:$0xff]  }
  0x1f   :  { %178 = vperm.xlu1 %1354, %v140_v1   ;;  %v1442_v24 = vld [vmem:[%s1853_s0 + $0xd8] ss:$20 sps:$4 sm:$0xff]   ;;  %v1446_v28 = vld [vmem:[%s1853_s0 + $0x128] ss:$20 sps:$4 sm:$0xff]  }
  0x20   :  { %1195 = vmatpush3.bf16.msra.mxu0 %v1385_v31 }
  0x21   :  { %1259 = vmatpush3.bf16.msra.mxu1 %v1386_v32  ;;  %1320 = vmatprep.subr.bf16.mxu0 %v1393_v37 }
  0x22   :  { %1344 = vmatprep.subr.bf16.mxu1 %v1393_v37  ;;  %183 = vperm.xlu0 %1353, %v141_v5  }
  0x23   :  { %705 = vmatmul.mubr.bf16.vlgmr.msra.gmra.mrb[0].mxu0 %v1387_v33  ;;  %188 = vperm.xlu1 %1354, %v142_v6  }
  0x24   :  { %802 = vmatmul.mubr.bf16.vlgmr.msra.gmra.mrb[0].mxu1 %v1390_v35  ;;  %1321 = vmatpush3.bf16.msra.mxu0 %v1393_v37 }
  0x25   :  { %1348 = vmatpush3.bf16.msra.mxu1 %v1393_v37  ;;  %712 = vmatprep.mubr.bf16.mxu0 %v1394_v38 }
  0x26   :  { %809 = vmatprep.mubr.bf16.mxu1 %v1396_v39  ;;  %1322 = vmatprep.subr.bf16.mxu0 %v1406_v43 }
  0x27   :  { %1345 = vmatprep.subr.bf16.mxu1 %v1406_v43  ;;  %193 = vperm.xlu0 %1353, %v143_v7  }
  0x28   :  { %1323 = vmatpush3.bf16.msra.mxu0 %v1406_v43  ;;  %198 = vperm.xlu1 %1354, %v144_v9  }
  0x29   :  { %1349 = vmatpush3.bf16.msra.mxu1 %v1406_v43  ;;  %1324 = vmatprep.subr.bf16.mxu0 %v1419_v47 }
  0x2a   :  { %1346 = vmatprep.subr.bf16.mxu1 %v1419_v47 }
  0x2b   :  { %713 = vmatmul.mubr.bf16.gmra.mrb[4].mxu0 %v1398_v40  ;;  %203 = vperm.xlu0 %1353, %v145_v13  }
  0x2c   :  { %810 = vmatmul.mubr.bf16.gmra.mrb[4].mxu1 %v1399_v41  ;;  %720 = vmatprep.mubr.bf16.mxu0 %v1400_v42 }
  0x2d   :  { %817 = vmatprep.mubr.bf16.mxu1 %v1402_v44  ;;  %1325 = vmatpush3.bf16.msra.mxu0 %v1419_v47 }
  0x2e   :  { %1350 = vmatpush3.bf16.msra.mxu1 %v1419_v47  ;;  %1326 = vmatprep.subr.bf16.mxu0 %v1432_v50 }
  0x2f   :  { %1347 = vmatprep.subr.bf16.mxu1 %v1432_v50  ;;  %208 = vperm.xlu1 %1354, %v146_v14  }
  0x30   :  { %213 = vperm.xlu0 %1353, %v147_v15  }
  0x31   :  { %1327 = vmatpush3.bf16.msra.mxu0 %v1432_v50 }
  0x32   :  { %1351 = vmatpush3.bf16.msra.mxu1 %v1432_v50 }
  0x33   :  { %721 = vmatmul.mubr.bf16.gmra.mrb[8].mxu0 %v1404_v45  ;;  %218 = vperm.xlu1 %1354, %v148_v17  }
  0x34   :  { %818 = vmatmul.mubr.bf16.gmra.mrb[8].mxu1 %v1405_v46  ;;  %728 = vmatprep.mubr.bf16.mxu0 %v1407_v48 }
  0x35   :  { %825 = vmatprep.mubr.bf16.mxu1 %v1409_v49  ;;  %223 = vperm.xlu0 %1353, %v149_v21  }
  0x37   :  { %228 = vperm.xlu1 %1354, %v150_v22  }
  0x3b   :  { %729 = vmatmul.mubr.bf16.gmra.mrb[12].mxu0 %v1411_v51 }
  0x3c   :  { %826 = vmatmul.mubr.bf16.gmra.mrb[12].mxu1 %v1412_v52  ;;  %736 = vmatprep.mubr.bf16.mxu0 %v1413_v53 }
  0x3d   :  { %833 = vmatprep.mubr.bf16.mxu1 %v1415_v54 }
  0x43   :  { %737 = vmatmul.mubr.bf16.gmra.mrb[16].mxu0 %v1417_v55 }
  0x44   :  { %834 = vmatmul.mubr.bf16.gmra.mrb[16].mxu1 %v1418_v56  ;;  %744 = vmatprep.mubr.bf16.mxu0 %v1420_v57 }
  0x45   :  { %841 = vmatprep.mubr.bf16.mxu1 %v1422_v59 }
  0x4b   :  { %745 = vmatmul.mubr.bf16.gmra.mrb[20].mxu0 %v1424_v0 }
  0x4c   :  { %842 = vmatmul.mubr.bf16.gmra.mrb[20].mxu1 %v1425_v2  ;;  %752 = vmatprep.mubr.bf16.mxu0 %v1426_v3 }
  0x4d   :  { %849 = vmatprep.mubr.bf16.mxu1 %v1428_v4 }
  0x53   :  { %753 = vmatmul.mubr.bf16.gmra.mrb[24].mxu0 %v1430_v8 }
  0x54   :  { %850 = vmatmul.mubr.bf16.gmra.mrb[24].mxu1 %v1431_v10  ;;  %760 = vmatprep.mubr.bf16.mxu0 %v1433_v11 }
  0x55   :  { %857 = vmatprep.mubr.bf16.mxu1 %v1435_v12 }
  0x5b   :  { %761 = vmatmul.mubr.bf16.gmra.mrb[28].mxu0 %v1437_v16 }
  0x5c   :  { %858 = vmatmul.mubr.bf16.gmra.mrb[28].mxu1 %v1438_v18  ;;  %1328 = vmatprep.mubr.msk.bf16.mxu0 %vm647_vm0, %v1439_v19 }
  0x5d   :  { %1336 = vmatprep.mubr.msk.bf16.mxu1 %vm647_vm0, %v1440_v20 }
  0x63   :  { %1329 = vmatmul.mubr.msk.bf16.vlgmr.msra.gmra.mrb[32].mxu0 %vm647_vm0, %v1441_v23 }
  0x64   :  { %1337 = vmatmul.mubr.msk.bf16.vlgmr.msra.gmra.mrb[32].mxu1 %vm647_vm0, %v1442_v24  ;;  %1332 = vmatprep.mubr.msk.bf16.mxu0 %vm647_vm0, %v1443_v25 }
  0x65   :  { %1340 = vmatprep.mubr.msk.bf16.mxu1 %vm647_vm0, %v1444_v26 }
  0x6b   :  { %1333 = vmatmul.mubr.msk.bf16.gmra.mrb[36].mxu0 %vm647_vm0, %v1445_v27 }
  0x6c   :  { %1341 = vmatmul.mubr.msk.bf16.gmra.mrb[36].mxu1 %vm647_vm0, %v1446_v28 }
  0x95   :  { %v154_v29 = vpop.permute.xlu0 %153 }
  0x96   :  { %v164_v30 = vpop.permute.xlu1 %163 }
  0x99   :  { %v159_v32 = vpop.permute.xlu0 %158 }
  0x9a   :  { %v169_v48 = vpop.permute.xlu1 %168 }
  0x9d   :  { %v174_v0 = vpop.permute.xlu0 %173 }
  0x9e   :  { %v179_v2 = vpop.permute.xlu1 %178 }
  0xa1   :  { %v184_v19 = vpop.permute.xlu0 %183 }
  0xf6   :  { %v1196_v31 = vpop.f32.mrb[0].mxu0 }
  0xf7   :  { %v1260_v33 = vpop.f32.mrb[0].mxu1  ;;  %v1197_v34 = vpop.f32.mrb[1].mxu0 }
  0xf8   :  { %v1198_v35 = vadd.f32 %v1197_v34, %v1196_v31  ;;  %v1261_v36 = vpop.f32.mrb[1].mxu1  ;;  %v1199_v37 = vpop.f32.mrb[2].mxu0 }
  0xf9   :  { %v1262_v38 = vadd.f32 %v1261_v36, %v1260_v33  ;;  %v1263_v39 = vpop.f32.mrb[2].mxu1  ;;  %v1200_v40 = vpop.f32.mrb[3].mxu0 }
  0xfa   :  { %v707_v41 = vadd.f32 %v1198_v35, %v154_v29  ;;  %v1201_v42 = vadd.f32 %v1200_v40, %v1199_v37  ;;  %v1264_v43 = vpop.f32.mrb[3].mxu1  ;;  %v189_v33 = vpop.permute.xlu1 %188 }
  0xfb   :  { %v1265_v44 = vadd.f32 %v1264_v43, %v1263_v39  ;;  %v194_v36 = vpop.permute.xlu0 %193 }
  0xfc   :  { %v710_v45 = vadd.f32 %v1201_v42, %v159_v32  ;;  %v1752_v46 = vadd.f32 %v1262_v38, %v707_v41 }
  0xfe   :  { %v1202_v47 = vpop.f32.mrb[4].mxu0  ;;  %v1754_v49 = vadd.f32 %v1265_v44, %v710_v45 }
  0xff   :  { %v1266_v50 = vpop.f32.mrb[4].mxu1  ;;  %v1203_v51 = vpop.f32.mrb[5].mxu0 }
 0x100   :  { %v1204_v52 = vadd.f32 %v1203_v51, %v1202_v47  ;;  %v1267_v53 = vpop.f32.mrb[5].mxu1  ;;  %v1205_v54 = vpop.f32.mrb[6].mxu0 }
 0x101   :  { %v1268_v55 = vadd.f32 %v1267_v53, %v1266_v50  ;;  %v1269_v56 = vpop.f32.mrb[6].mxu1  ;;  %v1206_v57 = vpop.f32.mrb[7].mxu0 }
 0x102   :  { %v715_v58 = vadd.f32 %v1204_v52, %v164_v30  ;;  %v1207_v59 = vadd.f32 %v1206_v57, %v1205_v54  ;;  %v1270_v60 = vpop.f32.mrb[7].mxu1  ;;  %v199_v52 = vpop.permute.xlu1 %198 }
 0x103   :  { %v1271_v61 = vadd.f32 %v1270_v60, %v1269_v56  ;;  %v204_v56 = vpop.permute.xlu0 %203 }
 0x104   :  { %v718_v62 = vadd.f32 %v1207_v59, %v169_v48  ;;  %v1756_v63 = vadd.f32 %v1268_v55, %v715_v58 }
 0x106   :  { %v1208_v1 = vpop.f32.mrb[8].mxu0  ;;  %v1758_v3 = vadd.f32 %v1271_v61, %v718_v62 }
 0x107   :  { %v1272_v4 = vpop.f32.mrb[8].mxu1  ;;  %v1209_v5 = vpop.f32.mrb[9].mxu0 }
 0x108   :  { %v1210_v6 = vadd.f32 %v1209_v5, %v1208_v1  ;;  %v1273_v7 = vpop.f32.mrb[9].mxu1  ;;  %v1211_v8 = vpop.f32.mrb[10].mxu0 }
 0x109   :  { %v1274_v9 = vadd.f32 %v1273_v7, %v1272_v4  ;;  %v1275_v10 = vpop.f32.mrb[10].mxu1  ;;  %v1212_v11 = vpop.f32.mrb[11].mxu0 }
 0x10a   :  { %v723_v12 = vadd.f32 %v1210_v6, %v174_v0  ;;  %v1213_v13 = vadd.f32 %v1212_v11, %v1211_v8  ;;  %v1276_v14 = vpop.f32.mrb[11].mxu1  ;;  %v209_v8 = vpop.permute.xlu1 %208 }
 0x10b   :  { %v1277_v15 = vadd.f32 %v1276_v14, %v1275_v10 }
 0x10c   :  { %v726_v16 = vadd.f32 %v1213_v13, %v179_v2  ;;  %v1760_v17 = vadd.f32 %v1274_v9, %v723_v12  ;;  %v214_v12 = vpop.permute.xlu0 %213 }
 0x10e   :  { %v1214_v18 = vpop.f32.mrb[12].mxu0  ;;  %v1762_v20 = vadd.f32 %v1277_v15, %v726_v16 }
 0x10f   :  { %v1278_v21 = vpop.f32.mrb[12].mxu1  ;;  %v1215_v22 = vpop.f32.mrb[13].mxu0 }
 0x110   :  { %v1216_v23 = vadd.f32 %v1215_v22, %v1214_v18  ;;  %v1279_v24 = vpop.f32.mrb[13].mxu1  ;;  %v1217_v25 = vpop.f32.mrb[14].mxu0 }
 0x111   :  { %v1280_v26 = vadd.f32 %v1279_v24, %v1278_v21  ;;  %v1281_v27 = vpop.f32.mrb[14].mxu1  ;;  %v1218_v28 = vpop.f32.mrb[15].mxu0 }
 0x112   :  { %v731_v29 = vadd.f32 %v1216_v23, %v184_v19  ;;  %v1219_v30 = vadd.f32 %v1218_v28, %v1217_v25  ;;  %v1282_v31 = vpop.f32.mrb[15].mxu1  ;;  %v219_v28 = vpop.permute.xlu1 %218 }
 0x113   :  { %v1283_v32 = vadd.f32 %v1282_v31, %v1281_v27 }
 0x114   :  { %v734_v34 = vadd.f32 %v1219_v30, %v189_v33  ;;  %v1764_v35 = vadd.f32 %v1280_v26, %v731_v29 }
 0x116   :  { %v1220_v37 = vpop.f32.mrb[16].mxu0  ;;  %v1766_v38 = vadd.f32 %v1283_v32, %v734_v34  ;;  %v224_v32 = vpop.permute.xlu0 %223 }
 0x117   :  { %v1284_v39 = vpop.f32.mrb[16].mxu1  ;;  %v1221_v40 = vpop.f32.mrb[17].mxu0 }
 0x118   :  { %v1222_v41 = vadd.f32 %v1221_v40, %v1220_v37  ;;  %v1285_v42 = vpop.f32.mrb[17].mxu1  ;;  %v1223_v43 = vpop.f32.mrb[18].mxu0 }
 0x119   :  { %v1286_v44 = vadd.f32 %v1285_v42, %v1284_v39  ;;  %v1287_v45 = vpop.f32.mrb[18].mxu1  ;;  %v1224_v47 = vpop.f32.mrb[19].mxu0 }
 0x11a   :  { %v739_v48 = vadd.f32 %v1222_v41, %v194_v36  ;;  %v1225_v50 = vadd.f32 %v1224_v47, %v1223_v43  ;;  %v1288_v51 = vpop.f32.mrb[19].mxu1 }
 0x11b   :  { %v1289_v53 = vadd.f32 %v1288_v51, %v1287_v45 }
 0x11c   :  { %v742_v54 = vadd.f32 %v1225_v50, %v199_v52  ;;  %v1768_v55 = vadd.f32 %v1286_v44, %v739_v48  ;;  %v229_v50 = vpop.permute.xlu1 %228 }
 0x11e   :  { %v1226_v57 = vpop.f32.mrb[20].mxu0  ;;  %v1770_v58 = vadd.f32 %v1289_v53, %v742_v54 }
 0x11f   :  { %v1290_v59 = vpop.f32.mrb[20].mxu1  ;;  %v1227_v60 = vpop.f32.mrb[21].mxu0 }
 0x120   :  { %v1228_v61 = vadd.f32 %v1227_v60, %v1226_v57  ;;  %v1291_v62 = vpop.f32.mrb[21].mxu1  ;;  %v1229_v0 = vpop.f32.mrb[22].mxu0 }
 0x121   :  { %v1292_v1 = vadd.f32 %v1291_v62, %v1290_v59  ;;  %v1293_v2 = vpop.f32.mrb[22].mxu1  ;;  %v1230_v4 = vpop.f32.mrb[23].mxu0 }
 0x122   :  { %v747_v5 = vadd.f32 %v1228_v61, %v204_v56  ;;  %v1231_v6 = vadd.f32 %v1230_v4, %v1229_v0  ;;  %v1294_v7 = vpop.f32.mrb[23].mxu1 }
 0x123   :  { %v1295_v9 = vadd.f32 %v1294_v7, %v1293_v2 }
 0x124   :  { %v750_v10 = vadd.f32 %v1231_v6, %v209_v8  ;;  %v844_v11 = vadd.f32 %v1292_v1, %v747_v5 }
 0x126   :  { %v1232_v13 = vpop.f32.mrb[24].mxu0  ;;  %v847_v14 = vadd.f32 %v1295_v9, %v750_v10 }
 0x127   :  { %v1296_v15 = vpop.f32.mrb[24].mxu1  ;;  %v1233_v16 = vpop.f32.mrb[25].mxu0 }
 0x128   :  { %v1234_v18 = vadd.f32 %v1233_v16, %v1232_v13  ;;  %v1297_v19 = vpop.f32.mrb[25].mxu1  ;;  %v1235_v21 = vpop.f32.mrb[26].mxu0 }
 0x129   :  { %v1298_v22 = vadd.f32 %v1297_v19, %v1296_v15  ;;  %v1299_v23 = vpop.f32.mrb[26].mxu1  ;;  %v1236_v24 = vpop.f32.mrb[27].mxu0 }
 0x12a   :  { %v755_v25 = vadd.f32 %v1234_v18, %v214_v12  ;;  %v1237_v26 = vadd.f32 %v1236_v24, %v1235_v21  ;;  %v1300_v27 = vpop.f32.mrb[27].mxu1 }
 0x12b   :  { %v1301_v29 = vadd.f32 %v1300_v27, %v1299_v23 }
 0x12c   :  { %v758_v30 = vadd.f32 %v1237_v26, %v219_v28  ;;  %v1772_v31 = vadd.f32 %v1298_v22, %v755_v25 }
 0x12e   :  { %v1238_v33 = vpop.f32.mrb[28].mxu0  ;;  %v1774_v34 = vadd.f32 %v1301_v29, %v758_v30 }
 0x12f   :  { %v1302_v36 = vpop.f32.mrb[28].mxu1  ;;  %v1239_v37 = vpop.f32.mrb[29].mxu0 }
 0x130   :  { %v1240_v39 = vadd.f32 %v1239_v37, %v1238_v33  ;;  %v1303_v40 = vpop.f32.mrb[29].mxu1  ;;  %v1241_v41 = vpop.f32.mrb[30].mxu0 }
 0x131   :  { %v1304_v42 = vadd.f32 %v1303_v40, %v1302_v36  ;;  %v1305_v43 = vpop.f32.mrb[30].mxu1  ;;  %v1242_v44 = vpop.f32.mrb[31].mxu0 }
 0x132   :  { %v763_v45 = vadd.f32 %v1240_v39, %v224_v32  ;;  %v1243_v47 = vadd.f32 %v1242_v44, %v1241_v41  ;;  %v1306_v48 = vpop.f32.mrb[31].mxu1 }
 0x133   :  { %v1307_v51 = vadd.f32 %v1306_v48, %v1305_v43 }
 0x134   :  { %v766_v52 = vadd.f32 %v1243_v47, %v229_v50  ;;  %v860_v53 = vadd.f32 %v1304_v42, %v763_v45 }
 0x136   :  { %v1330_v54 = vpop.f32.mrb[32].mxu0  ;;  %v863_v56 = vadd.f32 %v1307_v51, %v766_v52 }
 0x137   :  { %v909_v57 = vadd.f32 %v1330_v54, %v1756_v63  ;;  %v1338_v59 = vpop.f32.mrb[32].mxu1  ;;  %v900_v60 = vpop.f32.mrb[33].mxu0 }
 0x138   :  { %v941_v61 = vadd.f32 %v1338_v59, %v844_v11  ;;  %v901_v62 = vadd.f32 %v900_v60, %v1752_v46  ;;  %v932_v0 = vpop.f32.mrb[33].mxu1  ;;  %v1331_v1 = vpop.f32.mrb[34].mxu0 }
 0x139   :  { %v965_v2 = vmax.f32 %v909_v57, 0.0  ;;  %v933_v4 = vadd.f32 %v932_v0, %v1768_v55  ;;  %v912_v5 = vadd.f32 %v1331_v1, %v1758_v3  ;;  %v1339_v6 = vpop.f32.mrb[34].mxu1  ;;  %v903_v7 = vpop.f32.mrb[35].mxu0 }
 0x13a   :  { %v973_v8 = vmax.f32 %v941_v61, 0.0  ;;  %v963_v9 = vmax.f32 %v901_v62, 0.0  ;;  %v944_v10 = vadd.f32 %v1339_v6, %v847_v14  ;;  %v904_v63 = vadd.f32 %v903_v7, %v1754_v49  ;;  %v935_v12 = vpop.f32.mrb[35].mxu1 }
 0x13b   :  { %v1166_v13 = vpack.c.bf16 %v965_v2, %v965_v2  ;;  %v971_v11 = vmax.f32 %v933_v4, 0.0  ;;  %v966_v15 = vmax.f32 %v912_v5, 0.0  ;;  %v936_v46 = vadd.f32 %v935_v12, %v1770_v58 }
 0x13c   :  { %v1174_v16 = vpack.c.bf16 %v973_v8, %v973_v8  ;;  %v1164_v18 = vpack.c.bf16 %v963_v9, %v963_v9  ;;  %v974_v19 = vmax.f32 %v944_v10, 0.0  ;;  %v964_v21 = vmax.f32 %v904_v63, 0.0 }
 0x13d   :  { %1046 = vst.msk [vmem:[%s1855_s3 + $0x8] sm:$0xf] %vm1043_vm1, %v1166_v13  ;;  %v1172_v3 = vpack.c.bf16 %v971_v11, %v971_v11  ;;  %v1167_v55 = vpack.c.bf16 %v966_v15, %v966_v15  ;;  %v972_v14 = vmax.f32 %v936_v46, 0.0 }
 0x13e   :  { %1054 = vst.msk [vmem:[%s1855_s3 + $0x28] sm:$0xf] %vm1043_vm1, %v1174_v16  ;;  %1044 = vst.msk [vmem:[%s1855_s3] sm:$0xf] %vm1043_vm1, %v1164_v18  ;;  %v1175_v49 = vpack.c.bf16 %v974_v19, %v974_v19  ;;  %v1165_v58 = vpack.c.bf16 %v964_v21, %v964_v21  ;;  %v1334_v22 = vpop.f32.mrb[36].mxu0 }
 0x13f   :  { %1052 = vst.msk [vmem:[%s1855_s3 + $0x20] sm:$0xf] %vm1043_vm1, %v1172_v3  ;;  %1047 = vst.msk [vmem:[%s1855_s3 + $0xc] sm:$0xf] %vm1043_vm1, %v1167_v55  ;;  %v1173_v23 = vpack.c.bf16 %v972_v14, %v972_v14  ;;  %v925_v24 = vadd.f32 %v1334_v22, %v1764_v35  ;;  %v1342_v25 = vpop.f32.mrb[36].mxu1  ;;  %v916_v26 = vpop.f32.mrb[37].mxu0 }
 0x140   :  { %1055 = vst.msk [vmem:[%s1855_s3 + $0x2c] sm:$0xf] %vm1043_vm1, %v1175_v49  ;;  %1045 = vst.msk [vmem:[%s1855_s3 + $0x4] sm:$0xf] %vm1043_vm1, %v1165_v58  ;;  %v957_v27 = vadd.f32 %v1342_v25, %v860_v53  ;;  %v917_v28 = vadd.f32 %v916_v26, %v1760_v17  ;;  %v948_v29 = vpop.f32.mrb[37].mxu1  ;;  %v1335_v30 = vpop.f32.mrb[38].mxu0 }
 0x141   :  { %1053 = vst.msk [vmem:[%s1855_s3 + $0x24] sm:$0xf] %vm1043_vm1, %v1173_v23  ;;  %v969_v35 = vmax.f32 %v925_v24, 0.0  ;;  %v949_v32 = vadd.f32 %v948_v29, %v1772_v31  ;;  %v928_v33 = vadd.f32 %v1335_v30, %v1766_v38  ;;  %v1343_v36 = vpop.f32.mrb[38].mxu1  ;;  %v919_v37 = vpop.f32.mrb[39].mxu0 }
 0x142   :  { %v977_v39 = vmax.f32 %v957_v27, 0.0  ;;  %v967_v40 = vmax.f32 %v917_v28, 0.0  ;;  %v960_v41 = vadd.f32 %v1343_v36, %v863_v56  ;;  %v920_v42 = vadd.f32 %v919_v37, %v1762_v20  ;;  %v951_v17 = vpop.f32.mrb[39].mxu1 }
 0x143   :  { %v1170_v43 = vpack.c.bf16 %v969_v35, %v969_v35  ;;  %v975_v44 = vmax.f32 %v949_v32, 0.0  ;;  %v970_v45 = vmax.f32 %v928_v33, 0.0  ;;  %v952_v47 = vadd.f32 %v951_v17, %v1774_v34 }
 0x144   :  { %v1178_v48 = vpack.c.bf16 %v977_v39, %v977_v39  ;;  %v1168_v50 = vpack.c.bf16 %v967_v40, %v967_v40  ;;  %v978_v51 = vmax.f32 %v960_v41, 0.0  ;;  %v968_v52 = vmax.f32 %v920_v42, 0.0 }
 0x145   :  { %1050 = vst.msk [vmem:[%s1855_s3 + $0x18] sm:$0xf] %vm1043_vm1, %v1170_v43  ;;  %v1176_v38 = vpack.c.bf16 %v975_v44, %v975_v44  ;;  %v1171_v31 = vpack.c.bf16 %v970_v45, %v970_v45  ;;  %v976_v53 = vmax.f32 %v952_v47, 0.0 }
 0x146   :  { %1058 = vst.msk [vmem:[%s1855_s3 + $0x38] sm:$0xf] %vm1043_vm1, %v1178_v48  ;;  %1048 = vst.msk [vmem:[%s1855_s3 + $0x10] sm:$0xf] %vm1043_vm1, %v1168_v50  ;;  %v1179_v20 = vpack.c.bf16 %v978_v51, %v978_v51  ;;  %v1169_v34 = vpack.c.bf16 %v968_v52, %v968_v52 }
 0x147   :  { %1056 = vst.msk [vmem:[%s1855_s3 + $0x30] sm:$0xf] %vm1043_vm1, %v1176_v38  ;;  %1051 = vst.msk [vmem:[%s1855_s3 + $0x1c] sm:$0xf] %vm1043_vm1, %v1171_v31  ;;  %v1177_v54 = vpack.c.bf16 %v976_v53, %v976_v53 }
 0x148   :  { %1059 = vst.msk [vmem:[%s1855_s3 + $0x3c] sm:$0xf] %vm1043_vm1, %v1179_v20  ;;  %1049 = vst.msk [vmem:[%s1855_s3 + $0x14] sm:$0xf] %vm1043_vm1, %v1169_v34 }
 0x149   :  { %1057 = vst.msk [vmem:[%s1855_s3 + $0x34] sm:$0xf] %vm1043_vm1, %v1177_v54 }

// kernel: backbone_with_fpn_forward.16
= control target key start
LH: loop header
LB: loop body
LE: loop exit
PB: predicated region body
PF: predicated region fallthrough
CT: control target
= control target key end

     0   :  { %v217_v1 = vmov 0   ;;  %vm72_vm0 = vcmask 261120   ;;  %s281_s1 = inlined_call_operand.vmem [shape: bf16[32,128], index: 1, kind: input, shape index: {}]   ;;  %s282_s0 = inlined_call_operand.vmem [shape: bf16[32,32], index: 0, kind: input, shape index: {}]   ;;  %s283_s2 = inlined_call_operand.vmem [shape: f32[32,1], index: 2, kind: input, shape index: {}]   ;;  %s284_s3 = inlined_call_operand.vmem [shape: bf16[32,128], index: 3, kind: input, shape index: {}]   ;;  %s285_s4 = inlined_call_operand.vmem [shape: bf16[32,128], index: 4, kind: output, shape index: {}]  }
   0x1   :  { %v213_v0 = vld [vmem:[%s281_s1] sm:$0xff]   ;;  %212 = vset.pattern.permute.xlu1 %v217_v1  ;;  %211 = vset.pattern.permute.xlu0 %v217_v1  ;;  %v214_v2 = vld [vmem:[%s281_s1 + $0x8] sm:$0xff]   ;;  %v28_v4 = vld [vmem:[%s283_s2 + $0x10] sm:$0xff] }
   0x2   :  { %202 = vmatprep.subr.bf16.mxu0 %v213_v0  ;;  %v215_v3 = vld [vmem:[%s282_s0] sm:$0xff]   ;;  %42 = vperm.xlu1 %212, %v28_v4   ;;  %v216_v6 = vld [vmem:[%s282_s0 + $0x8] sm:$0xff]   ;;  %v29_v7 = vld [vmem:[%s283_s2 + $0x18] sm:$0xff] }
   0x3   :  { %203 = vmatpush3.bf16.msra.mxu0 %v213_v0  ;;  %206 = vmatprep.mubr.msk.bf16.mxu0 %vm72_vm0, %v215_v3  ;;  %v26_v5 = vld [vmem:[%s283_s2] sm:$0xff]  ;;  %v27_v8 = vld [vmem:[%s283_s2 + $0x8] sm:$0xff] }
   0x4   :  { %204 = vmatprep.subr.bf16.mxu0 %v214_v2  ;;  %32 = vperm.xlu0 %211, %v26_v5   ;;  %v196_v11 = vld [vmem:[%s284_s3 + $0x8] sm:$0xff]   ;;  %v179_v12 = vld [vmem:[%s284_s3] sm:$0xff]  }
   0x5   :  { %v184_v15 = vunpack.c.l.bf16 %v196_v11  ;;  %v185_v17 = vunpack.c.h.bf16 %v196_v11  ;;  %v180_v20 = vunpack.c.l.bf16 %v179_v12  ;;  %v181_v22 = vunpack.c.h.bf16 %v179_v12 }
   0x6   :  { %47 = vperm.xlu1 %212, %v29_v7  }
   0x7   :  { %205 = vmatpush3.bf16.msra.mxu0 %v214_v2 }
   0x8   :  { %37 = vperm.xlu0 %211, %v27_v8  }
   0xa   :  { %207 = vmatmul.mubr.msk.bf16.vlgmr.msra.gmra.mrb[0].mxu0 %vm72_vm0, %v216_v6 }
  0x81   :  { %v43_v9 = vpop.permute.xlu1 %42 }
  0x83   :  { %v33_v10 = vpop.permute.xlu0 %32 }
  0x85   :  { %v48_v18 = vpop.permute.xlu1 %47 }
  0x87   :  { %v38_v23 = vpop.permute.xlu0 %37 }
  0xdd   :  { %v208_v13 = vpop.f32.mrb[0].mxu0 }
  0xde   :  { %v122_v14 = vadd.f32 %v208_v13, %v43_v9  ;;  %v113_v16 = vpop.f32.mrb[1].mxu0 }
  0xdf   :  { %v114_v19 = vadd.f32 %v113_v16, %v33_v10  ;;  %v209_v21 = vpop.f32.mrb[2].mxu0 }
  0xe0   :  { %v125_v24 = vadd.f32 %v209_v21, %v48_v18  ;;  %v116_v25 = vpop.f32.mrb[3].mxu0  ;;  %v138_v27 = vadd.f32 %v184_v15, %v122_v14 }
  0xe1   :  { %v117_v26 = vadd.f32 %v116_v25, %v38_v23  ;;  %v136_v29 = vadd.f32 %v180_v20, %v114_v19 }
  0xe2   :  { %v139_v28 = vadd.f32 %v185_v17, %v125_v24 }
  0xe3   :  { %v137_v30 = vadd.f32 %v181_v22, %v117_v26 }
  0xe4   :  { %v194_v31 = vpack.c.bf16 %v139_v28, %v138_v27 }
  0xe5   :  { %v189_v32 = vpack.c.bf16 %v137_v30, %v136_v29 }
  0xe6   :  { %197 = vst [vmem:[%s285_s4 + $0x8] sm:$0xff] %v194_v31  }
  0xe7   :  { %190 = vst [vmem:[%s285_s4] sm:$0xff] %v189_v32  }

// kernel: backbone_with_fpn_forward.15
= control target key start
LH: loop header
LB: loop body
LE: loop exit
PB: predicated region body
PF: predicated region fallthrough
CT: control target
= control target key end

     0   :  { %v233_v1 = vmov 0   ;;  %vm88_vm0 = vcmask 523264   ;;  %vm172_vm1 = vcmask 257024   ;;  %s309_s1 = inlined_call_operand.vmem [shape: bf16[64,32], index: 1, kind: input, shape index: {}]   ;;  %s310_s0 = inlined_call_operand.vmem [shape: bf16[32,64], index: 0, kind: input, shape index: {}]   ;;  %s311_s2 = inlined_call_operand.vmem [shape: f32[32,1], index: 2, kind: input, shape index: {}]   ;;  %s312_s3 = inlined_call_operand.vmem [shape: bf16[32,32], index: 3, kind: input, shape index: {}]   ;;  %s313_s4 = inlined_call_operand.vmem [shape: bf16[32,32], index: 4, kind: output, shape index: {}]  }
   0x1   :  { %v227_v0 = vld [vmem:[%s309_s1] sm:$0xff]   ;;  %226 = vset.pattern.permute.xlu1 %v233_v1  ;;  %225 = vset.pattern.permute.xlu0 %v233_v1  ;;  %v228_v2 = vld [vmem:[%s309_s1 + $0x8] sm:$0xff]   ;;  %v229_v3 = vld [vmem:[%s309_s1 + $0x10] sm:$0xff]  }
   0x2   :  { %212 = vmatprep.subr.bf16.mxu0 %v227_v0  ;;  %v231_v4 = vld [vmem:[%s310_s0] sm:$0xff]   ;;  %v32_v5 = vld [vmem:[%s311_s2 + $0x10] sm:$0xff]  ;;  %v230_v7 = vld [vmem:[%s309_s1 + $0x18] sm:$0xff]  }
   0x3   :  { %213 = vmatpush3.bf16.msra.mxu0 %v227_v0  ;;  %220 = vmatprep.mubr.msk.bf16.mxu0 %vm88_vm0, %v231_v4  ;;  %v30_v6 = vld [vmem:[%s311_s2] sm:$0xff]  ;;  %v33_v8 = vld [vmem:[%s311_s2 + $0x18] sm:$0xff]  ;;  %v31_v9 = vld [vmem:[%s311_s2 + $0x8] sm:$0xff] }
   0x4   :  { %214 = vmatprep.subr.bf16.mxu0 %v228_v2  ;;  %46 = vperm.xlu1 %226, %v32_v5   ;;  %v232_v10 = vld [vmem:[%s310_s0 + $0x8] sm:$0xff]   ;;  %v198_v14 = vld [vmem:[%s312_s3] sm:$0xff]  }
   0x5   :  { %36 = vperm.xlu0 %225, %v30_v6   ;;  %v205_v12 = vld [vmem:[%s312_s3 + $0x8] sm:$0xff]   ;;  %v199_v17 = vunpack.c.l.bf16 %v198_v14  ;;  %v200_v24 = vunpack.c.h.bf16 %v198_v14 }
   0x6   :  { %v203_v15 = vunpack.c.l.bf16 %v205_v12  ;;  %v204_v20 = vunpack.c.h.bf16 %v205_v12 }
   0x7   :  { %215 = vmatpush3.bf16.msra.mxu0 %v228_v2 }
   0x8   :  { %216 = vmatprep.subr.bf16.mxu0 %v229_v3  ;;  %51 = vperm.xlu1 %226, %v33_v8  }
   0x9   :  { %41 = vperm.xlu0 %225, %v31_v9  }
   0xb   :  { %217 = vmatpush3.bf16.msra.mxu0 %v229_v3 }
   0xc   :  { %218 = vmatprep.subr.bf16.mxu0 %v230_v7 }
   0xf   :  { %219 = vmatpush3.bf16.msra.mxu0 %v230_v7 }
  0x12   :  { %221 = vmatmul.mubr.msk.bf16.vlgmr.msra.gmra.mrb[0].mxu0 %vm88_vm0, %v232_v10 }
  0x83   :  { %v47_v11 = vpop.permute.xlu1 %46 }
  0x84   :  { %v37_v13 = vpop.permute.xlu0 %36 }
  0x87   :  { %v52_v21 = vpop.permute.xlu1 %51 }
  0x88   :  { %v42_v25 = vpop.permute.xlu0 %41 }
  0xe5   :  { %v222_v16 = vpop.f32.mrb[0].mxu0 }
  0xe6   :  { %v138_v18 = vadd.f32 %v222_v16, %v47_v11  ;;  %v129_v19 = vpop.f32.mrb[1].mxu0 }
  0xe7   :  { %v130_v22 = vadd.f32 %v129_v19, %v37_v13  ;;  %v223_v23 = vpop.f32.mrb[2].mxu0 }
  0xe8   :  { %v154_v26 = vadd.f32 %v203_v15, %v138_v18  ;;  %v141_v27 = vadd.f32 %v223_v23, %v52_v21  ;;  %v132_v28 = vpop.f32.mrb[3].mxu0 }
  0xe9   :  { %v152_v29 = vadd.f32 %v199_v17, %v130_v22  ;;  %v133_v30 = vadd.f32 %v132_v28, %v42_v25 }
  0xea   :  { %v195_v31 = vpack.c.bf16 %v154_v26, %v154_v26  ;;  %v155_v32 = vadd.f32 %v204_v20, %v141_v27 }
  0xeb   :  { %v193_v33 = vpack.c.bf16 %v152_v29, %v152_v29  ;;  %v153_v34 = vadd.f32 %v200_v24, %v133_v30 }
  0xec   :  { %175 = vst.msk [vmem:[%s313_s4 + $0x8] sm:$0xf] %vm172_vm1, %v195_v31  ;;  %v196_v35 = vpack.c.bf16 %v155_v32, %v155_v32 }
  0xed   :  { %173 = vst.msk [vmem:[%s313_s4] sm:$0xf] %vm172_vm1, %v193_v33  ;;  %v194_v36 = vpack.c.bf16 %v153_v34, %v153_v34 }
  0xee   :  { %176 = vst.msk [vmem:[%s313_s4 + $0xc] sm:$0xf] %vm172_vm1, %v196_v35 }
  0xef   :  { %174 = vst.msk [vmem:[%s313_s4 + $0x4] sm:$0xf] %vm172_vm1, %v194_v36 }

// kernel: backbone_with_fpn_forward.17
= control target key start
LH: loop header
LB: loop body
LE: loop exit
PB: predicated region body
PF: predicated region fallthrough
CT: control target
= control target key end

     0   :  { %s1017_s12 = smov 0   ;;  %s1019_s13 = smov 0   ;;  %s1195_s0 = inlined_call_operand.vmem [shape: bf16[3,32,288], index: 0, kind: input, shape index: {}]   ;;  %s1196_s1 = inlined_call_operand.vmem [shape: bf16[288,384], index: 1, kind: input, shape index: {}]   ;;  %s1197_s2 = inlined_call_operand.vmem [shape: f32[3,32,1], index: 2, kind: input, shape index: {}]   ;;  %s1198_s3 = inlined_call_operand.vmem [shape: f32[32,384], index: 3, kind: output, shape index: {}]  }
   0x1   :  { %s1021_s14 = smov 0  }
   0x2 LB: > { %s1033_s15 = sadd.s32 4294967295, %s994_s14   ;;  %s1036_s16 = sadd.s32 1, %s994_s14   ;;  %s994_s14 = sphi %s1021_s14, %s1202_s14   ;;  %s990_s13 = sphi %s1019_s13, %s1201_s13   ;;  %s986_s12 = sphi %s1017_s12, %s1200_s12  }
   0x3   : > { %s43_s17 = ssub.s32 %s994_s14, %s1036_s16  ;;  %s46_s18 = sadd.s32 1, %s990_s13 }
   0x4   : > { %p44_p0 = scmp.eq.s32.totalorder %s43_s17, 0  ;;  %p53_p1 = scmp.ne.s32.totalorder %s990_s13, %s986_s12 }
   0x5   : > { %p54_p2 = scmp.eq.s32.totalorder %s994_s14, 0  ;;  %p109_p3 = scmp.eq.s32.totalorder %s1033_s15, 2 }
   0x6   : > { %s1046_s19 = scalar_select %p44_p0, %s990_s13, %s46_s18  }
   0x7   : > { %p55_p4 = por %p54_p2, %p53_p1  ;;  %p1048_p5 = por %p109_p3, %p53_p1 }
   0x8   : > { %p838_p6 = scmp.ge.s32.totalorder %s994_s14, 3 }
   0xa   : > { %131 = sbr.rel (%p838_p6) target bundleno = 45 (0x2d), region = 16 }
  0x11   : > { %142 = sbr.rel (!%p55_p4) target bundleno = 45 (0x2d), region = 24  ;;  %s144_s21 = sand.u32 (%p55_p4), 1, %s990_s13  }
  0x12   : > { %s839_s22 = sshll.u32 (%p55_p4), %s994_s14, 2  ;;  %s916_s23 = smul.u32 (%p55_p4), 144, %s144_s21 }
  0x13   : > { %s1058_s26 = scalar_lea.vmem (%p55_p4), %s1196_s1, %s839_s22 }
  0x14   : > { %v164_v0 = vld [vmem:[%s1058_s26] sm:$0xf] (%p55_p4)  ;;  %v166_v1 = vld [vmem:[%s1058_s26 + $0xc] sm:$0xf] (%p55_p4)  ;;  %v168_v2 = vld [vmem:[%s1058_s26 + $0x18] sm:$0xf] (%p55_p4) }
  0x15   : > { %v170_v3 = vld [vmem:[%s1058_s26 + $0x24] sm:$0xf] (%p55_p4)  ;;  %v172_v4 = vld [vmem:[%s1058_s26 + $0x30] sm:$0xf] (%p55_p4)  ;;  %s1065_s27 = scalar_lea.vmem (%p55_p4), [#allocation2], %s916_s23 }
  0x16   : > { %165 = vst [vmem:[%s1065_s27] sm:$0xf] (%p55_p4), %v164_v0  ;;  %167 = vst [vmem:[%s1065_s27 + $0x4] sm:$0xf] (%p55_p4), %v166_v1  ;;  %v174_v5 = vld [vmem:[%s1058_s26 + $0x3c] sm:$0xf] (%p55_p4) }
  0x17   : > { %169 = vst [vmem:[%s1065_s27 + $0x8] sm:$0xf] (%p55_p4), %v168_v2  ;;  %171 = vst [vmem:[%s1065_s27 + $0xc] sm:$0xf] (%p55_p4), %v170_v3  ;;  %v176_v6 = vld [vmem:[%s1058_s26 + $0x48] sm:$0xf] (%p55_p4) }
  0x18   : > { %173 = vst [vmem:[%s1065_s27 + $0x10] sm:$0xf] %v172_v4  ;;  %v178_v7 = vld [vmem:[%s1058_s26 + $0x54] sm:$0xf]  ;;  %175 = vst [vmem:[%s1065_s27 + $0x14] sm:$0xf] %v174_v5 }
  0x19   : > { %177 = vst [vmem:[%s1065_s27 + $0x18] sm:$0xf] %v176_v6  ;;  %179 = vst [vmem:[%s1065_s27 + $0x1c] sm:$0xf] %v178_v7  ;;  %v180_v8 = vld [vmem:[%s1058_s26 + $0x60] sm:$0xf] }
  0x1a   : > { %v182_v9 = vld [vmem:[%s1058_s26 + $0x6c] sm:$0xf]  ;;  %v184_v10 = vld [vmem:[%s1058_s26 + $0x78] sm:$0xf]  ;;  %181 = vst [vmem:[%s1065_s27 + $0x20] sm:$0xf] %v180_v8 }
  0x1b   : > { %183 = vst [vmem:[%s1065_s27 + $0x24] sm:$0xf] %v182_v9  ;;  %185 = vst [vmem:[%s1065_s27 + $0x28] sm:$0xf] %v184_v10  ;;  %v186_v11 = vld [vmem:[%s1058_s26 + $0x84] sm:$0xf] }
  0x1c   : > { %v188_v12 = vld [vmem:[%s1058_s26 + $0x90] sm:$0xf]  ;;  %v190_v13 = vld [vmem:[%s1058_s26 + $0x9c] sm:$0xf]  ;;  %187 = vst [vmem:[%s1065_s27 + $0x2c] sm:$0xf] %v186_v11 }
  0x1d   : > { %189 = vst [vmem:[%s1065_s27 + $0x30] sm:$0xf] %v188_v12  ;;  %191 = vst [vmem:[%s1065_s27 + $0x34] sm:$0xf] %v190_v13  ;;  %v192_v14 = vld [vmem:[%s1058_s26 + $0xa8] sm:$0xf] }
  0x1e   : > { %v194_v15 = vld [vmem:[%s1058_s26 + $0xb4] sm:$0xf]  ;;  %v196_v16 = vld [vmem:[%s1058_s26 + $0xc0] sm:$0xf]  ;;  %193 = vst [vmem:[%s1065_s27 + $0x38] sm:$0xf] %v192_v14 }
  0x1f   : > { %195 = vst [vmem:[%s1065_s27 + $0x3c] sm:$0xf] %v194_v15  ;;  %197 = vst [vmem:[%s1065_s27 + $0x40] sm:$0xf] %v196_v16  ;;  %v198_v17 = vld [vmem:[%s1058_s26 + $0xcc] sm:$0xf] }
  0x20   : > { %v200_v18 = vld [vmem:[%s1058_s26 + $0xd8] sm:$0xf]  ;;  %v202_v19 = vld [vmem:[%s1058_s26 + $0xe4] sm:$0xf]  ;;  %199 = vst [vmem:[%s1065_s27 + $0x44] sm:$0xf] %v198_v17 }
  0x21   : > { %201 = vst [vmem:[%s1065_s27 + $0x48] sm:$0xf] %v200_v18  ;;  %203 = vst [vmem:[%s1065_s27 + $0x4c] sm:$0xf] %v202_v19  ;;  %v204_v20 = vld [vmem:[%s1058_s26 + $0xf0] sm:$0xf] }
  0x22   : > { %v206_v21 = vld [vmem:[%s1058_s26 + $0xfc] sm:$0xf]  ;;  %v208_v22 = vld [vmem:[%s1058_s26 + $0x108] sm:$0xf]  ;;  %205 = vst [vmem:[%s1065_s27 + $0x50] sm:$0xf] %v204_v20 }
  0x23   : > { %207 = vst [vmem:[%s1065_s27 + $0x54] sm:$0xf] %v206_v21  ;;  %209 = vst [vmem:[%s1065_s27 + $0x58] sm:$0xf] %v208_v22  ;;  %v210_v23 = vld [vmem:[%s1058_s26 + $0x114] sm:$0xf] }
  0x24   : > { %v212_v24 = vld [vmem:[%s1058_s26 + $0x120] sm:$0xf]  ;;  %v214_v25 = vld [vmem:[%s1058_s26 + $0x12c] sm:$0xf]  ;;  %211 = vst [vmem:[%s1065_s27 + $0x5c] sm:$0xf] %v210_v23 }
  0x25   : > { %213 = vst [vmem:[%s1065_s27 + $0x60] sm:$0xf] %v212_v24  ;;  %215 = vst [vmem:[%s1065_s27 + $0x64] sm:$0xf] %v214_v25  ;;  %v216_v26 = vld [vmem:[%s1058_s26 + $0x138] sm:$0xf] }
  0x26   : > { %v218_v27 = vld [vmem:[%s1058_s26 + $0x144] sm:$0xf]  ;;  %v220_v28 = vld [vmem:[%s1058_s26 + $0x150] sm:$0xf]  ;;  %217 = vst [vmem:[%s1065_s27 + $0x68] sm:$0xf] %v216_v26 }
  0x27   : > { %219 = vst [vmem:[%s1065_s27 + $0x6c] sm:$0xf] %v218_v27  ;;  %221 = vst [vmem:[%s1065_s27 + $0x70] sm:$0xf] %v220_v28  ;;  %v222_v29 = vld [vmem:[%s1058_s26 + $0x15c] sm:$0xf] }
  0x28   : > { %v224_v30 = vld [vmem:[%s1058_s26 + $0x168] sm:$0xf]  ;;  %v226_v31 = vld [vmem:[%s1058_s26 + $0x174] sm:$0xf]  ;;  %223 = vst [vmem:[%s1065_s27 + $0x74] sm:$0xf] %v222_v29 }
  0x29   : > { %225 = vst [vmem:[%s1065_s27 + $0x78] sm:$0xf] %v224_v30  ;;  %227 = vst [vmem:[%s1065_s27 + $0x7c] sm:$0xf] %v226_v31  ;;  %v228_v32 = vld [vmem:[%s1058_s26 + $0x180] sm:$0xf] }
  0x2a   : > { %v230_v33 = vld [vmem:[%s1058_s26 + $0x18c] sm:$0xf]  ;;  %v232_v34 = vld [vmem:[%s1058_s26 + $0x198] sm:$0xf]  ;;  %229 = vst [vmem:[%s1065_s27 + $0x80] sm:$0xf] %v228_v32 }
  0x2b   : > { %231 = vst [vmem:[%s1065_s27 + $0x84] sm:$0xf] %v230_v33  ;;  %233 = vst [vmem:[%s1065_s27 + $0x88] sm:$0xf] %v232_v34  ;;  %v234_v35 = vld [vmem:[%s1058_s26 + $0x1a4] sm:$0xf] }
  0x2c   : > { %235 = vst [vmem:[%s1065_s27 + $0x8c] sm:$0xf] %v234_v35 }
  0x2d PF: > { %p840_p7 = scmp.ge.s32.totalorder %s994_s14, 1  ;;  %p337_p8 = scmp.lt.s32.totalorder %s994_s14, 4 }
  0x2f   : > { %p338_p9 = pnand %p840_p7, %p337_p8 }
  0x30   : > { %s344_s28 = sand.u32 (!%p338_p9), 1, %s986_s12   ;;  %v996_v36 = vmov (!%p338_p9), 0   ;;  %p376_p10 = scmp.lt.s32.totalorder (!%p338_p9), %s1033_s15, 2  ;;  %vm593_vm0 = vcmask (!%p338_p9), 261120  }
  0x31   : > { %341 = sbr.rel (%p338_p9) target bundleno = 324 (0x144), region = 69  ;;  %944 = vset.pattern.permute.xlu0 (!%p338_p9), %v996_v36  ;;  %945 = vset.pattern.permute.xlu1 (!%p338_p9), %v996_v36  ;;  %s841_s17 = sshll.u32 (!%p338_p9), %s344_s28, 5 }
  0x32   : > { %s917_s29 = smul.u32 (!%p338_p9), 144, %s344_s28  ;;  %s375_s18 = scalar_lea.vmem (!%p338_p9), [#allocation3], %s841_s17 }
  0x34   : > { %s1139_s30 = scalar_lea.vmem (!%p338_p9), [#allocation2], %s917_s29 }
  0x35   : > { %v946_v37 = vld [vmem:[%s1139_s30 + $0x40] sm:$0xff] (!%p338_p9)   ;;  %v948_v39 = vld [vmem:[%s1139_s30 + $0x48] sm:$0xff] (!%p338_p9)   ;;  %v950_v41 = vld [vmem:[%s1139_s30 + $0x50] sm:$0xff] (!%p338_p9)  }
  0x36   : > { %v947_v38 = vld [vmem:[%s1139_s30] sm:$0xff] (!%p338_p9)   ;;  %876 = vmatprep.subr.bf16.mxu0 (!%p338_p9), %v946_v37  ;;  %v949_v40 = vld [vmem:[%s1139_s30 + $0x8] sm:$0xff] (!%p338_p9)   ;;  %v951_v42 = vld [vmem:[%s1139_s30 + $0x10] sm:$0xff] (!%p338_p9)  }
  0x37   : > { %877 = vmatpush3.bf16.msra.mxu0 (!%p338_p9), %v947_v38  ;;  %v952_v43 = vld [vmem:[%s1139_s30 + $0x58] sm:$0xff] (!%p338_p9)   ;;  %v954_v45 = vld [vmem:[%s1139_s30 + $0x60] sm:$0xff] (!%p338_p9)   ;;  %v956_v48 = vld [vmem:[%s1139_s30 + $0x68] sm:$0xff] (!%p338_p9)  }
  0x38   : > { %878 = vmatprep.subr.bf16.mxu0 %v948_v39  ;;  %s377_s4 = scalar_select %p376_p10, %s1033_s15, 2  ;;  %v953_v44 = vld [vmem:[%s1139_s30 + $0x18] sm:$0xff]   ;;  %v955_v46 = vld [vmem:[%s1139_s30 + $0x20] sm:$0xff]   ;;  %v957_v49 = vld [vmem:[%s1139_s30 + $0x28] sm:$0xff]  }
  0x39   : > { %v961_v47 = vld [vmem:[%s1139_s30 + $0x80] sm:$0xff]   ;;  %v958_v50 = vld [vmem:[%s1139_s30 + $0x70] sm:$0xff]   ;;  %v966_v52 = vld [vmem:[%s1139_s30 + $0x88] sm:$0xff]   ;;  %s872_s12 = sshll.u32 (%p1048_p5), %s1033_s15, 3 }
  0x3a   : > { %s918_s5 = smul.u32 48, %s377_s4  ;;  %s875_s9 = sshll.u32 %s377_s4, 5  ;;  %908 = vmatprep.subr.bf16.mxu1 %v961_v47  ;;  %v959_v56 = vld [vmem:[%s1139_s30 + $0x30] sm:$0xff]   ;;  %v960_v58 = vld [vmem:[%s1139_s30 + $0x78] sm:$0xff]  }
  0x3b   : > { %879 = vmatpush3.bf16.msra.mxu0 %v949_v40  ;;  %909 = vmatpush3.bf16.msra.mxu1 %v961_v47  ;;  %s385_s14 = scalar_lea.vmem %s1197_s2, %s875_s9  ;;  %v962_v61 = vld [vmem:[%s1139_s30 + $0x38] sm:$0xff]   ;;  %s710_s23 = scalar_lea.vmem (%p1048_p5), %s1198_s3, %s872_s12 }
  0x3c   : > { %880 = vmatprep.subr.bf16.mxu0 %v950_v41  ;;  %s1157_s8 = scalar_lea.vmem %s1195_s0, %s918_s5  ;;  %910 = vmatprep.subr.bf16.mxu1 %v966_v52  ;;  %v431_v55 = vld [vmem:[%s385_s14] sm:$0xff]  ;;  %v433_v57 = vld [vmem:[%s385_s14 + $0x10] sm:$0xff]  ;;  %v432_v59 = vld [vmem:[%s385_s14 + $0x8] sm:$0xff] }
  0x3d   : > { %v965_v51 = vld [vmem:[%s1157_s8 + $0x4] ss:$12 sps:$4 sm:$0xff]   ;;  %v967_v53 = vld [vmem:[%s1157_s8 + $0x8] ss:$12 sps:$4 sm:$0xff]   ;;  %v968_v54 = vld [vmem:[%s1157_s8 + $0x20] ss:$12 sps:$4 sm:$0xff]   ;;  %437 = vperm.xlu0 %944, %v431_v55   ;;  %447 = vperm.xlu1 %945, %v433_v57  }
  0x3e   : > { %632 = vmatprep.mubr.bf16.mxu0 %v965_v51  ;;  %912 = vmatprep.mubr.msk.bf16.mxu1 %vm593_vm0, %v967_v53  ;;  %v434_v60 = vld [vmem:[%s385_s14 + $0x18] sm:$0xff]  ;;  %v963_v62 = vld [vmem:[%s1157_s8] ss:$12 sps:$4 sm:$0xff]  }
  0x3f   : > { %881 = vmatpush3.bf16.msra.mxu0 %v951_v42  ;;  %911 = vmatpush3.bf16.msra.mxu1 %v966_v52  ;;  %v969_v63 = vld [vmem:[%s1157_s8 + $0x1c] ss:$12 sps:$4 sm:$0xff]   ;;  %v971_v0 = vld [vmem:[%s1157_s8 + $0x18] ss:$12 sps:$4 sm:$0xff]  }
  0x40   : > { %882 = vmatprep.subr.bf16.mxu0 %v952_v43 }
  0x41   : > { %442 = vperm.xlu0 %944, %v432_v59   ;;  %452 = vperm.xlu1 %945, %v434_v60  }
  0x42   : > { %913 = vmatmul.mubr.msk.bf16.vlgmr.msra.gmra.mrb[0].mxu1 %vm593_vm0, %v968_v54 }
  0x43   : > { %883 = vmatpush3.bf16.msra.mxu0 %v953_v44 }
  0x44   : > { %884 = vmatprep.subr.bf16.mxu0 %v954_v45 }
  0x47   : > { %885 = vmatpush3.bf16.msra.mxu0 %v955_v46 }
  0x48   : > { %886 = vmatprep.subr.bf16.mxu0 %v956_v48 }
  0x4b   : > { %887 = vmatpush3.bf16.msra.mxu0 %v957_v49 }
  0x4c   : > { %888 = vmatprep.subr.bf16.mxu0 %v958_v50 }
  0x4f   : > { %889 = vmatpush3.bf16.msra.mxu0 %v959_v56 }
  0x50   : > { %890 = vmatprep.subr.bf16.mxu0 %v960_v58 }
  0x53   : > { %891 = vmatpush3.bf16.msra.mxu0 %v962_v61 }
  0x56   : > { %633 = vmatmul.mubr.bf16.vlgmr.msra.gmra.mrb[0].mxu0 %v963_v62 }
  0x57   : > { %640 = vmatprep.mubr.bf16.mxu0 %v969_v63 }
  0x5e   : > { %641 = vmatmul.mubr.bf16.gmra.mrb[4].mxu0 %v971_v0 }
  0xbc   : > { %v438_v5 = vpop.permute.xlu0 %437  ;;  %v448_v16 = vpop.permute.xlu1 %447 }
  0xc0   : > { %v443_v11 = vpop.permute.xlu0 %442  ;;  %v453_v25 = vpop.permute.xlu1 %452 }
 0x115   : > { %v914_v1 = vpop.f32.mrb[0].mxu1 }
 0x116   : > { %v683_v2 = vpop.f32.mrb[1].mxu1 }
 0x117   : > { %v915_v3 = vpop.f32.mrb[2].mxu1 }
 0x118   : > { %v686_v4 = vpop.f32.mrb[3].mxu1 }
 0x129   : > { %v892_v6 = vpop.f32.mrb[0].mxu0 }
 0x12a   : > { %v893_v7 = vpop.f32.mrb[1].mxu0 }
 0x12b   : > { %v894_v8 = vadd.f32 %v893_v7, %v892_v6  ;;  %v895_v9 = vpop.f32.mrb[2].mxu0 }
 0x12c   : > { %v896_v10 = vpop.f32.mrb[3].mxu0 }
 0x12d   : > { %v897_v12 = vadd.f32 %v896_v10, %v895_v9  ;;  %v635_v13 = vadd.f32 %v894_v8, %v438_v5 }
 0x12f   : > { %v638_v14 = vadd.f32 %v897_v12, %v443_v11  ;;  %v684_v15 = vadd.f32 %v683_v2, %v635_v13 }
 0x131   : > { %698 = vst [vmem:[%s375_s18] sm:$0xff] %v684_v15  ;;  %v687_v17 = vadd.f32 %v686_v4, %v638_v14  ;;  %v898_v18 = vpop.f32.mrb[4].mxu0 }
 0x132   : > { %v899_v19 = vpop.f32.mrb[5].mxu0 }
 0x133   : > { %699 = vst [vmem:[%s375_s18 + $0x8] sm:$0xff] %v687_v17  ;;  %v900_v20 = vadd.f32 %v899_v19, %v898_v18  ;;  %v901_v21 = vpop.f32.mrb[6].mxu0 }
 0x134   : > { %v902_v22 = vpop.f32.mrb[7].mxu0 }
 0x135   : > { %v643_v23 = vadd.f32 %v900_v20, %v448_v16  ;;  %v903_v24 = vadd.f32 %v902_v22, %v901_v21  ;;  %708 = sbr.rel (!%p1048_p5) target bundleno = 324 (0x144), region = 77 }
 0x137   : > { %v692_v26 = vadd.f32 %v914_v1, %v643_v23  ;;  %v646_v27 = vadd.f32 %v903_v24, %v453_v25 }
 0x138   : > { %v744_v29 = vld [vmem:[%s375_s18] sm:$0xff] (%p1048_p5) }
 0x139   : > { %700 = vst [vmem:[%s375_s18 + $0x10] sm:$0xff] %v692_v26  ;;  %v695_v28 = vadd.f32 %v915_v3, %v646_v27  ;;  %745 = vst [vmem:[%s710_s23] sm:$0xff] (%p1048_p5), %v744_v29 }
 0x13a   : > { %v746_v30 = vld [vmem:[%s375_s18 + $0x8] sm:$0xff] (%p1048_p5) }
 0x13b   : > { %701 = vst [vmem:[%s375_s18 + $0x18] sm:$0xff] %v695_v28  ;;  %747 = vst [vmem:[%s710_s23 + $0x18] sm:$0xff] (%p1048_p5), %v746_v30 }
 0x140   : > { %v748_v31 = vld [vmem:[%s375_s18 + $0x10] sm:$0xff] }
 0x141   : > { %749 = vst [vmem:[%s710_s23 + $0x30] sm:$0xff] %v748_v31 }
 0x142   : > { %v750_v32 = vld [vmem:[%s375_s18 + $0x18] sm:$0xff] }
 0x143   : > { %751 = vst [vmem:[%s710_s23 + $0x48] sm:$0xff] %v750_v32 }
 0x144 PF: > { %p10_p11 = scmp.ge.s32.totalorder %s1036_s16, 5   ;;  %s1200_s12 = smov %s990_s13 }
 0x145   : > { %s1201_s13 = smov %s1046_s19  ;;  %s1202_s14 = smov %s1036_s16 }
 0x146   :  { %12 = sbr.rel (!%p10_p11) target bundleno = 2 (0x2), region = 152 }

</bundles_post_ra>
